<compile_context>
chip_gen: v7x
topology: tpu7x:2x2x1
jax: 0.10.0
libtpu: 0.0.40
codegen_flags: <defaults>
</compile_context>

<pallas_src>
import math
import functools

import numpy as np
import jax
import jax.numpy as jnp
from jax.experimental import pallas as pl
from jax.experimental.pallas import tpu as pltpu

_LOG_2PI = math.log(2.0 * math.pi)
NEG = -1.0e30   # finite "minus infinity" for padded leaf columns (no inf/nan math)


def _round_up(a, m):
    return (a + m - 1) // m * m


# ----------------------------------------------------------------------------- kernel
def ratspn_kernel(x_ref, a_ref, c_ref, perm_ref, e1_ref, e2_ref, wbd_ref,
                  wroot_ref, out_ref, *, half):
    f32 = jnp.float32
    hi = jax.lax.Precision.HIGHEST

    x = x_ref[...]                                        # (TB, F)
    feats = jnp.concatenate([x * x, x], axis=-1)          # (TB, 2F)

    # Gaussian leaves + feature-partition products: one fused MXU matmul.
    # Left products in lanes [0, half), right in [half, 2*half); each repetition
    # owns a 16-lane group, pad lanes carry NEG so their exp() is exactly 0.
    p = jnp.dot(feats, a_ref[...], precision=hi,
                preferred_element_type=f32) + c_ref[...]  # (TB, 2*half)
    p_left = p[:, :half]
    p_right = p[:, half:]

    # Per-repetition max of the right half, broadcast over its 16-lane group.
    # Hypercube butterfly: each step is a dense permutation matmul (lane XOR)
    # followed by a VPU max - no narrow slices / concats / rolls.
    g = p_right
    for k in range(perm_ref.shape[0]):
        g = jnp.maximum(g, jnp.dot(g, perm_ref[k], preferred_element_type=f32))
    mrb = g                                               # (TB, half)

    # Linear-domain carry: el * er == exp(p_left + p_right - m2) with
    # m2 = max_r (max_i p_left[r] + max_j p_right[r])  -> no overflow, and the
    # clamp only guards garbage pad-group lanes (excluded by the 0/1 expansions).
    q = p_left + mrb
    m2 = jnp.max(q, axis=-1, keepdims=True)               # (TB, 1)
    el = jnp.exp(q - m2)                                  # <= 1
    er = jnp.exp(jnp.minimum(p_right - mrb, 60.0))        # ~<= 1

    # Cross product + all R sum nodes: expand each half onto the (rep, i, j)
    # axis with 0/1 matmuls, multiply, then one block-diagonal matmul giving a
    # lane-dense (TB, 128) sum-layer output.
    el_rep = jnp.dot(el, e1_ref[...], preferred_element_type=f32)   # (TB, KBD)
    er_rep = jnp.dot(er, e2_ref[...], preferred_element_type=f32)   # (TB, KBD)
    v = jnp.dot(el_rep * er_rep, wbd_ref[...],
                preferred_element_type=f32)                          # (TB, CP)

    # Root sum node + final .exp(), still in the linear domain; lane-dense store.
    root = jnp.dot(v, wroot_ref[...], precision=hi,
                   preferred_element_type=f32)                       # (TB, CP)
    out_ref[...] = jnp.exp(m2) * root


# ----------------------------------------------------------------------------- host-side parameter folding
def prepare_ratspn_params(mu, log_sigma, mask_left, w_sum, w_root, *, R, I, S, C):
    """Fold RAT-SPN parameters into MXU-friendly, lane-aligned matrices."""
    mu64 = np.asarray(mu, np.float64)
    ls64 = np.asarray(log_sigma, np.float64)
    mleft = np.asarray(mask_left, np.float64)
    RI, F = mu64.shape
    assert RI == R * I

    ip = max(8, 1 << (I - 1).bit_length())        # leaves per rep, padded (10 -> 16)
    half = _round_up(R * ip, 128)                 # lanes per partition half (-> 256)
    kbd = _round_up(R * I * I, 128)               # cross-product width (1000 -> 1024)
    cp = _round_up(max(R * S, C), 128)            # sum-layer / class width (-> 128)

    inv_var = np.exp(-2.0 * ls64)
    const = -0.5 * mu64 * mu64 * inv_var - ls64 - 0.5 * _LOG_2PI

    A = np.zeros((2 * F, 2 * half), np.float64)
    c = np.full((1, 2 * half), NEG, np.float64)
    for side, msk in ((0, mleft), (1, 1.0 - mleft)):
        for r in range(R):
            for i in range(I):
                n = r * I + i
                col = side * half + r * ip + i
                A[:F, col] = -0.5 * inv_var[n] * msk[n]        # x^2 coefficients
                A[F:, col] = mu64[n] * inv_var[n] * msk[n]     # x coefficients
                c[0, col] = float(np.sum(const[n] * msk[n]))

    # 0/1 expansions onto the (rep, i, j) axis and block-diagonal sum weights.
    E1 = np.zeros((half, kbd), np.float32)
    E2 = np.zeros((half, kbd), np.float32)
    Wbd = np.zeros((kbd, cp), np.float32)
    ws = np.asarray(w_sum, np.float64).reshape(R, I, I, S)
    for r in range(R):
        for i in range(I):
            for j in range(I):
                col = r * I * I + i * I + j
                E1[r * ip + i, col] = 1.0
                E2[r * ip + j, col] = 1.0
                Wbd[col, r * S:(r + 1) * S] = ws[r, i, j]

    wroot = np.zeros((cp, cp), np.float32)
    wroot[:R * S, :C] = np.asarray(w_root, np.float32)

    # Lane-XOR permutation matrices for the per-rep max butterfly.
    n_steps = int(math.log2(ip))
    perms = np.zeros((n_steps, half, half), np.float32)
    idx = np.arange(half)
    for k in range(n_steps):
        perms[k, idx, idx ^ (1 << k)] = 1.0

    to32 = lambda a: jnp.asarray(a, jnp.float32)
    return (to32(A), to32(c), to32(perms), to32(E1), to32(E2), to32(Wbd),
            to32(wroot), half, cp)


# ----------------------------------------------------------------------------- wrapper
def rat_spn_forward(x, mu, log_sigma, mask_left, w_sum, w_root, *, R, I, S, C,
                    batch_tile=1024):
    B, F = x.shape
    (A, c, perms, E1, E2, Wbd, wroot, half, cp) = prepare_ratspn_params(
        mu, log_sigma, mask_left, w_sum, w_root, R=R, I=I, S=S, C=C)

    batch_tile = max(8, _round_up(batch_tile, 8))
    # Always >= 2 grid steps so ("parallel",) can shard across v7x's 2 TCs.
    tb = min(batch_tile, max(8, _round_up(pl.cdiv(B, 2), 8)))
    steps = max(2, pl.cdiv(B, tb))
    b_pad = steps * tb
    x_in = jnp.pad(x, ((0, b_pad - B), (0, 0))) if b_pad != B else x
    x_in = x_in.astype(jnp.float32)

    kernel = functools.partial(ratspn_kernel, half=half)
    out = pl.pallas_call(
        kernel,
        out_shape=jax.ShapeDtypeStruct((b_pad, cp), jnp.float32),
        grid=(steps,),
        in_specs=[
            pl.BlockSpec((tb, F), lambda i: (i, 0)),            # x (batch tiled)
            pl.BlockSpec(A.shape, lambda i: (0, 0)),            # fused leaf weights
            pl.BlockSpec(c.shape, lambda i: (0, 0)),            # leaf bias / pads
            pl.BlockSpec(perms.shape, lambda i: (0, 0, 0)),     # lane-XOR perms
            pl.BlockSpec(E1.shape, lambda i: (0, 0)),           # left expansion
            pl.BlockSpec(E2.shape, lambda i: (0, 0)),           # right expansion
            pl.BlockSpec(Wbd.shape, lambda i: (0, 0)),          # block-diag sum weights
            pl.BlockSpec(wroot.shape, lambda i: (0, 0)),        # padded root weights
        ],
        out_specs=pl.BlockSpec((tb, cp), lambda i: (i, 0)),
        compiler_params=pltpu.CompilerParams(
            dimension_semantics=("parallel",),
            vmem_limit_bytes=48 * 1024 * 1024),
    )(x_in, A, c, perms, E1, E2, Wbd, wroot)
    return out[:B, :C]


# ----------------------------------------------------------------------------- pure-JAX reference
def ref_log_forward(x, mu, log_sigma, mask_left, w_sum, w_root, *, R, I, S, C):
    """Pure-JAX reference (log-space class scores), dense formulation."""
    B, F = x.shape
    inv_sigma = jnp.exp(-log_sigma)
    z = (x[:, None, :] - mu[None, :, :]) * inv_sigma[None, :, :]
    ll = -0.5 * z * z - log_sigma[None, :, :] - 0.5 * _LOG_2PI        # (B, R*I, F)
    p_left = jnp.sum(ll * mask_left[None], axis=-1).reshape(B, R, I)
    p_right = jnp.sum(ll * (1.0 - mask_left)[None], axis=-1).reshape(B, R, I)
    cp = (p_left[:, :, :, None] + p_right[:, :, None, :]).reshape(B, R, I * I)
    s = jax.scipy.special.logsumexp(
        cp[:, :, :, None] + jnp.log(w_sum)[None, :, :, :], axis=2)    # (B, R, S)
    s = s.reshape(B, R * S)
    root = jax.scipy.special.logsumexp(
        s[:, :, None] + jnp.log(w_root)[None, :, :], axis=1)          # (B, C)
    return root


if __name__ == "__main__":
    # small shapes consistent with RatSPN(num_features=16, classes=4,
    # leaves=10, sums=10, num_splits=10)
    B, F, C = 2, 16, 4
    I, S, R = 10, 10, 10   # leaves, sums, num_splits (module defaults)

    key = jax.random.PRNGKey(0)
    k_mu, k_sig, k_mask, k_sum, k_root, k_x = jax.random.split(key, 6)

    mu = 0.5 * jax.random.normal(k_mu, (R * I, F), jnp.float32)
    log_sigma = 0.1 * jax.random.normal(k_sig, (R * I, F), jnp.float32)

    # deterministic random feature partition per repetition, repeated per leaf
    mask_rows = []
    for r, kr in enumerate(jax.random.split(k_mask, R)):
        perm = jax.random.permutation(kr, F)
        mask_rows.append(jnp.zeros((F,), jnp.float32).at[perm[:F // 2]].set(1.0))
    mask_left = jnp.repeat(jnp.stack(mask_rows, axis=0), I, axis=0)   # (R*I, F)

    sum_logits = jax.random.normal(k_sum, (R, S, I * I), jnp.float32)
    w_sum = jnp.transpose(jax.nn.softmax(sum_logits, axis=-1), (0, 2, 1))  # (R, I*I, S)

    root_logits = jax.random.normal(k_root, (C, R * S), jnp.float32)
    w_root = jnp.transpose(jax.nn.softmax(root_logits, axis=-1), (1, 0))   # (R*S, C)

    x = jax.random.normal(k_x, (B, F), jnp.float32)

    out = rat_spn_forward(x, mu, log_sigma, mask_left, w_sum, w_root,
                          R=R, I=I, S=S, C=C)
    out = jax.block_until_ready(out)

    assert out.shape == (B, C) and out.dtype == jnp.float32
    assert bool(jnp.all(jnp.isfinite(out))) and bool(jnp.all(out > 0.0))

    # correctness vs pure-JAX reference (log-space)
    ref_log = ref_log_forward(x, mu, log_sigma, mask_left, w_sum, w_root,
                              R=R, I=I, S=S, C=C)
    assert bool(jnp.allclose(jnp.log(out), ref_log, atol=0.1, rtol=0.0)), (
        jnp.log(out), ref_log)

    print("KERNEL_OK")
</pallas_src>

<mosaic_0001>
module attributes {stable_mosaic.version = 11 : i64} {
  func.func @ratspn_kernel(%arg0: i32, %arg1: memref<8x16xf32, #tpu.memory_space<vmem>>, %arg2: memref<32x512xf32, #tpu.memory_space<vmem>>, %arg3: memref<1x512xf32, #tpu.memory_space<vmem>>, %arg4: memref<4x256x256xf32, #tpu.memory_space<vmem>>, %arg5: memref<256x1024xf32, #tpu.memory_space<vmem>>, %arg6: memref<256x1024xf32, #tpu.memory_space<vmem>>, %arg7: memref<1024x128xf32, #tpu.memory_space<vmem>>, %arg8: memref<128x128xf32, #tpu.memory_space<vmem>>, %arg9: memref<8x128xf32, #tpu.memory_space<vmem>>) attributes {dimension_semantics = [#tpu.dimension_semantics<parallel>], iteration_bounds = array<i64: 2>, scalar_prefetch = 0 : i64, scratch_operands = 0 : i64, tpu.core_type = #tpu.core_type<tc>, window_params = [{transform_indices = @transform_0, window_bounds = array<i64: 8, 16>}, {pipeline_mode = #tpu.pipeline_mode<synchronous>, transform_indices = @transform_1, window_bounds = array<i64: 32, 512>}, {pipeline_mode = #tpu.pipeline_mode<synchronous>, transform_indices = @transform_2, window_bounds = array<i64: 1, 512>}, {pipeline_mode = #tpu.pipeline_mode<synchronous>, transform_indices = @transform_3, window_bounds = array<i64: 4, 256, 256>}, {pipeline_mode = #tpu.pipeline_mode<synchronous>, transform_indices = @transform_4, window_bounds = array<i64: 256, 1024>}, {pipeline_mode = #tpu.pipeline_mode<synchronous>, transform_indices = @transform_5, window_bounds = array<i64: 256, 1024>}, {pipeline_mode = #tpu.pipeline_mode<synchronous>, transform_indices = @transform_6, window_bounds = array<i64: 1024, 128>}, {pipeline_mode = #tpu.pipeline_mode<synchronous>, transform_indices = @transform_7, window_bounds = array<i64: 128, 128>}, {transform_indices = @transform_8, window_bounds = array<i64: 8, 128>}]} {
    %c0 = arith.constant 0 : index
    %c0_0 = arith.constant 0 : index
    %0 = vector.load %arg1[%c0, %c0_0] : memref<8x16xf32, #tpu.memory_space<vmem>>, vector<8x16xf32>
    %1 = arith.mulf %0, %0 : vector<8x16xf32>
    %2 = tpu.concatenate %1, %0 in 1 : vector<8x16xf32>, vector<8x16xf32> -> vector<8x32xf32>
    %c0_1 = arith.constant 0 : index
    %c0_2 = arith.constant 0 : index
    %3 = vector.load %arg2[%c0_1, %c0_2] : memref<32x512xf32, #tpu.memory_space<vmem>>, vector<32x512xf32>
    %cst = arith.constant dense<0.000000e+00> : vector<8x512xf32>
    %4 = tpu.matmul %2, %3, %cst {dimension_numbers = #tpu.dot_dimension_numbers<[1], [0], [0], [1], [0, 0, 1, 1], [], []>, precision = #tpu.contract_precision<fp32>} : vector<8x32xf32>, vector<32x512xf32>, vector<8x512xf32> -> vector<8x512xf32>
    %c0_3 = arith.constant 0 : index
    %c0_4 = arith.constant 0 : index
    %5 = vector.load %arg3[%c0_3, %c0_4] : memref<1x512xf32, #tpu.memory_space<vmem>>, vector<1x512xf32>
    %6 = vector.broadcast %5 : vector<1x512xf32> to vector<8x512xf32>
    %7 = arith.addf %4, %6 : vector<8x512xf32>
    %8 = vector.extract_strided_slice %7 {offsets = [0, 0], sizes = [8, 256], strides = [1, 1]} : vector<8x512xf32> to vector<8x256xf32>
    %9 = vector.extract_strided_slice %7 {offsets = [0, 256], sizes = [8, 256], strides = [1, 1]} : vector<8x512xf32> to vector<8x256xf32>
    %c0_5 = arith.constant 0 : index
    %c0_6 = arith.constant 0 : index
    %c0_7 = arith.constant 0 : index
    %10 = vector.load %arg4[%c0_5, %c0_6, %c0_7] : memref<4x256x256xf32, #tpu.memory_space<vmem>>, vector<1x256x256xf32>
    %11 = vector.shape_cast %10 : vector<1x256x256xf32> to vector<256x256xf32>
    %cst_8 = arith.constant dense<0.000000e+00> : vector<8x256xf32>
    %12 = tpu.matmul %9, %11, %cst_8 {dimension_numbers = #tpu.dot_dimension_numbers<[1], [0], [0], [1], [0, 0, 1, 1], [], []>} : vector<8x256xf32>, vector<256x256xf32>, vector<8x256xf32> -> vector<8x256xf32>
    %13 = arith.maximumf %9, %12 : vector<8x256xf32>
    %c1 = arith.constant 1 : index
    %c0_9 = arith.constant 0 : index
    %c0_10 = arith.constant 0 : index
    %14 = vector.load %arg4[%c1, %c0_9, %c0_10] : memref<4x256x256xf32, #tpu.memory_space<vmem>>, vector<1x256x256xf32>
    %15 = vector.shape_cast %14 : vector<1x256x256xf32> to vector<256x256xf32>
    %cst_11 = arith.constant dense<0.000000e+00> : vector<8x256xf32>
    %16 = tpu.matmul %13, %15, %cst_11 {dimension_numbers = #tpu.dot_dimension_numbers<[1], [0], [0], [1], [0, 0, 1, 1], [], []>} : vector<8x256xf32>, vector<256x256xf32>, vector<8x256xf32> -> vector<8x256xf32>
    %17 = arith.maximumf %13, %16 : vector<8x256xf32>
    %c2 = arith.constant 2 : index
    %c0_12 = arith.constant 0 : index
    %c0_13 = arith.constant 0 : index
    %18 = vector.load %arg4[%c2, %c0_12, %c0_13] : memref<4x256x256xf32, #tpu.memory_space<vmem>>, vector<1x256x256xf32>
    %19 = vector.shape_cast %18 : vector<1x256x256xf32> to vector<256x256xf32>
    %cst_14 = arith.constant dense<0.000000e+00> : vector<8x256xf32>
    %20 = tpu.matmul %17, %19, %cst_14 {dimension_numbers = #tpu.dot_dimension_numbers<[1], [0], [0], [1], [0, 0, 1, 1], [], []>} : vector<8x256xf32>, vector<256x256xf32>, vector<8x256xf32> -> vector<8x256xf32>
    %21 = arith.maximumf %17, %20 : vector<8x256xf32>
    %c3 = arith.constant 3 : index
    %c0_15 = arith.constant 0 : index
    %c0_16 = arith.constant 0 : index
    %22 = vector.load %arg4[%c3, %c0_15, %c0_16] : memref<4x256x256xf32, #tpu.memory_space<vmem>>, vector<1x256x256xf32>
    %23 = vector.shape_cast %22 : vector<1x256x256xf32> to vector<256x256xf32>
    %cst_17 = arith.constant dense<0.000000e+00> : vector<8x256xf32>
    %24 = tpu.matmul %21, %23, %cst_17 {dimension_numbers = #tpu.dot_dimension_numbers<[1], [0], [0], [1], [0, 0, 1, 1], [], []>} : vector<8x256xf32>, vector<256x256xf32>, vector<8x256xf32> -> vector<8x256xf32>
    %25 = arith.maximumf %21, %24 : vector<8x256xf32>
    %26 = arith.addf %8, %25 : vector<8x256xf32>
    %cst_18 = arith.constant dense<0xFF800000> : vector<8xf32>
    %27 = vector.multi_reduction <maximumf>, %26, %cst_18 [1] : vector<8x256xf32> to vector<8xf32>
    %28 = vector.shape_cast %27 : vector<8xf32> to vector<8x1xf32>
    %29 = vector.broadcast %28 : vector<8x1xf32> to vector<8x256xf32>
    %30 = arith.subf %26, %29 : vector<8x256xf32>
    %31 = math.exp %30 : vector<8x256xf32>
    %32 = arith.subf %9, %25 : vector<8x256xf32>
    %cst_19 = arith.constant 6.000000e+01 : f32
    %33 = vector.broadcast %cst_19 : f32 to vector<8x256xf32>
    %34 = arith.minimumf %32, %33 : vector<8x256xf32>
    %35 = math.exp %34 : vector<8x256xf32>
    %c0_20 = arith.constant 0 : index
    %c0_21 = arith.constant 0 : index
    %36 = vector.load %arg5[%c0_20, %c0_21] : memref<256x1024xf32, #tpu.memory_space<vmem>>, vector<256x1024xf32>
    %cst_22 = arith.constant dense<0.000000e+00> : vector<8x1024xf32>
    %37 = tpu.matmul %31, %36, %cst_22 {dimension_numbers = #tpu.dot_dimension_numbers<[1], [0], [0], [1], [0, 0, 1, 1], [], []>} : vector<8x256xf32>, vector<256x1024xf32>, vector<8x1024xf32> -> vector<8x1024xf32>
    %c0_23 = arith.constant 0 : index
    %c0_24 = arith.constant 0 : index
    %38 = vector.load %arg6[%c0_23, %c0_24] : memref<256x1024xf32, #tpu.memory_space<vmem>>, vector<256x1024xf32>
    %cst_25 = arith.constant dense<0.000000e+00> : vector<8x1024xf32>
    %39 = tpu.matmul %35, %38, %cst_25 {dimension_numbers = #tpu.dot_dimension_numbers<[1], [0], [0], [1], [0, 0, 1, 1], [], []>} : vector<8x256xf32>, vector<256x1024xf32>, vector<8x1024xf32> -> vector<8x1024xf32>
    %40 = arith.mulf %37, %39 : vector<8x1024xf32>
    %c0_26 = arith.constant 0 : index
    %c0_27 = arith.constant 0 : index
    %41 = vector.load %arg7[%c0_26, %c0_27] : memref<1024x128xf32, #tpu.memory_space<vmem>>, vector<1024x128xf32>
    %cst_28 = arith.constant dense<0.000000e+00> : vector<8x128xf32>
    %42 = tpu.matmul %40, %41, %cst_28 {dimension_numbers = #tpu.dot_dimension_numbers<[1], [0], [0], [1], [0, 0, 1, 1], [], []>} : vector<8x1024xf32>, vector<1024x128xf32>, vector<8x128xf32> -> vector<8x128xf32>
    %c0_29 = arith.constant 0 : index
    %c0_30 = arith.constant 0 : index
    %43 = vector.load %arg8[%c0_29, %c0_30] : memref<128x128xf32, #tpu.memory_space<vmem>>, vector<128x128xf32>
    %cst_31 = arith.constant dense<0.000000e+00> : vector<8x128xf32>
    %44 = tpu.matmul %42, %43, %cst_31 {dimension_numbers = #tpu.dot_dimension_numbers<[1], [0], [0], [1], [0, 0, 1, 1], [], []>, precision = #tpu.contract_precision<fp32>} : vector<8x128xf32>, vector<128x128xf32>, vector<8x128xf32> -> vector<8x128xf32>
    %45 = math.exp %28 : vector<8x1xf32>
    %46 = vector.broadcast %45 : vector<8x1xf32> to vector<8x128xf32>
    %47 = arith.mulf %46, %44 : vector<8x128xf32>
    %c0_32 = arith.constant 0 : index
    %c0_33 = arith.constant 0 : index
    %48 = vector.load %arg9[%c0_32, %c0_33] : memref<8x128xf32, #tpu.memory_space<vmem>>, vector<8x128xf32>
    tpu.vector_store %arg9[%c0_32, %c0_33], %47 {strides = array<i32>} : memref<8x128xf32, #tpu.memory_space<vmem>>, vector<8x128xf32>,
    return
  }
  func.func @transform_0(%arg0: i32) -> (i32, i32) {
    %c0_i32 = arith.constant 0 : i32
    %c0_i32_0 = arith.constant 0 : i32
    return %arg0, %c0_i32 : i32, i32
  }
  func.func @transform_1(%arg0: i32) -> (i32, i32) {
    %c0_i32 = arith.constant 0 : i32
    %c0_i32_0 = arith.constant 0 : i32
    %c0_i32_1 = arith.constant 0 : i32
    return %c0_i32, %c0_i32_0 : i32, i32
  }
  func.func @transform_2(%arg0: i32) -> (i32, i32) {
    %c0_i32 = arith.constant 0 : i32
    %c0_i32_0 = arith.constant 0 : i32
    %c0_i32_1 = arith.constant 0 : i32
    return %c0_i32, %c0_i32_0 : i32, i32
  }
  func.func @transform_3(%arg0: i32) -> (i32, i32, i32) {
    %c0_i32 = arith.constant 0 : i32
    %c0_i32_0 = arith.constant 0 : i32
    %c0_i32_1 = arith.constant 0 : i32
    %c0_i32_2 = arith.constant 0 : i32
    return %c0_i32, %c0_i32_0, %c0_i32_1 : i32, i32, i32
  }
  func.func @transform_4(%arg0: i32) -> (i32, i32) {
    %c0_i32 = arith.constant 0 : i32
    %c0_i32_0 = arith.constant 0 : i32
    %c0_i32_1 = arith.constant 0 : i32
    return %c0_i32, %c0_i32_0 : i32, i32
  }
  func.func @transform_5(%arg0: i32) -> (i32, i32) {
    %c0_i32 = arith.constant 0 : i32
    %c0_i32_0 = arith.constant 0 : i32
    %c0_i32_1 = arith.constant 0 : i32
    return %c0_i32, %c0_i32_0 : i32, i32
  }
  func.func @transform_6(%arg0: i32) -> (i32, i32) {
    %c0_i32 = arith.constant 0 : i32
    %c0_i32_0 = arith.constant 0 : i32
    %c0_i32_1 = arith.constant 0 : i32
    return %c0_i32, %c0_i32_0 : i32, i32
  }
  func.func @transform_7(%arg0: i32) -> (i32, i32) {
    %c0_i32 = arith.constant 0 : i32
    %c0_i32_0 = arith.constant 0 : i32
    %c0_i32_1 = arith.constant 0 : i32
    return %c0_i32, %c0_i32_0 : i32, i32
  }
  func.func @transform_8(%arg0: i32) -> (i32, i32) {
    %c0_i32 = arith.constant 0 : i32
    %c0_i32_0 = arith.constant 0 : i32
    return %arg0, %c0_i32 : i32, i32
  }
}

</mosaic_0001>

<bundles_post_ra>
// kernel: tpu_custom_call.1
= control target key start
LH: loop header
LB: loop body
LE: loop exit
PB: predicated region body
PF: predicated region fallthrough
CT: control target
= control target key end

     0   :  { %s7401_s0 = inlined_call_operand.hbm [shape: f32[16,16], index: 0, kind: input, shape index: {}]   ;;  %s7402_s1 = inlined_call_operand.hbm [shape: f32[32,512], index: 1, kind: input, shape index: {}]   ;;  %s7403_s2 = inlined_call_operand.vmem [shape: f32[1,512], index: 2, kind: input, shape index: {}]   ;;  %s7404_s3 = inlined_call_operand.hbm [shape: f32[4,256,256], index: 3, kind: input, shape index: {}]   ;;  %s7405_s4 = inlined_call_operand.hbm [shape: f32[256,1024], index: 4, kind: input, shape index: {}]   ;;  %s7406_s5 = inlined_call_operand.hbm [shape: f32[256,1024], index: 5, kind: input, shape index: {}]   ;;  %s7407_s6 = inlined_call_operand.hbm [shape: f32[1024,128], index: 6, kind: input, shape index: {}]   ;;  %s7408_s7 = inlined_call_operand.hbm [shape: f32[128,128], index: 7, kind: input, shape index: {}]   ;;  %s7409_s8 = inlined_call_operand.hbm [shape: f32[16,128], index: 8, kind: output, shape index: {}]  }
   0x1   :  { %7430 = sst [smem:[#allocation20_spill]] %s7402_s1 }
   0x2   :  { %13 = vsyncpa [#allocation3], 0 }
   0x3   :  { %15 = vsyncpa [#allocation3 + $0x1], 0 }
   0x4   :  { %16 = vsyncpa [#allocation6], 0 }
   0x5   :  { %17 = vsyncpa [#allocation9], 0 }
   0x6   :  { %18 = vsyncpa [#allocation12], 0 }
   0x7   :  { %19 = vsyncpa [#allocation4], 0 }
   0x8   :  { %21 = vsyncpa [#allocation4 + $0x1], 0  ;;  %s6531_s27 = smov 0   ;;  %s6533_s28 = smov 0  }
   0x9   :  { %s6535_s29 = smov 0   ;;  %s6537_s30 = smov 0  }
   0xa LB: > { %s6466_s9 = smov [#allocation5]   ;;  %s6552_s11 = sadd.s32 4294967295, %s6464_s30   ;;  %s6464_s30 = sphi %s6537_s30, %s7471_s30   ;;  %s6460_s29 = sphi %s6535_s29, %s7470_s29   ;;  %s6456_s28 = sphi %s6533_s28, %s7469_s28   ;;  %s6452_s27 = sphi %s6531_s27, %s7468_s27  }
   0xb   : > { %s243_s10 = sshll.u32 %s6466_s9, 4  ;;  %p4413_p0 = scmp.ge.s32.totalorder %s6464_s30, 1  ;;  %s6557_s10 = int_to_ptr.vmem [resolvable:$true] %s243_s10 }
   0xc   : > { %p7410_p1 = scmp.eq.s32.totalorder %s6552_s11, 0  ;;  %p231_p2 = scmp.lt.s32.totalorder %s6464_s30, 3 }
   0xd   : > { %s6467_s13 = smov [#allocation8]   ;;  %s6468_s16 = smov [#allocation11]  }
   0xe   : > { %p6559_p3 = pnand %p4413_p0, %p231_p2  ;;  %s272_s14 = sshll.u32 %s6467_s13, 4  ;;  %s6572_s14 = int_to_ptr.vmem [resolvable:$true] %s272_s14 }
   0xf   : > { %s6574_s17 = sshll.u32 %s6468_s16, 4  ;;  %s7433_s1 = sld [smem:[#allocation20_spill]]  ;;  %s299_s17 = int_to_ptr.vmem [resolvable:$true] %s6574_s17 }
  0x10   : > { %s7431_s12 = scalar_select %p6559_p3, 1, 0 }
  0x11   : > { %p6086_p5 = pneg %p6559_p3 }
  0x13   : > { %p6568_p6 = pnand %p6086_p5, %p7410_p1 }
  0x15   : > { %s6188_s20 = scalar_lea.hbm %s7433_s1, 2048  ;;  %p6584_p8 = pneg %p6568_p6 }
  0x16   : > { %p6189_p7 = scmp.ne.s32.totalorder %s7433_s1, %s6188_s20  ;;  %p6195_p11 = scmp.lt.u32.totalorder %s6188_s20, %s7433_s1 }
  0x18   : > { %p6191_p9 = pnand %p6584_p8, %p6189_p7 }
  0x1a   : > { %p6192_p10 = pneg %p6191_p9 }
  0x1c   : > { %p6197_p12 = pnand %p6195_p11, %p6192_p10 }
  0x1e   : > { %6200 = shalt.err (!%p6197_p12)
}
  0x1f   : > { %s6201_s26 = scalar_lea.vmem %s6557_s10, 2048  ;;  %p6209_p5 = scmp.lt.s32.totalorder %s6557_s10, %s6557_s10 }
  0x20   : > { %p6202_p13 = scmp.ne.s32.totalorder %s6557_s10, %s6201_s26  ;;  %p6210_p4 = scmp.lt.s32.totalorder %s6201_s26, %s6201_s26 }
  0x22   : > { %p6204_p0 = pnand %p6202_p13, %p6584_p8  ;;  %p6211_p7 = por %p6210_p4, %p6209_p5 }
  0x24   : > { %p6205_p2 = pneg %p6204_p0 }
  0x26   : > { %p6212_p9 = pnand %p6211_p7, %p6205_p2 }
  0x28   : > { %6215 = shalt.err (!%p6212_p9)
}
  0x29   : > { %s6469_s9 = smov 512   ;;  %s6470_s13 = smov 32  }
  0x2a   : > { %6089 = dma.hbm_to_vmem [thread:$0]  (!%p6568_p6), %s7433_s1, 2048, %s6557_s10, [#allocation6], %s6469_s9, %s6469_s9, %s6470_s13  }
  0x2b   : > { %s6216_s21 = scalar_lea.hbm %s7405_s4, 32768 }
  0x2c   : > { %p6217_p4 = scmp.ne.s32.totalorder %s7405_s4, %s6216_s21  ;;  %p6223_p12 = scmp.lt.u32.totalorder %s6216_s21, %s7405_s4 }
  0x2e   : > { %p6219_p10 = pnand %p6217_p4, %p6584_p8 }
  0x30   : > { %p6220_p11 = pneg %p6219_p10 }
  0x32   : > { %p6225_p13 = pnand %p6223_p12, %p6220_p11 }
  0x34   : > { %6228 = shalt.err (!%p6225_p13)
}
  0x35   : > { %s6229_s10 = scalar_lea.vmem %s6572_s14, 32768  ;;  %p6237_p7 = scmp.lt.s32.totalorder %s6572_s14, %s6572_s14 }
  0x36   : > { %p6230_p0 = scmp.ne.s32.totalorder %s6572_s14, %s6229_s10  ;;  %p6238_p9 = scmp.lt.s32.totalorder %s6229_s10, %s6229_s10 }
  0x38   : > { %p6232_p2 = pnand %p6230_p0, %p6584_p8  ;;  %p6239_p4 = por %p6238_p9, %p6237_p7 }
  0x3a   : > { %p6233_p5 = pneg %p6232_p2 }
  0x3c   : > { %p6240_p10 = pnand %p6239_p4, %p6233_p5 }
  0x3e   : > { %6243 = shalt.err (!%p6240_p10)
}
  0x3f   : > { %s7412_s9 = smov 1024   ;;  %s7413_s13 = smov 64  }
  0x40   : > { %6095 = dma.hbm_to_vmem [thread:$0]  (!%p6568_p6), %s7405_s4, 32768, %s6572_s14, [#allocation9], %s7412_s9, %s7412_s9, %s7413_s13  }
  0x41   : > { %s6244_s21 = scalar_lea.hbm %s7407_s6, 16384 }
  0x42   : > { %p6245_p11 = scmp.ne.s32.totalorder %s7407_s6, %s6244_s21  ;;  %p6251_p0 = scmp.lt.u32.totalorder %s6244_s21, %s7407_s6 }
  0x44   : > { %p6247_p12 = pnand %p6245_p11, %p6584_p8 }
  0x46   : > { %p6248_p13 = pneg %p6247_p12 }
  0x48   : > { %p6253_p2 = pnand %p6251_p0, %p6248_p13 }
  0x4a   : > { %6256 = shalt.err (!%p6253_p2)
}
  0x4b   : > { %s6257_s10 = scalar_lea.vmem %s299_s17, 16384  ;;  %p6265_p4 = scmp.lt.s32.totalorder %s299_s17, %s299_s17 }
  0x4c   : > { %p6258_p5 = scmp.ne.s32.totalorder %s299_s17, %s6257_s10  ;;  %p6266_p10 = scmp.lt.s32.totalorder %s6257_s10, %s6257_s10 }
  0x4e   : > { %p6260_p7 = pnand %p6258_p5, %p6584_p8  ;;  %p6267_p1 = por %p6266_p10, %p6265_p4 }
  0x50   : > { %p6261_p9 = pneg %p6260_p7 }
  0x52   : > { %p6268_p3 = pnand %p6267_p1, %p6261_p9 }
  0x54   : > { %6271 = shalt.err (!%p6268_p3)
}
  0x55   : > { %s7414_s14 = smov 128   ;;  %s7415_s16 = smov 8  }
  0x56   : > { %6101 = dma.hbm_to_vmem [thread:$0]  (!%p6568_p6), %s7407_s6, 16384, %s299_s17, [#allocation12], %s7414_s14, %s7414_s14, %s7415_s16  }
  0x57   : > { %s6475_s20 = smov [#allocation7]   ;;  %s6272_s25 = scalar_lea.hbm %s7404_s3, 32768 }
  0x58   : > { %s259_s21 = sshll.u32 %s6475_s20, 4  ;;  %p6273_p1 = scmp.ne.s32.totalorder %s7404_s3, %s6272_s25  ;;  %s260_s21 = int_to_ptr.vmem [resolvable:$true] %s259_s21 }
  0x59   : > { %p6279_p12 = scmp.lt.u32.totalorder %s6272_s25, %s7404_s3 }
  0x5a   : > { %p6275_p3 = pnand %p6273_p1, %p6584_p8 }
  0x5c   : > { %p6276_p11 = pneg %p6275_p3 }
  0x5e   : > { %p6281_p13 = pnand %p6279_p12, %p6276_p11 }
  0x60   : > { %6284 = shalt.err (!%p6281_p13)
}
  0x61   : > { %s6285_s17 = scalar_lea.vmem %s260_s21, 32768  ;;  %p6293_p7 = scmp.lt.s32.totalorder %s260_s21, %s260_s21 }
  0x62   : > { %p6286_p0 = scmp.ne.s32.totalorder %s260_s21, %s6285_s17  ;;  %p6294_p9 = scmp.lt.s32.totalorder %s6285_s17, %s6285_s17 }
  0x64   : > { %p6288_p2 = pnand %p6286_p0, %p6584_p8  ;;  %p6295_p4 = por %p6294_p9, %p6293_p7 }
  0x66   : > { %p6289_p5 = pneg %p6288_p2 }
  0x68   : > { %p6296_p10 = pnand %p6295_p4, %p6289_p5 }
  0x6a   : > { %6299 = shalt.err (!%p6296_p10)
}
  0x6b   : > { %s6476_s18 = smov 256   ;;  %s6477_s19 = smov 16  }
  0x6c   : > { %6092 = dma.hbm_to_vmem [thread:$0]  (!%p6568_p6), %s7404_s3, 32768, %s260_s21, [#allocation6], %s6476_s18, %s6476_s18, %s6477_s19  }
  0x6d   : > { %s6478_s20 = smov [#allocation10]   ;;  %s6479_s24 = smov [#allocation13]  }
  0x6e   : > { %s285_s22 = sshll.u32 %s6478_s20, 4  ;;  %s311_s25 = sshll.u32 %s6479_s24, 4  ;;  %s286_s22 = int_to_ptr.vmem [resolvable:$true] %s285_s22  ;;  %s6671_s25 = int_to_ptr.vmem [resolvable:$true] %s311_s25 }
  0x6f   : > { %s6300_s17 = scalar_lea.hbm %s7406_s5, 32768 }
  0x70   : > { %p6301_p1 = scmp.ne.s32.totalorder %s7406_s5, %s6300_s17  ;;  %p6307_p12 = scmp.lt.u32.totalorder %s6300_s17, %s7406_s5 }
  0x72   : > { %p6303_p3 = pnand %p6301_p1, %p6584_p8 }
  0x74   : > { %p6304_p11 = pneg %p6303_p3 }
  0x76   : > { %p6309_p13 = pnand %p6307_p12, %p6304_p11 }
  0x78   : > { %6312 = shalt.err (!%p6309_p13)
}
  0x79   : > { %s6313_s18 = scalar_lea.vmem %s286_s22, 32768  ;;  %p6321_p7 = scmp.lt.s32.totalorder %s286_s22, %s286_s22 }
  0x7a   : > { %p6314_p0 = scmp.ne.s32.totalorder %s286_s22, %s6313_s18  ;;  %p6322_p9 = scmp.lt.s32.totalorder %s6313_s18, %s6313_s18 }
  0x7c   : > { %p6316_p2 = pnand %p6314_p0, %p6584_p8  ;;  %p6323_p4 = por %p6322_p9, %p6321_p7 }
  0x7e   : > { %p6317_p5 = pneg %p6316_p2 }
  0x80   : > { %p6324_p10 = pnand %p6323_p4, %p6317_p5 }
  0x82   : > { %6327 = shalt.err (!%p6324_p10)
}
  0x83   : > { %s7435_s14 = smov 64   ;;  %s7436_s16 = smov 1024  }
  0x84   : > { %6098 = dma.hbm_to_vmem [thread:$0]  (!%p6568_p6), %s7406_s5, 32768, %s286_s22, [#allocation9], %s7436_s16, %s7436_s16, %s7435_s14  }
  0x85   : > { %s6328_s26 = scalar_lea.hbm %s7408_s7, 2048 }
  0x86   : > { %p6329_p1 = scmp.ne.s32.totalorder %s7408_s7, %s6328_s26  ;;  %p6335_p12 = scmp.lt.u32.totalorder %s6328_s26, %s7408_s7 }
  0x88   : > { %p6331_p3 = pnand %p6329_p1, %p6584_p8 }
  0x8a   : > { %p6332_p11 = pneg %p6331_p3 }
  0x8c   : > { %p6337_p13 = pnand %p6335_p12, %p6332_p11 }
  0x8e   : > { %6340 = shalt.err (!%p6337_p13)
}
  0x8f   : > { %s6341_s22 = scalar_lea.vmem %s6671_s25, 2048  ;;  %p6349_p7 = scmp.lt.s32.totalorder %s6671_s25, %s6671_s25 }
  0x90   : > { %p6342_p0 = scmp.ne.s32.totalorder %s6671_s25, %s6341_s22  ;;  %p6350_p9 = scmp.lt.s32.totalorder %s6341_s22, %s6341_s22 }
  0x92   : > { %p6344_p2 = pnand %p6342_p0, %p6584_p8  ;;  %p6351_p4 = por %p6350_p9, %p6349_p7 }
  0x94   : > { %p6345_p5 = pneg %p6344_p2 }
  0x96   : > { %p6352_p10 = pnand %p6351_p4, %p6345_p5 }
  0x98   : > { %6355 = shalt.err (!%p6352_p10)
}
  0x99   : > { %s7437_s18 = smov 8   ;;  %s7438_s14 = smov 128  }
  0x9a   : > { %6104 = dma.hbm_to_vmem [thread:$0]  (!%p6568_p6), %s7408_s7, 2048, %s6671_s25, [#allocation12], %s7438_s14, %s7438_s14, %s7437_s18  }
  0x9b   : > { %s4412_s15 = sadd.s32 4294967294, %s6464_s30   ;;  %s6722_s23 = sadd.s32 1, %s6464_s30  }
  0x9c   : > { %s31_s13 = ssub.s32 %s6464_s30, %s6722_s23  ;;  %s34_s20 = sadd.s32 1, %s6460_s29 }
  0x9d   : > { %p32_p8 = scmp.eq.s32.totalorder %s31_s13, 0  ;;  %p41_p1 = scmp.ne.s32.totalorder %s6460_s29, %s6456_s28 }
  0x9e   : > { %p42_p3 = scmp.eq.s32.totalorder %s6464_s30, 0  ;;  %p47_p11 = scmp.ne.s32.totalorder %s6456_s28, %s6452_s27 }
  0x9f   : > { %s6733_s24 = scalar_select %p32_p8, %s6460_s29, %s34_s20  }
  0xa0   : > { %p6735_p12 = por %p42_p3, %p41_p1  ;;  %p7440_p13 = scmp.eq.s32.totalorder %s6552_s11, 0 }
  0xa1   : > { %p218_p0 = scmp.eq.s32.totalorder %s6552_s11, 1  ;;  %p224_p2 = scmp.eq.s32.totalorder %s4412_s15, 1 }
  0xa2   : > { %p6741_p6 = por %p7440_p13, %p47_p11  ;;  %p6119_p5 = scmp.lt.s32.totalorder %s6464_s30, 2 }
  0xa3   : > { %s325_s10 = sand.u32 1, %s6460_s29   ;;  %p6748_p7 = por %p218_p0, %p41_p1 }
  0xa4   : > { %p6752_p9 = por %p224_p2, %p47_p11  ;;  %s4421_s21 = sshll.u32 %s325_s10, 3 }
  0xa5   : > { %s7442_s17 = scalar_select %p6748_p7, 1, 0 }
  0xa6   : > { %s7443_s9 = scalar_select %p6752_p9, 1, 0 }
  0xa7   : > { %s4422_s22 = sshll.u32 %s6464_s30, 7  ;;  %s329_s19 = scalar_lea.vmem [#allocation2], %s4421_s21 }
  0xa8   : > { %s6760_s16 = scalar_lea.hbm %s7401_s0, %s4422_s22  ;;  %s336_s15 = sshll.u32 %s329_s19, 4  ;;  %s6762_s15 = int_to_ptr.vmem [resolvable:$true] %s336_s15 }
  0xa9   : > { %p6766_p4 = pnand %p6119_p5, %p6735_p12  ;;  %s326_s20 = scalar_lea.sflag [#allocation3], %s325_s10 }
  0xaa   : > { %s6356_s1 = scalar_lea.hbm %s6760_s16, 128  ;;  %s6361_s18 = scalar_lea.hbm %s7401_s0, 256 }
  0xab   : > { %p6357_p10 = scmp.ne.s32.totalorder %s6760_s16, %s6356_s1  ;;  %p6358_p8 = pneg %p6766_p4 }
  0xac   : > { %p6362_p11 = scmp.lt.u32.totalorder %s6760_s16, %s7401_s0  ;;  %p6363_p12 = scmp.lt.u32.totalorder %s6361_s18, %s6356_s1 }
  0xad   : > { %p6359_p1 = pnand %p6358_p8, %p6357_p10  ;;  %p6365_p0 = scmp.lt.u32.totalorder %s6356_s1, %s6760_s16 }
  0xae   : > { %p6364_p13 = por %p6363_p12, %p6362_p11 }
  0xaf   : > { %p6360_p3 = pneg %p6359_p1 }
  0xb0   : > { %p6366_p2 = por %p6365_p0, %p6364_p13 }
  0xb2   : > { %p6367_p5 = pnand %p6366_p2, %p6360_p3 }
  0xb4   : > { %6370 = shalt.err (!%p6367_p5)
}
  0xb5   : > { %s6371_s10 = scalar_lea.vmem %s6762_s15, 128  ;;  %s6480_s19 = smov [#allocation2]  }
  0xb6   : > { %p6372_p10 = scmp.ne.s32.totalorder %s6762_s15, %s6371_s10  ;;  %s6376_s21 = sshll.u32 %s6480_s19, 4  ;;  %s6377_s21 = int_to_ptr.vmem [resolvable:$false] %s6376_s21 }
  0xb7   : > { %s6378_s22 = scalar_lea.vmem %s6377_s21, 256  ;;  %p6379_p7 = scmp.lt.s32.totalorder %s6762_s15, %s6377_s21 }
  0xb8   : > { %p6374_p1 = pnand %p6372_p10, %p6358_p8  ;;  %p6380_p11 = scmp.lt.s32.totalorder %s6378_s22, %s6371_s10 }
  0xba   : > { %p6375_p9 = pneg %p6374_p1  ;;  %p6381_p12 = por %p6380_p11, %p6379_p7 }
  0xbc   : > { %p6382_p13 = pnand %p6381_p12, %p6375_p9 }
  0xbe   : > { %6385 = shalt.err (!%p6382_p13)
}
  0xbf   : > { %6108 = dma.hbm_to_vmem [thread:$0]  (!%p6766_p4), %s6760_s16, 128, %s6762_s15, %s326_s20  }
  0xc0   : > { %p7445_p3 = scmp.ne.s32.totalorder %s7431_s12, 0 }
  0xc1   : > { %s6798_s1 = sand.u32 (!%p7445_p3), 1, %s6456_s28  }
  0xc2   : > { %345 = sbr.rel (%p7445_p3) target bundleno = 2647 (0xa57), region = 52  ;;  %s4424_s18 = sshll.u32 (!%p7445_p3), %s6798_s1, 3 }
  0xc3   : > { %s348_s26 = scalar_lea.sflag (!%p7445_p3), [#allocation3], %s6798_s1  ;;  %s351_s14 = scalar_lea.vmem (!%p7445_p3), [#allocation2], %s4424_s18 }
  0xc9   : > { %6431 = dma.done.wait (%p6741_p6), %s348_s26, 128  }
  0xca   : > { %6433 = vsyncadd (%p6741_p6), %s348_s26, 4294967168  ;;  %p7446_p7 = scmp.eq.s32.totalorder %s6552_s11, 0 }
  0xcc   : > { %6435 = dma.done.wait (%p7446_p7), [#allocation6], 34816   ;;  %p7447_p9 = pmov %p7446_p7 }
  0xcd   : > { %p7448_p4 = pmov %p7446_p7 }
  0xce   : > { %6437 = vsyncadd (%p7447_p9), [#allocation6], 4294932480 }
  0xcf   : > { %6439 = dma.done.wait (%p7448_p4), [#allocation9], 65536   ;;  %p7449_p8 = pmov %p7448_p4 }
  0xd0   : > { %p7450_p0 = pmov %p7448_p4 }
  0xd1   : > { %6441 = vsyncadd (%p7449_p8), [#allocation9], 4294901760 }
  0xd2   : > { %6443 = dma.done.wait (%p7450_p0), [#allocation12], 18432   ;;  %p7451_p2 = pmov %p7450_p0 }
  0xd3   : > { %v6481_v0 = vmov 0.0   ;;  %v6822_v1 = vld [vmem:[%s351_s14] sm:$0xff]  ;;  %s6482_s12 = smov 16   ;;  %v417_v6 = vld [vmem:[#allocation5 + $0x8] sm:$0xff]  ;;  %v416_v13 = vld [vmem:[#allocation5] sm:$0xff]  ;;  %vm414_vm0 = vcmask 130048  }
  0xd4   : > { %6445 = vsyncadd (%p7451_p2), [#allocation12], 4294948864  ;;  %530 = vmatprep.mubr.f32.mxu0 %v6481_v0  ;;  %1073 = vmatprep.mubr.f32.mxu1 %v6481_v0  ;;  %v419_v2 = vld [vmem:[#allocation5 + $0x18] sm:$0xff]  ;;  %v421_v7 = vld [vmem:[#allocation5 + $0x28] sm:$0xff]  ;;  %v458_v9 = vand.u32 4294901760, %v417_v6  ;;  %v460_v30 = vand.u32 4294901760, %v416_v13 }
  0xd5   : > { %v423_v3 = vld [vmem:[#allocation5 + $0x38] sm:$0xff]  ;;  %411 = vrot.lane.b32.xlu0 %v6822_v1, %s6482_s12  ;;  %v1001_v4 = vand.u32 4294901760, %v419_v2  ;;  %v418_v8 = vld [vmem:[#allocation5 + $0x10] sm:$0xff]  ;;  %v462_v10 = vand.u32 4294901760, %v421_v7  ;;  %v420_v14 = vld [vmem:[#allocation5 + $0x20] sm:$0xff]  ;;  %vm454_vm1 = vcmask 261120  }
  0xd6   : > { %v1005_v5 = vand.u32 4294901760, %v423_v3  ;;  %v422_v11 = vld [vmem:[#allocation5 + $0x30] sm:$0xff]  ;;  %v1003_v12 = vand.u32 4294901760, %v418_v8  ;;  %v427_v19 = vld [vmem:[#allocation5 + $0x58] sm:$0xff]  ;;  %v425_v21 = vld [vmem:[#allocation5 + $0x48] sm:$0xff]  ;;  %v6833_v23 = vsub.f32 %v417_v6, %v458_v9  ;;  %v464_v31 = vand.u32 4294901760, %v420_v14 }
  0xd7   : > { %v6827_v16 = vsub.f32 %v419_v2, %v1001_v4  ;;  %v1007_v18 = vand.u32 4294901760, %v422_v11  ;;  %v431_v20 = vld [vmem:[#allocation5 + $0x78] sm:$0xff]  ;;  %v6831_v22 = vpack.c.bf16 %v462_v10, %v458_v9  ;;  %v6835_v24 = vsub.f32 %v421_v7, %v462_v10  ;;  %v429_v26 = vld [vmem:[#allocation5 + $0x68] sm:$0xff]  ;;  %v426_v27 = vld [vmem:[#allocation5 + $0x50] sm:$0xff]  ;;  %s4433_s20 = sshll.u32 %s6552_s11, 7  ;;  %s407_s10 = scalar_lea.vmem [#allocation14], %s4424_s18 }
  0xd8   : > { %v6825_v15 = vpack.c.bf16 %v1005_v5, %v1001_v4  ;;  %v6829_v17 = vsub.f32 %v423_v3, %v1005_v5  ;;  %v6837_v25 = vsub.f32 %v418_v8, %v1003_v12  ;;  %v1009_v32 = vand.u32 4294901760, %v427_v19  ;;  %v430_v36 = vld [vmem:[#allocation5 + $0x70] sm:$0xff]  ;;  %v424_v41 = vld [vmem:[#allocation5 + $0x40] sm:$0xff]  ;;  %s4285_s19 = sshll.u32 %s407_s10, 4  ;;  %s7357_s26 = scalar_lea.hbm %s7409_s8, %s4433_s20  ;;  %s7359_s19 = int_to_ptr.vmem [resolvable:$true] %s4285_s19 }
  0xd9   : > { %v6840_v28 = vpack.c.bf16 %v1007_v18, %v1003_v12  ;;  %v6842_v29 = vsub.f32 %v422_v11, %v1007_v18  ;;  %4889 = vmatprep.subr.bf16.mxu0 %v6831_v22  ;;  %v1013_v33 = vand.u32 4294901760, %v431_v20  ;;  %v466_v34 = vand.u32 4294901760, %v425_v21  ;;  %v428_v42 = vld [vmem:[#allocation5 + $0x60] sm:$0xff]  ;;  %s4272_s14 = scalar_lea.sflag [#allocation4], %s6798_s1  ;;  %s6386_s11 = scalar_lea.vmem %s7359_s19, 128 }
  0xda   : > { %4937 = vmatprep.subr.bf16.mxu1 %v6825_v15  ;;  %v470_v35 = vand.u32 4294901760, %v429_v26  ;;  %v6846_v37 = vpack.c.bf16 %v464_v31, %v460_v30  ;;  %v6848_v38 = vsub.f32 %v416_v13, %v460_v30  ;;  %v6850_v39 = vsub.f32 %v420_v14, %v464_v31  ;;  %p6387_p6 = scmp.ne.s32.totalorder %s7359_s19, %s6386_s11  ;;  %p7465_p5 = scmp.ne.s32.totalorder %s7442_s17, 0 }
  0xdb   : > { %4939 = vmatpush1.bf16.msra.mxu1 %v6840_v28  ;;  %v1011_v40 = vand.u32 4294901760, %v426_v27  ;;  %v6852_v43 = vpack.c.bf16 %v1013_v33, %v1009_v32  ;;  %v6854_v44 = vsub.f32 %v427_v19, %v1009_v32  ;;  %v6856_v45 = vsub.f32 %v431_v20, %v1013_v33  ;;  %s6485_s18 = smov [#allocation14]  }
  0xdc   : > { %v6858_v46 = vpack.c.bf16 %v470_v35, %v466_v34  ;;  %4891 = vmatpush1.bf16.msra.mxu0 %v6846_v37  ;;  %v6861_v47 = vsub.f32 %v425_v21, %v466_v34  ;;  %v6863_v48 = vsub.f32 %v429_v26, %v470_v35  ;;  %v1015_v49 = vand.u32 4294901760, %v430_v36  ;;  %p6388_p10 = pnand %p6387_p6, %p7465_p5  ;;  %s6390_s12 = sshll.u32 %s6485_s18, 4  ;;  %s6391_s12 = int_to_ptr.vmem [resolvable:$false] %s6390_s12 }
  0xdd   : > { %v6865_v50 = vsub.f32 %v426_v27, %v1011_v40  ;;  %4941 = vmatprep.subr.bf16.mxu1 %v6852_v43  ;;  %v468_v51 = vand.u32 4294901760, %v424_v41  ;;  %v472_v52 = vand.u32 4294901760, %v428_v42  ;;  %v1087_v53 = vand.u32 4294901760, %v6827_v16  ;;  %s6392_s25 = scalar_lea.vmem %s6391_s12, 256  ;;  %p6393_p11 = scmp.lt.s32.totalorder %s7359_s19, %s6391_s12 }
  0xde   : > { %4893 = vmatprep.subr.bf16.mxu0 %v6858_v46  ;;  %v1099_v54 = vand.u32 4294901760, %v6829_v17  ;;  %v6871_v55 = vpack.c.bf16 %v1015_v49, %v1011_v40  ;;  %v6873_v56 = vsub.f32 %v430_v36, %v1015_v49  ;;  %v544_v57 = vand.u32 4294901760, %v6833_v23  ;;  %p6389_p1 = pneg %p6388_p10  ;;  %p6394_p12 = scmp.lt.s32.totalorder %s6392_s25, %s6386_s11 }
  0xdf   : > { %v556_v58 = vand.u32 4294901760, %v6835_v24  ;;  %v6877_v59 = vpack.c.bf16 %v472_v52, %v468_v51  ;;  %v6879_v60 = vsub.f32 %v424_v41, %v468_v51  ;;  %v6881_v61 = vsub.f32 %v428_v42, %v472_v52 }
  0xe0   : > { %v1088_v62 = vsub.f32 %v6827_v16, %v1087_v53  ;;  %4943 = vmatpush1.bf16.msra.mxu1 %v6871_v55  ;;  %v1100_v63 = vsub.f32 %v6829_v17, %v1099_v54  ;;  %v545_v2 = vsub.f32 %v6833_v23, %v544_v57  ;;  %v1093_v4 = vand.u32 4294901760, %v6837_v25  ;;  %p6395_p13 = por %p6394_p12, %p6393_p11 }
  0xe1   : > { %v557_v3 = vsub.f32 %v6835_v24, %v556_v58  ;;  %4895 = vmatpush1.bf16.msra.mxu0 %v6877_v59  ;;  %v1105_v6 = vand.u32 4294901760, %v6842_v29  ;;  %v550_v7 = vand.u32 4294901760, %v6848_v38  ;;  %v562_v8 = vand.u32 4294901760, %v6850_v39 }
  0xe2   : > { %v1089_v5 = vand.u32 4294901760, %v1088_v62  ;;  %v1101_v9 = vand.u32 4294901760, %v1100_v63  ;;  %v546_v10 = vand.u32 4294901760, %v545_v2  ;;  %v1094_v12 = vsub.f32 %v6837_v25, %v1093_v4  ;;  %p6396_p3 = pnand %p6395_p13, %p6389_p1 }
  0xe3   : > { %v558_v11 = vand.u32 4294901760, %v557_v3  ;;  %v1106_v13 = vsub.f32 %v6842_v29, %v1105_v6  ;;  %v551_v14 = vsub.f32 %v6848_v38, %v550_v7  ;;  %v563_v18 = vsub.f32 %v6850_v39, %v562_v8 }
  0xe4   : > { %v1111_v19 = vand.u32 4294901760, %v6854_v44  ;;  %v4944_v20 = vpack.c.bf16 %v1101_v9, %v1089_v5  ;;  %v1095_v26 = vand.u32 4294901760, %v1094_v12  ;;  %v1123_v27 = vand.u32 4294901760, %v6856_v45 }
  0xe5   : > { %v4896_v21 = vpack.c.bf16 %v558_v11, %v546_v10  ;;  %v1107_v30 = vand.u32 4294901760, %v1106_v13  ;;  %v552_v31 = vand.u32 4294901760, %v551_v14  ;;  %v564_v32 = vand.u32 4294901760, %v563_v18 }
  0xe6   : > { %v1112_v33 = vsub.f32 %v6854_v44, %v1111_v19  ;;  %4945 = vmatprep.subr.bf16.mxu1 %v4944_v20  ;;  %v1124_v34 = vsub.f32 %v6856_v45, %v1123_v27  ;;  %v568_v35 = vand.u32 4294901760, %v6861_v47  ;;  %v580_v36 = vand.u32 4294901760, %v6863_v48 }
  0xe7   : > { %4897 = vmatprep.subr.bf16.mxu0 %v4896_v21  ;;  %v1117_v40 = vand.u32 4294901760, %v6865_v50  ;;  %v4946_v41 = vpack.c.bf16 %v1107_v30, %v1095_v26  ;;  %v4898_v42 = vpack.c.bf16 %v564_v32, %v552_v31  ;;  %v1129_v51 = vand.u32 4294901760, %v6873_v56 }
  0xe8   : > { %v1113_v49 = vand.u32 4294901760, %v1112_v33  ;;  %v1125_v52 = vand.u32 4294901760, %v1124_v34  ;;  %v569_v62 = vsub.f32 %v6861_v47, %v568_v35  ;;  %v581_v63 = vsub.f32 %v6863_v48, %v580_v36 }
  0xe9   : > { %v1118_v2 = vsub.f32 %v6865_v50, %v1117_v40  ;;  %v1130_v3 = vsub.f32 %v6873_v56, %v1129_v51  ;;  %v574_v5 = vand.u32 4294901760, %v6879_v60  ;;  %v586_v9 = vand.u32 4294901760, %v6881_v61 }
  0xea   : > { %v4952_v10 = vpack.c.bf16 %v6829_v17, %v6827_v16  ;;  %v4948_v11 = vpack.c.bf16 %v1125_v52, %v1113_v49  ;;  %v570_v12 = vand.u32 4294901760, %v569_v62  ;;  %v582_v13 = vand.u32 4294901760, %v581_v63 }
  0xeb   : > { %v1119_v14 = vand.u32 4294901760, %v1118_v2  ;;  %v1131_v18 = vand.u32 4294901760, %v1130_v3  ;;  %v575_v20 = vsub.f32 %v6879_v60, %v574_v5  ;;  %v587_v21 = vsub.f32 %v6881_v61, %v586_v9  ;;  %v1561_v3 = vld [vmem:[#allocation7 + $0x88] sm:$0xff] }
  0xec   : > { %v4904_v26 = vpack.c.bf16 %v6835_v24, %v6833_v23  ;;  %v4900_v30 = vpack.c.bf16 %v582_v13, %v570_v12  ;;  %v4954_v31 = vpack.c.bf16 %v6842_v29, %v6837_v25  ;;  %v4906_v32 = vpack.c.bf16 %v6850_v39, %v6848_v38  ;;  %v1562_v12 = vld [vmem:[#allocation7 + $0x90] sm:$0xff]  ;;  %v1565_v13 = vld [vmem:[#allocation7 + $0xa8] sm:$0xff] }
  0xed   : > { %v4956_v33 = vpack.c.bf16 %v6856_v45, %v6854_v44  ;;  %v4950_v34 = vpack.c.bf16 %v1131_v18, %v1119_v14  ;;  %v576_v49 = vand.u32 4294901760, %v575_v20  ;;  %v588_v52 = vand.u32 4294901760, %v587_v21  ;;  %v1567_v14 = vld [vmem:[#allocation7 + $0xb8] sm:$0xff]  ;;  %v1564_v21 = vld [vmem:[#allocation7 + $0xa0] sm:$0xff] }
  0xee   : > { %v4908_v62 = vpack.c.bf16 %v6863_v48, %v6861_v47  ;;  %v4958_v63 = vpack.c.bf16 %v6873_v56, %v6865_v50  ;;  %v4910_v2 = vpack.c.bf16 %v6881_v61, %v6879_v60  ;;  %v4968_v25 = vpack.c.bf16 %v1099_v54, %v1087_v53  ;;  %v1547_v60 = vld [vmem:[#allocation7 + $0x18] sm:$0xff] }
  0xef   : > { %v4920_v29 = vpack.c.bf16 %v556_v58, %v544_v57  ;;  %v4902_v38 = vpack.c.bf16 %v588_v52, %v576_v49  ;;  %v4970_v39 = vpack.c.bf16 %v1105_v6, %v1093_v4  ;;  %v4922_v44 = vpack.c.bf16 %v562_v8, %v550_v7  ;;  %v1544_v4 = vld [vmem:[#allocation7] sm:$0xff]  ;;  %v1546_v6 = vld [vmem:[#allocation7 + $0x10] sm:$0xff]  ;;  %v1553_v8 = vld [vmem:[#allocation7 + $0x48] sm:$0xff] }
  0xf0   : > { %v4972_v45 = vpack.c.bf16 %v1123_v27, %v1111_v19  ;;  %v4924_v47 = vpack.c.bf16 %v580_v36, %v568_v35  ;;  %v4974_v48 = vpack.c.bf16 %v1129_v51, %v1117_v40  ;;  %v4926_v50 = vpack.c.bf16 %v586_v9, %v574_v5  ;;  %v1548_v7 = vld [vmem:[#allocation7 + $0x20] sm:$0xff]  ;;  %v1554_v36 = vld [vmem:[#allocation7 + $0x50] sm:$0xff]  ;;  %v1559_v40 = vld [vmem:[#allocation7 + $0x78] sm:$0xff] }
  0xf1   : > { %v409_v56 = vmul.f32 %v6822_v1, %v6822_v1  ;;  %v1545_v1 = vld [vmem:[#allocation7 + $0x8] sm:$0xff]  ;;  %v1552_v35 = vld [vmem:[#allocation7 + $0x40] sm:$0xff]  ;;  %v1558_v51 = vld [vmem:[#allocation7 + $0x70] sm:$0xff]  ;;  %v5004_v20 = vpack.c.bf16 %v1567_v14, %v1565_v13  ;;  %vm6484_vm2 = vmmov 0  }
  0xf2   : > { %v4984_v61 = vpack.c.bf16 %v1547_v60, %v1545_v1  ;;  %v1563_v5 = vld [vmem:[#allocation7 + $0x98] sm:$0xff]  ;;  %v1570_v49 = vld [vmem:[#allocation7 + $0xd0] sm:$0xff]  ;;  %v1573_v52 = vld [vmem:[#allocation7 + $0xe8] sm:$0xff] }
  0xf3   : > { %v1584_v1 = vld [vmem:[#allocation7 + $0x140] sm:$0xff]  ;;  %v1586_v60 = vld [vmem:[#allocation7 + $0x150] sm:$0xff] }
  0xf4   : > { %v1604_v14 = vld [vmem:[#allocation7 + $0x1e0] sm:$0xff] }
 0x147   : > { %v412_v16 = vpop.permute.xlu0 %411 }
 0x148   : > { %v415_v17 = vsel %vm414_vm0, %v409_v56, %v412_v16  ;;  %v1583_v56 = vld [vmem:[#allocation7 + $0x138] sm:$0xff] }
 0x149   : > { %v456_v53 = vsel %vm454_vm1, %v415_v17, 0 }
 0x14a   : > { %v6947_v54 = vand.u32 4294901760, %v456_v53 }
 0x14c   : > { %v532_v23 = vsub.f32 %v456_v53, %v6947_v54  ;;  %v1580_v53 = vld [vmem:[#allocation7 + $0x120] sm:$0xff] }
 0x14e   : > { %v533_v24 = vand.u32 4294901760, %v532_v23 }
 0x150   : > { %v534_v57 = vsub.f32 %v532_v23, %v533_v24 }
 0x152   : > { %v535_v58 = vand.u32 4294901760, %v534_v57 }
 0x154   : > { %536 = vmatmul.mubr.f32.vlgmr.msra.gmra.mrb[0].mxu0 %v535_v58  ;;  %1079 = vmatmul.mubr.f32.vlgmr.msra.gmra.mrb[0].mxu1 %v535_v58 }
 0x155   : > { %4947 = vmatpush1.bf16.msra.mxu1 %v4946_v41  ;;  %4899 = vmatpush1.bf16.msra.mxu0 %v4898_v42  ;;  %v1556_v42 = vld [vmem:[#allocation7 + $0x60] sm:$0xff] }
 0x156   : > { %4949 = vmatprep.subr.bf16.mxu1 %v4948_v11  ;;  %4901 = vmatprep.subr.bf16.mxu0 %v4900_v30  ;;  %v4998_v9 = vpack.c.bf16 %v1558_v51, %v1556_v42  ;;  %v1560_v11 = vld [vmem:[#allocation7 + $0x80] sm:$0xff]  ;;  %v1569_v30 = vld [vmem:[#allocation7 + $0xc8] sm:$0xff]  ;;  %v1603_v42 = vld [vmem:[#allocation7 + $0x1d8] sm:$0xff] }
 0x157   : > { %646 = vmatprep.mubr.f32.mxu0 %v6481_v0  ;;  %1189 = vmatprep.mubr.f32.mxu1 %v6481_v0  ;;  %v5002_v18 = vpack.c.bf16 %v1562_v12, %v1560_v11  ;;  %v1605_v11 = vld [vmem:[#allocation7 + $0x1e8] sm:$0xff]  ;;  %v1607_v12 = vld [vmem:[#allocation7 + $0x1f8] sm:$0xff] }
 0x158   : > { %v5044_v13 = vpack.c.bf16 %v1607_v12, %v1605_v11  ;;  %v1710_v12 = vld [vmem:[#allocation7 + $0x2e0] sm:$0xff] }
 0x159   : > { %4951 = vmatpush1.bf16.msra.mxu1 %v4950_v34  ;;  %4903 = vmatpush1.bf16.msra.mxu0 %v4902_v38  ;;  %v1568_v34 = vld [vmem:[#allocation7 + $0xc0] sm:$0xff]  ;;  %v1577_v38 = vld [vmem:[#allocation7 + $0x108] sm:$0xff] }
 0x15a   : > { %4953 = vmatprep.subr.bf16.mxu1 %v4952_v10  ;;  %4905 = vmatprep.subr.bf16.mxu0 %v4904_v26  ;;  %v5000_v10 = vpack.c.bf16 %v1563_v5, %v1561_v3  ;;  %v1566_v26 = vld [vmem:[#allocation7 + $0xb0] sm:$0xff]  ;;  %v1600_v5 = vld [vmem:[#allocation7 + $0x1c0] sm:$0xff] }
 0x15c   : > { %648 = vmatmul.mubr.f32.vlgmr.msra.gmra.mrb[0].mxu0 %v6947_v54  ;;  %1191 = vmatmul.mubr.f32.vlgmr.msra.gmra.mrb[0].mxu1 %v6947_v54 }
 0x15d   : > { %4955 = vmatpush1.bf16.msra.mxu1 %v4954_v31  ;;  %4907 = vmatpush1.bf16.msra.mxu0 %v4906_v32  ;;  %v1571_v31 = vld [vmem:[#allocation7 + $0xd8] sm:$0xff]  ;;  %v5006_v32 = vpack.c.bf16 %v1566_v26, %v1564_v21  ;;  %v1683_v21 = vld [vmem:[#allocation7 + $0x208] sm:$0xff] }
 0x15e   : > { %4957 = vmatprep.subr.bf16.mxu1 %v4956_v33  ;;  %4909 = vmatprep.subr.bf16.mxu0 %v4908_v62  ;;  %v5008_v33 = vpack.c.bf16 %v1571_v31, %v1569_v30  ;;  %v1575_v62 = vld [vmem:[#allocation7 + $0xf8] sm:$0xff]  ;;  %v434_v31 = vlaneseq }
 0x15f   : > { %734 = vmatprep.mubr.f32.mxu0 %v6481_v0  ;;  %1277 = vmatprep.mubr.f32.mxu1 %v6481_v0  ;;  %v1685_v26 = vld [vmem:[#allocation7 + $0x218] sm:$0xff] }
 0x160   : > { %v5048_v30 = vpack.c.bf16 %v1685_v26, %v1683_v21  ;;  %v1714_v26 = vld [vmem:[#allocation7 + $0x300] sm:$0xff] }
 0x161   : > { %4959 = vmatpush1.bf16.msra.mxu1 %v4958_v63  ;;  %4911 = vmatpush1.bf16.msra.mxu0 %v4910_v2  ;;  %v5010_v63 = vpack.c.bf16 %v1570_v49, %v1568_v34  ;;  %v5012_v2 = vpack.c.bf16 %v1575_v62, %v1573_v52  ;;  %v432_v34 = vld [vmem:[%s7403_s2] sm:$0xf] }
 0x162   : > { %4961 = vmatprep.subr.bf16.mxu1 %v6825_v15  ;;  %4913 = vmatprep.subr.bf16.mxu0 %v6831_v22 }
 0x164   : > { %737 = vmatmul.mubr.f32.vlgmr.msra.gmra.mrb[0].mxu0 %v532_v23  ;;  %1280 = vmatmul.mubr.f32.vlgmr.msra.gmra.mrb[0].mxu1 %v532_v23  ;;  %v1585_v23 = vld [vmem:[#allocation7 + $0x148] sm:$0xff] }
 0x165   : > { %4963 = vmatpush1.bf16.msra.mxu1 %v6840_v28  ;;  %4915 = vmatpush1.bf16.msra.mxu0 %v6846_v37 }
 0x166   : > { %4965 = vmatprep.subr.bf16.mxu1 %v6852_v43  ;;  %4917 = vmatprep.subr.bf16.mxu0 %v6858_v46 }
 0x167   : > { %815 = vmatprep.mubr.f32.mxu0 %v6481_v0  ;;  %1358 = vmatprep.mubr.f32.mxu1 %v6481_v0 }
 0x169   : > { %4967 = vmatpush1.bf16.msra.mxu1 %v6871_v55  ;;  %4919 = vmatpush1.bf16.msra.mxu0 %v6877_v59 }
 0x16a   : > { %4969 = vmatprep.subr.bf16.mxu1 %v4968_v25  ;;  %4921 = vmatprep.subr.bf16.mxu0 %v4920_v29  ;;  %v1572_v25 = vld [vmem:[#allocation7 + $0xe0] sm:$0xff]  ;;  %v1574_v29 = vld [vmem:[#allocation7 + $0xf0] sm:$0xff] }
 0x16c   : > { %819 = vmatmul.mubr.f32.vlgmr.msra.gmra.mrb[0].mxu0 %v533_v24  ;;  %1362 = vmatmul.mubr.f32.vlgmr.msra.gmra.mrb[0].mxu1 %v533_v24  ;;  %v1587_v24 = vld [vmem:[#allocation7 + $0x158] sm:$0xff] }
 0x16d   : > { %4971 = vmatpush1.bf16.msra.mxu1 %v4970_v39  ;;  %4923 = vmatpush1.bf16.msra.mxu0 %v4922_v44  ;;  %v1579_v39 = vld [vmem:[#allocation7 + $0x118] sm:$0xff]  ;;  %v5014_v44 = vpack.c.bf16 %v1574_v29, %v1572_v25  ;;  %v5024_v58 = vpack.c.bf16 %v1587_v24, %v1585_v23 }
 0x16e   : > { %4973 = vmatprep.subr.bf16.mxu1 %v4972_v45  ;;  %4925 = vmatprep.subr.bf16.mxu0 %v4924_v47  ;;  %v5016_v45 = vpack.c.bf16 %v1579_v39, %v1577_v38  ;;  %v1576_v47 = vld [vmem:[#allocation7 + $0x100] sm:$0xff]  ;;  %v1687_v38 = vld [vmem:[#allocation7 + $0x228] sm:$0xff]  ;;  %v1689_v39 = vld [vmem:[#allocation7 + $0x238] sm:$0xff] }
 0x16f   : > { %913 = vmatprep.mubr.f32.mxu0 %v6481_v0  ;;  %1456 = vmatprep.mubr.f32.mxu1 %v6481_v0 }
 0x171   : > { %4975 = vmatpush1.bf16.msra.mxu1 %v4974_v48  ;;  %4927 = vmatpush1.bf16.msra.mxu0 %v4926_v50  ;;  %v1578_v48 = vld [vmem:[#allocation7 + $0x110] sm:$0xff]  ;;  %v1581_v50 = vld [vmem:[#allocation7 + $0x128] sm:$0xff] }
 0x172   : > { %4977 = vmatprep.subr.bf16.mxu1 %v6825_v15  ;;  %4929 = vmatprep.subr.bf16.mxu0 %v6831_v22  ;;  %v1549_v15 = vld [vmem:[#allocation7 + $0x28] sm:$0xff]  ;;  %v1551_v22 = vld [vmem:[#allocation7 + $0x38] sm:$0xff]  ;;  %v5018_v16 = vpack.c.bf16 %v1578_v48, %v1576_v47  ;;  %v5020_v17 = vpack.c.bf16 %v1583_v56, %v1581_v50  ;;  %v5052_v56 = vpack.c.bf16 %v1689_v39, %v1687_v38  ;;  %v1722_v39 = vld [vmem:[#allocation7 + $0x340] sm:$0xff] }
 0x174   : > { %915 = vmatmul.mubr.f32.vlgmr.msra.gmra.mrb[0].mxu0 %v6947_v54  ;;  %1458 = vmatmul.mubr.f32.vlgmr.msra.gmra.mrb[0].mxu1 %v6947_v54 }
 0x175   : > { %4979 = vmatpush1.bf16.msra.mxu1 %v6840_v28  ;;  %4931 = vmatpush1.bf16.msra.mxu0 %v6846_v37  ;;  %v4986_v28 = vpack.c.bf16 %v1546_v6, %v1544_v4  ;;  %v4988_v37 = vpack.c.bf16 %v1551_v22, %v1549_v15  ;;  %v1591_v4 = vld [vmem:[#allocation7 + $0x178] sm:$0xff]  ;;  %v5026_v6 = vpack.c.bf16 %v1586_v60, %v1584_v1  ;;  %v1588_v22 = vld [vmem:[#allocation7 + $0x160] sm:$0xff]  ;;  %v1695_v1 = vld [vmem:[#allocation7 + $0x268] sm:$0xff] }
 0x176   : > { %4981 = vmatprep.subr.bf16.mxu1 %v6852_v43  ;;  %4933 = vmatprep.subr.bf16.mxu0 %v6858_v46  ;;  %v1550_v43 = vld [vmem:[#allocation7 + $0x30] sm:$0xff]  ;;  %v1555_v46 = vld [vmem:[#allocation7 + $0x58] sm:$0xff] }
 0x177   : > { %993 = vmatprep.mubr.f32.mxu0 %v6481_v0  ;;  %1536 = vmatprep.mubr.f32.mxu1 %v6481_v0  ;;  %v4990_v19 = vpack.c.bf16 %v1550_v43, %v1548_v7  ;;  %v4992_v27 = vpack.c.bf16 %v1555_v46, %v1553_v8  ;;  %v1595_v7 = vld [vmem:[#allocation7 + $0x198] sm:$0xff]  ;;  %v1592_v46 = vld [vmem:[#allocation7 + $0x180] sm:$0xff] }
 0x178   : > { %v1697_v60 = vld [vmem:[#allocation7 + $0x278] sm:$0xff] }
 0x179   : > { %4983 = vmatpush1.bf16.msra.mxu1 %v6871_v55  ;;  %4935 = vmatpush1.bf16.msra.mxu0 %v6877_v59  ;;  %v1557_v55 = vld [vmem:[#allocation7 + $0x68] sm:$0xff]  ;;  %v4994_v59 = vpack.c.bf16 %v1554_v36, %v1552_v35  ;;  %v1599_v35 = vld [vmem:[#allocation7 + $0x1b8] sm:$0xff] }
 0x17a   : > { %4985 = vmatprep.subr.bf16.mxu1 %v4984_v61  ;;  %v4996_v41 = vpack.c.bf16 %v1559_v40, %v1557_v55  ;;  %v1589_v61 = vld [vmem:[#allocation7 + $0x168] sm:$0xff]  ;;  %v1596_v40 = vld [vmem:[#allocation7 + $0x1a0] sm:$0xff] }
 0x17b   : > { %v5028_v15 = vpack.c.bf16 %v1591_v4, %v1589_v61  ;;  %v5060_v4 = vpack.c.bf16 %v1697_v60, %v1695_v1  ;;  %v1730_v1 = vld [vmem:[#allocation7 + $0x380] sm:$0xff]  ;;  %v1732_v60 = vld [vmem:[#allocation7 + $0x390] sm:$0xff] }
 0x17c   : > { %995 = vmatmul.mubr.f32.vlgmr.msra.gmra.mrb[0].mxu0 %v6947_v54  ;;  %1538 = vmatmul.mubr.f32.vlgmr.msra.gmra.mrb[0].mxu1 %v6947_v54  ;;  %v1582_v54 = vld [vmem:[#allocation7 + $0x130] sm:$0xff] }
 0x17d   : > { %4987 = vmatpush1.bf16.msra.mxu1 %v4986_v28  ;;  %v5022_v57 = vpack.c.bf16 %v1582_v54, %v1580_v53  ;;  %v1590_v28 = vld [vmem:[#allocation7 + $0x170] sm:$0xff]  ;;  %v1691_v53 = vld [vmem:[#allocation7 + $0x248] sm:$0xff]  ;;  %v1693_v54 = vld [vmem:[#allocation7 + $0x258] sm:$0xff] }
 0x17e   : > { %4989 = vmatprep.subr.bf16.mxu1 %v4988_v37  ;;  %v1593_v37 = vld [vmem:[#allocation7 + $0x188] sm:$0xff]  ;;  %v5030_v43 = vpack.c.bf16 %v1590_v28, %v1588_v22  ;;  %v5056_v24 = vpack.c.bf16 %v1693_v54, %v1691_v53  ;;  %v1701_v28 = vld [vmem:[#allocation7 + $0x298] sm:$0xff]  ;;  %v1726_v53 = vld [vmem:[#allocation7 + $0x360] sm:$0xff] }
 0x17f   : > { %v5032_v8 = vpack.c.bf16 %v1595_v7, %v1593_v37  ;;  %v1699_v22 = vld [vmem:[#allocation7 + $0x288] sm:$0xff]  ;;  %v1728_v54 = vld [vmem:[#allocation7 + $0x370] sm:$0xff] }
 0x180   : > { %v5064_v7 = vpack.c.bf16 %v1701_v28, %v1699_v22  ;;  %v1734_v22 = vld [vmem:[#allocation7 + $0x3a0] sm:$0xff]  ;;  %v1736_v28 = vld [vmem:[#allocation7 + $0x3b0] sm:$0xff] }
 0x181   : > { %4991 = vmatpush1.bf16.msra.mxu1 %v4990_v19  ;;  %v1594_v19 = vld [vmem:[#allocation7 + $0x190] sm:$0xff] }
 0x182   : > { %4993 = vmatprep.subr.bf16.mxu1 %v4992_v27  ;;  %v1597_v27 = vld [vmem:[#allocation7 + $0x1a8] sm:$0xff]  ;;  %v5034_v36 = vpack.c.bf16 %v1594_v19, %v1592_v46  ;;  %v1705_v19 = vld [vmem:[#allocation7 + $0x2b8] sm:$0xff] }
 0x183   : > { %v5036_v55 = vpack.c.bf16 %v1599_v35, %v1597_v27  ;;  %v1703_v46 = vld [vmem:[#allocation7 + $0x2a8] sm:$0xff] }
 0x184   : > { %v5068_v35 = vpack.c.bf16 %v1705_v19, %v1703_v46  ;;  %v1738_v46 = vld [vmem:[#allocation7 + $0x3c0] sm:$0xff]  ;;  %v1740_v19 = vld [vmem:[#allocation7 + $0x3d0] sm:$0xff] }
 0x185   : > { %4995 = vmatpush1.bf16.msra.mxu1 %v4994_v59  ;;  %v1598_v59 = vld [vmem:[#allocation7 + $0x1b0] sm:$0xff] }
 0x186   : > { %4997 = vmatprep.subr.bf16.mxu1 %v4996_v41  ;;  %v1601_v41 = vld [vmem:[#allocation7 + $0x1c8] sm:$0xff]  ;;  %v5038_v51 = vpack.c.bf16 %v1598_v59, %v1596_v40  ;;  %v1709_v59 = vld [vmem:[#allocation7 + $0x2d8] sm:$0xff] }
 0x187   : > { %v5040_v3 = vpack.c.bf16 %v1603_v42, %v1601_v41  ;;  %v1707_v40 = vld [vmem:[#allocation7 + $0x2c8] sm:$0xff] }
 0x188   : > { %v5072_v42 = vpack.c.bf16 %v1709_v59, %v1707_v40  ;;  %v1742_v40 = vld [vmem:[#allocation7 + $0x3e0] sm:$0xff]  ;;  %v1744_v59 = vld [vmem:[#allocation7 + $0x3f0] sm:$0xff] }
 0x189   : > { %4999 = vmatpush1.bf16.msra.mxu1 %v4998_v9  ;;  %v1602_v9 = vld [vmem:[#allocation7 + $0x1d0] sm:$0xff] }
 0x18a   : > { %5001 = vmatprep.subr.bf16.mxu1 %v5000_v10  ;;  %v5042_v10 = vpack.c.bf16 %v1602_v9, %v1600_v5  ;;  %v1711_v5 = vld [vmem:[#allocation7 + $0x2e8] sm:$0xff]  ;;  %v1713_v9 = vld [vmem:[#allocation7 + $0x2f8] sm:$0xff] }
 0x18b   : > { %v5076_v11 = vpack.c.bf16 %v1713_v9, %v1711_v5  ;;  %v1822_v9 = vld [vmem:[#allocation7 + $0x410] sm:$0xff] }
 0x18d   : > { %5003 = vmatpush1.bf16.msra.mxu1 %v5002_v18  ;;  %v1606_v18 = vld [vmem:[#allocation7 + $0x1f0] sm:$0xff] }
 0x18e   : > { %5005 = vmatprep.subr.bf16.mxu1 %v5004_v20  ;;  %v5046_v20 = vpack.c.bf16 %v1606_v18, %v1604_v14  ;;  %v1715_v14 = vld [vmem:[#allocation7 + $0x308] sm:$0xff]  ;;  %v1717_v18 = vld [vmem:[#allocation7 + $0x318] sm:$0xff] }
 0x18f   : > { %v5080_v21 = vpack.c.bf16 %v1717_v18, %v1715_v14  ;;  %v1824_v14 = vld [vmem:[#allocation7 + $0x420] sm:$0xff]  ;;  %v1826_v18 = vld [vmem:[#allocation7 + $0x430] sm:$0xff] }
 0x191   : > { %5007 = vmatpush1.bf16.msra.mxu1 %v5006_v32  ;;  %v6982_v32 = vshrl.u32 %v434_v31, 7  ;;  %v1719_v31 = vld [vmem:[#allocation7 + $0x328] sm:$0xff] }
 0x192   : > { %5009 = vmatprep.subr.bf16.mxu1 %v5008_v33 }
 0x193   : > { %v448_v33 = vsub.s32 3, %v6982_v32  ;;  %v444_v49 = vsub.s32 2, %v6982_v32 }
 0x195   : > { %5011 = vmatpush1.bf16.msra.mxu1 %v5010_v63  ;;  %v449_v52 = vrot.slane %v432_v34, %v448_v33  ;;  %v445_v62 = vrot.slane %v432_v34, %v444_v49  ;;  %v1682_v63 = vld [vmem:[#allocation7 + $0x200] sm:$0xff]  ;;  %v1721_v33 = vld [vmem:[#allocation7 + $0x338] sm:$0xff] }
 0x196   : > { %5013 = vmatprep.subr.bf16.mxu1 %v5012_v2  ;;  %v1684_v2 = vld [vmem:[#allocation7 + $0x210] sm:$0xff]  ;;  %v5084_v49 = vpack.c.bf16 %v1721_v33, %v1719_v31  ;;  %v1828_v31 = vld [vmem:[#allocation7 + $0x440] sm:$0xff] }
 0x197   : > { %v5050_v48 = vpack.c.bf16 %v1684_v2, %v1682_v63  ;;  %v1723_v63 = vld [vmem:[#allocation7 + $0x348] sm:$0xff]  ;;  %v1725_v2 = vld [vmem:[#allocation7 + $0x358] sm:$0xff]  ;;  %v1830_v33 = vld [vmem:[#allocation7 + $0x450] sm:$0xff] }
 0x198   : > { %v5088_v38 = vpack.c.bf16 %v1725_v2, %v1723_v63  ;;  %v1832_v63 = vld [vmem:[#allocation7 + $0x460] sm:$0xff]  ;;  %v1834_v2 = vld [vmem:[#allocation7 + $0x470] sm:$0xff] }
 0x199   : > { %5015 = vmatpush1.bf16.msra.mxu1 %v5014_v44 }
 0x19a   : > { %5017 = vmatprep.subr.bf16.mxu1 %v5016_v45 }
 0x19d   : > { %5019 = vmatpush1.bf16.msra.mxu1 %v5018_v16  ;;  %v1686_v16 = vld [vmem:[#allocation7 + $0x220] sm:$0xff] }
 0x19e   : > { %5021 = vmatprep.subr.bf16.mxu1 %v5020_v17  ;;  %v1688_v17 = vld [vmem:[#allocation7 + $0x230] sm:$0xff] }
 0x19f   : > { %v5054_v23 = vpack.c.bf16 %v1688_v17, %v1686_v16 }
 0x1a1   : > { %5023 = vmatpush1.bf16.msra.mxu1 %v5022_v57  ;;  %v1690_v57 = vld [vmem:[#allocation7 + $0x240] sm:$0xff] }
 0x1a2   : > { %5025 = vmatprep.subr.bf16.mxu1 %v5024_v58  ;;  %v1692_v58 = vld [vmem:[#allocation7 + $0x250] sm:$0xff] }
 0x1a3   : > { %v5058_v61 = vpack.c.bf16 %v1692_v58, %v1690_v57  ;;  %v5094_v57 = vpack.c.bf16 %v1728_v54, %v1726_v53 }
 0x1a5   : > { %5027 = vmatpush1.bf16.msra.mxu1 %v5026_v6  ;;  %v1694_v6 = vld [vmem:[#allocation7 + $0x260] sm:$0xff] }
 0x1a6   : > { %5029 = vmatprep.subr.bf16.mxu1 %v5028_v15  ;;  %v1696_v15 = vld [vmem:[#allocation7 + $0x270] sm:$0xff] }
 0x1a7   : > { %v5062_v37 = vpack.c.bf16 %v1696_v15, %v1694_v6  ;;  %v5098_v6 = vpack.c.bf16 %v1732_v60, %v1730_v1 }
 0x1a9   : > { %5031 = vmatpush1.bf16.msra.mxu1 %v5030_v43  ;;  %v1698_v43 = vld [vmem:[#allocation7 + $0x280] sm:$0xff] }
 0x1aa   : > { %5033 = vmatprep.subr.bf16.mxu1 %v5032_v8  ;;  %v1700_v8 = vld [vmem:[#allocation7 + $0x290] sm:$0xff] }
 0x1ab   : > { %v5066_v27 = vpack.c.bf16 %v1700_v8, %v1698_v43  ;;  %v5102_v43 = vpack.c.bf16 %v1736_v28, %v1734_v22 }
 0x1ad   : > { %5035 = vmatpush1.bf16.msra.mxu1 %v5034_v36  ;;  %v1702_v36 = vld [vmem:[#allocation7 + $0x2a0] sm:$0xff] }
 0x1ae   : > { %5037 = vmatprep.subr.bf16.mxu1 %v5036_v55  ;;  %v1704_v55 = vld [vmem:[#allocation7 + $0x2b0] sm:$0xff] }
 0x1af   : > { %v5070_v41 = vpack.c.bf16 %v1704_v55, %v1702_v36  ;;  %v1745_v36 = vld [vmem:[#allocation7 + $0x3f8] sm:$0xff] }
 0x1b1   : > { %5039 = vmatpush1.bf16.msra.mxu1 %v5038_v51  ;;  %v1706_v51 = vld [vmem:[#allocation7 + $0x2c0] sm:$0xff] }
 0x1b2   : > { %5041 = vmatprep.subr.bf16.mxu1 %v5040_v3  ;;  %v1708_v3 = vld [vmem:[#allocation7 + $0x2d0] sm:$0xff] }
 0x1b5   : > { %5043 = vmatpush1.bf16.msra.mxu1 %v5042_v10  ;;  %v5074_v10 = vpack.c.bf16 %v1708_v3, %v1706_v51  ;;  %v1823_v51 = vld [vmem:[#allocation7 + $0x418] sm:$0xff]  ;;  %v1820_v3 = vld [vmem:[#allocation7 + $0x400] sm:$0xff] }
 0x1b6   : > { %5045 = vmatprep.subr.bf16.mxu1 %v5044_v13  ;;  %v1712_v13 = vld [vmem:[#allocation7 + $0x2f0] sm:$0xff] }
 0x1b9   : > { %5047 = vmatpush1.bf16.msra.mxu1 %v5046_v20  ;;  %v5078_v20 = vpack.c.bf16 %v1712_v13, %v1710_v12  ;;  %v5114_v12 = vpack.c.bf16 %v1822_v9, %v1820_v3  ;;  %v1863_v3 = vld [vmem:[#allocation7 + $0x558] sm:$0xff] }
 0x1ba   : > { %5049 = vmatprep.subr.bf16.mxu1 %v5048_v30  ;;  %v1716_v30 = vld [vmem:[#allocation7 + $0x310] sm:$0xff] }
 0x1bb   : > { %v5082_v34 = vpack.c.bf16 %v1716_v30, %v1714_v26  ;;  %v5118_v26 = vpack.c.bf16 %v1826_v18, %v1824_v14 }
 0x24f   : > { %v6989_v25 = vpop.f32.mrb[0].mxu0  ;;  %v1539_v29 = vpop.f32.mrb[0].mxu1 }
 0x250   : > { %v6991_v44 = vpop.f32.mrb[1].mxu0  ;;  %v1541_v45 = vpop.f32.mrb[1].mxu1  ;;  %v6995_v50 = vadd.f32 %v1539_v29, %v445_v62  ;;  %v1720_v62 = vld [vmem:[#allocation7 + $0x330] sm:$0xff] }
 0x251   : > { %v6993_v47 = vadd.f32 %v1541_v45, %v449_v52  ;;  %v1718_v52 = vld [vmem:[#allocation7 + $0x320] sm:$0xff]  ;;  %v1724_v45 = vld [vmem:[#allocation7 + $0x350] sm:$0xff] }
 0x252   : > { %v5086_v29 = vpack.c.bf16 %v1720_v62, %v1718_v52  ;;  %v5090_v16 = vpack.c.bf16 %v1724_v45, %v1722_v39  ;;  %v5122_v52 = vpack.c.bf16 %v1830_v33, %v1828_v31  ;;  %v5126_v39 = vpack.c.bf16 %v1834_v2, %v1832_v63 }
 0x253   : > { %1672 = vmatprep.mubr.f32.mxu1 %v6993_v47 }
 0x254   : > { %1673 = vmatmul.mubr.f32.vlgmr.msra.gmra.mrb[2].mxu1 %v6995_v50 }
 0x255   : > { %5051 = vmatpush1.bf16.msra.mxu1 %v5050_v48  ;;  %v1727_v48 = vld [vmem:[#allocation7 + $0x368] sm:$0xff] }
 0x256   : > { %5053 = vmatprep.subr.bf16.mxu1 %v5052_v56  ;;  %v1729_v56 = vld [vmem:[#allocation7 + $0x378] sm:$0xff] }
 0x257   : > { %v5092_v17 = vpack.c.bf16 %v1729_v56, %v1727_v48  ;;  %v1836_v48 = vld [vmem:[#allocation7 + $0x480] sm:$0xff]  ;;  %v1838_v56 = vld [vmem:[#allocation7 + $0x490] sm:$0xff] }
 0x258   : > { %v5130_v53 = vpack.c.bf16 %v1838_v56, %v1836_v48 }
 0x259   : > { %5055 = vmatpush1.bf16.msra.mxu1 %v5054_v23  ;;  %v1731_v23 = vld [vmem:[#allocation7 + $0x388] sm:$0xff] }
 0x25a   : > { %5057 = vmatprep.subr.bf16.mxu1 %v5056_v24  ;;  %v1733_v24 = vld [vmem:[#allocation7 + $0x398] sm:$0xff] }
 0x25b   : > { %v5096_v58 = vpack.c.bf16 %v1733_v24, %v1731_v23  ;;  %v1840_v23 = vld [vmem:[#allocation7 + $0x4a0] sm:$0xff]  ;;  %v1842_v24 = vld [vmem:[#allocation7 + $0x4b0] sm:$0xff] }
 0x25c   : > { %v5134_v1 = vpack.c.bf16 %v1842_v24, %v1840_v23 }
 0x25d   : > { %5059 = vmatpush1.bf16.msra.mxu1 %v5058_v61  ;;  %v1735_v61 = vld [vmem:[#allocation7 + $0x3a8] sm:$0xff] }
 0x25e   : > { %5061 = vmatprep.subr.bf16.mxu1 %v5060_v4  ;;  %v1737_v4 = vld [vmem:[#allocation7 + $0x3b8] sm:$0xff] }
 0x25f   : > { %v5100_v15 = vpack.c.bf16 %v1737_v4, %v1735_v61  ;;  %v1844_v61 = vld [vmem:[#allocation7 + $0x4c0] sm:$0xff]  ;;  %v1846_v4 = vld [vmem:[#allocation7 + $0x4d0] sm:$0xff] }
 0x260   : > { %v5138_v22 = vpack.c.bf16 %v1846_v4, %v1844_v61  ;;  %v1880_v61 = vld [vmem:[#allocation7 + $0x5e0] sm:$0xff]  ;;  %v1882_v4 = vld [vmem:[#allocation7 + $0x5f0] sm:$0xff] }
 0x261   : > { %5063 = vmatpush1.bf16.msra.mxu1 %v5062_v37  ;;  %v1739_v37 = vld [vmem:[#allocation7 + $0x3c8] sm:$0xff] }
 0x262   : > { %5065 = vmatprep.subr.bf16.mxu1 %v5064_v7  ;;  %v1741_v7 = vld [vmem:[#allocation7 + $0x3d8] sm:$0xff] }
 0x263   : > { %v5104_v8 = vpack.c.bf16 %v1741_v7, %v1739_v37  ;;  %v1848_v37 = vld [vmem:[#allocation7 + $0x4e0] sm:$0xff]  ;;  %v1850_v7 = vld [vmem:[#allocation7 + $0x4f0] sm:$0xff] }
 0x265   : > { %5067 = vmatpush1.bf16.msra.mxu1 %v5066_v27  ;;  %v5106_v27 = vpack.c.bf16 %v1740_v19, %v1738_v46  ;;  %v5142_v46 = vpack.c.bf16 %v1850_v7, %v1848_v37  ;;  %v1960_v7 = vld [vmem:[#allocation7 + $0x610] sm:$0xff] }
 0x266   : > { %5069 = vmatprep.subr.bf16.mxu1 %v5068_v35  ;;  %v1743_v35 = vld [vmem:[#allocation7 + $0x3e8] sm:$0xff] }
 0x267   : > { %v5108_v55 = vpack.c.bf16 %v1745_v36, %v1743_v35  ;;  %v1854_v35 = vld [vmem:[#allocation7 + $0x510] sm:$0xff]  ;;  %v1857_v36 = vld [vmem:[#allocation7 + $0x528] sm:$0xff] }
 0x269   : > { %5071 = vmatpush1.bf16.msra.mxu1 %v5070_v41  ;;  %v5110_v41 = vpack.c.bf16 %v1744_v59, %v1742_v40 }
 0x26a   : > { %5073 = vmatprep.subr.bf16.mxu1 %v5072_v42  ;;  %v1821_v42 = vld [vmem:[#allocation7 + $0x408] sm:$0xff] }
 0x26b   : > { %v5112_v5 = vpack.c.bf16 %v1823_v51, %v1821_v42  ;;  %v1858_v42 = vld [vmem:[#allocation7 + $0x530] sm:$0xff]  ;;  %v1861_v51 = vld [vmem:[#allocation7 + $0x548] sm:$0xff] }
 0x26c   : > { %v5152_v9 = vpack.c.bf16 %v1863_v3, %v1861_v51  ;;  %v1971_v51 = vld [vmem:[#allocation7 + $0x668] sm:$0xff]  ;;  %v1973_v3 = vld [vmem:[#allocation7 + $0x678] sm:$0xff] }
 0x26d   : > { %5075 = vmatpush1.bf16.msra.mxu1 %v5074_v10  ;;  %v1825_v10 = vld [vmem:[#allocation7 + $0x428] sm:$0xff]  ;;  %5113 = vmatprep.subr.bf16.mxu0 %v5112_v5 }
 0x26e   : > { %5077 = vmatprep.subr.bf16.mxu1 %v5076_v11  ;;  %v1827_v11 = vld [vmem:[#allocation7 + $0x438] sm:$0xff]  ;;  %5115 = vmatpush1.bf16.msra.mxu0 %v5114_v12  ;;  %v1865_v12 = vld [vmem:[#allocation7 + $0x568] sm:$0xff] }
 0x26f   : > { %v5116_v13 = vpack.c.bf16 %v1827_v11, %v1825_v10  ;;  %v1860_v10 = vld [vmem:[#allocation7 + $0x540] sm:$0xff]  ;;  %v1862_v11 = vld [vmem:[#allocation7 + $0x550] sm:$0xff] }
 0x270   : > { %v5154_v14 = vpack.c.bf16 %v1862_v11, %v1860_v10  ;;  %v1970_v10 = vld [vmem:[#allocation7 + $0x660] sm:$0xff]  ;;  %v1972_v11 = vld [vmem:[#allocation7 + $0x670] sm:$0xff] }
 0x271   : > { %5079 = vmatpush1.bf16.msra.mxu1 %v5078_v20  ;;  %v1829_v20 = vld [vmem:[#allocation7 + $0x448] sm:$0xff]  ;;  %5117 = vmatprep.subr.bf16.mxu0 %v5116_v13  ;;  %v1867_v13 = vld [vmem:[#allocation7 + $0x578] sm:$0xff] }
 0x272   : > { %5081 = vmatprep.subr.bf16.mxu1 %v5080_v21  ;;  %v1831_v21 = vld [vmem:[#allocation7 + $0x458] sm:$0xff]  ;;  %5119 = vmatpush1.bf16.msra.mxu0 %v5118_v26  ;;  %v5156_v18 = vpack.c.bf16 %v1867_v13, %v1865_v12  ;;  %v1869_v26 = vld [vmem:[#allocation7 + $0x588] sm:$0xff] }
 0x273   : > { %v5120_v30 = vpack.c.bf16 %v1831_v21, %v1829_v20  ;;  %v1864_v20 = vld [vmem:[#allocation7 + $0x560] sm:$0xff]  ;;  %v1866_v21 = vld [vmem:[#allocation7 + $0x570] sm:$0xff]  ;;  %v1975_v12 = vld [vmem:[#allocation7 + $0x688] sm:$0xff] }
 0x274   : > { %v5158_v31 = vpack.c.bf16 %v1866_v21, %v1864_v20  ;;  %v1977_v13 = vld [vmem:[#allocation7 + $0x698] sm:$0xff]  ;;  %v1974_v20 = vld [vmem:[#allocation7 + $0x680] sm:$0xff]  ;;  %v1976_v21 = vld [vmem:[#allocation7 + $0x690] sm:$0xff] }
 0x275   : > { %5083 = vmatpush1.bf16.msra.mxu1 %v5082_v34  ;;  %v1833_v34 = vld [vmem:[#allocation7 + $0x468] sm:$0xff]  ;;  %5121 = vmatprep.subr.bf16.mxu0 %v5120_v30  ;;  %v1871_v30 = vld [vmem:[#allocation7 + $0x598] sm:$0xff] }
 0x276   : > { %5085 = vmatprep.subr.bf16.mxu1 %v5084_v49  ;;  %v1835_v49 = vld [vmem:[#allocation7 + $0x478] sm:$0xff]  ;;  %5123 = vmatpush1.bf16.msra.mxu0 %v5122_v52  ;;  %v5160_v33 = vpack.c.bf16 %v1871_v30, %v1869_v26  ;;  %v1873_v52 = vld [vmem:[#allocation7 + $0x5a8] sm:$0xff] }
 0x277   : > { %v5124_v62 = vpack.c.bf16 %v1835_v49, %v1833_v34  ;;  %v1868_v34 = vld [vmem:[#allocation7 + $0x580] sm:$0xff]  ;;  %v1870_v49 = vld [vmem:[#allocation7 + $0x590] sm:$0xff]  ;;  %v1979_v26 = vld [vmem:[#allocation7 + $0x6a8] sm:$0xff] }
 0x278   : > { %v5162_v63 = vpack.c.bf16 %v1870_v49, %v1868_v34  ;;  %v1981_v30 = vld [vmem:[#allocation7 + $0x6b8] sm:$0xff]  ;;  %v1978_v34 = vld [vmem:[#allocation7 + $0x6a0] sm:$0xff]  ;;  %v1980_v49 = vld [vmem:[#allocation7 + $0x6b0] sm:$0xff] }
 0x279   : > { %5087 = vmatpush1.bf16.msra.mxu1 %v5086_v29  ;;  %v1837_v29 = vld [vmem:[#allocation7 + $0x488] sm:$0xff]  ;;  %5125 = vmatprep.subr.bf16.mxu0 %v5124_v62  ;;  %v1875_v62 = vld [vmem:[#allocation7 + $0x5b8] sm:$0xff] }
 0x27a   : > { %5089 = vmatprep.subr.bf16.mxu1 %v5088_v38  ;;  %v1839_v38 = vld [vmem:[#allocation7 + $0x498] sm:$0xff]  ;;  %5127 = vmatpush1.bf16.msra.mxu0 %v5126_v39  ;;  %v5164_v2 = vpack.c.bf16 %v1875_v62, %v1873_v52  ;;  %v1877_v39 = vld [vmem:[#allocation7 + $0x5c8] sm:$0xff] }
 0x27b   : > { %v5128_v45 = vpack.c.bf16 %v1839_v38, %v1837_v29  ;;  %v1872_v29 = vld [vmem:[#allocation7 + $0x5a0] sm:$0xff]  ;;  %v1874_v38 = vld [vmem:[#allocation7 + $0x5b0] sm:$0xff]  ;;  %v1983_v52 = vld [vmem:[#allocation7 + $0x6c8] sm:$0xff] }
 0x27c   : > { %v5166_v48 = vpack.c.bf16 %v1874_v38, %v1872_v29  ;;  %v1985_v62 = vld [vmem:[#allocation7 + $0x6d8] sm:$0xff]  ;;  %v1982_v29 = vld [vmem:[#allocation7 + $0x6c0] sm:$0xff]  ;;  %v1984_v38 = vld [vmem:[#allocation7 + $0x6d0] sm:$0xff] }
 0x27d   : > { %5091 = vmatpush1.bf16.msra.mxu1 %v5090_v16  ;;  %v1841_v16 = vld [vmem:[#allocation7 + $0x4a8] sm:$0xff]  ;;  %5129 = vmatprep.subr.bf16.mxu0 %v5128_v45  ;;  %v1879_v45 = vld [vmem:[#allocation7 + $0x5d8] sm:$0xff] }
 0x27e   : > { %5093 = vmatprep.subr.bf16.mxu1 %v5092_v17  ;;  %v1843_v17 = vld [vmem:[#allocation7 + $0x4b8] sm:$0xff]  ;;  %5131 = vmatpush1.bf16.msra.mxu0 %v5130_v53  ;;  %v5168_v56 = vpack.c.bf16 %v1879_v45, %v1877_v39  ;;  %v1987_v39 = vld [vmem:[#allocation7 + $0x6e8] sm:$0xff] }
 0x27f   : > { %v5132_v54 = vpack.c.bf16 %v1843_v17, %v1841_v16  ;;  %v1876_v16 = vld [vmem:[#allocation7 + $0x5c0] sm:$0xff]  ;;  %v1878_v17 = vld [vmem:[#allocation7 + $0x5d0] sm:$0xff]  ;;  %v1989_v45 = vld [vmem:[#allocation7 + $0x6f8] sm:$0xff] }
 0x280   : > { %v5170_v53 = vpack.c.bf16 %v1878_v17, %v1876_v16  ;;  %v1986_v16 = vld [vmem:[#allocation7 + $0x6e0] sm:$0xff]  ;;  %v1988_v17 = vld [vmem:[#allocation7 + $0x6f0] sm:$0xff] }
 0x281   : > { %5095 = vmatpush1.bf16.msra.mxu1 %v5094_v57  ;;  %v1845_v57 = vld [vmem:[#allocation7 + $0x4c8] sm:$0xff]  ;;  %5133 = vmatprep.subr.bf16.mxu0 %v5132_v54 }
 0x282   : > { %5097 = vmatprep.subr.bf16.mxu1 %v5096_v58  ;;  %v1847_v58 = vld [vmem:[#allocation7 + $0x4d8] sm:$0xff]  ;;  %5135 = vmatpush1.bf16.msra.mxu0 %v5134_v1 }
 0x283   : > { %v5136_v60 = vpack.c.bf16 %v1847_v58, %v1845_v57  ;;  %v1881_v58 = vld [vmem:[#allocation7 + $0x5e8] sm:$0xff]  ;;  %v1883_v1 = vld [vmem:[#allocation7 + $0x5f8] sm:$0xff] }
 0x285   : > { %5099 = vmatpush1.bf16.msra.mxu1 %v5098_v6  ;;  %v1849_v6 = vld [vmem:[#allocation7 + $0x4e8] sm:$0xff]  ;;  %5137 = vmatprep.subr.bf16.mxu0 %v5136_v60  ;;  %v5172_v60 = vpack.c.bf16 %v1883_v1, %v1881_v58  ;;  %v1990_v1 = vld [vmem:[#allocation7 + $0x700] sm:$0xff] }
 0x286   : > { %5101 = vmatprep.subr.bf16.mxu1 %v5100_v15  ;;  %v1851_v15 = vld [vmem:[#allocation7 + $0x4f8] sm:$0xff]  ;;  %5139 = vmatpush1.bf16.msra.mxu0 %v5138_v22 }
 0x287   : > { %v5140_v28 = vpack.c.bf16 %v1851_v15, %v1849_v6  ;;  %v5174_v6 = vpack.c.bf16 %v1882_v4, %v1880_v61  ;;  %v1959_v15 = vld [vmem:[#allocation7 + $0x608] sm:$0xff]  ;;  %v1961_v22 = vld [vmem:[#allocation7 + $0x618] sm:$0xff] }
 0x288   : > { %v5176_v37 = vpack.c.bf16 %v1961_v22, %v1959_v15  ;;  %v1995_v61 = vld [vmem:[#allocation7 + $0x728] sm:$0xff]  ;;  %v1997_v4 = vld [vmem:[#allocation7 + $0x738] sm:$0xff]  ;;  %v1994_v22 = vld [vmem:[#allocation7 + $0x720] sm:$0xff] }
 0x289   : > { %5103 = vmatpush1.bf16.msra.mxu1 %v5102_v43  ;;  %v1853_v43 = vld [vmem:[#allocation7 + $0x508] sm:$0xff]  ;;  %5141 = vmatprep.subr.bf16.mxu0 %v5140_v28  ;;  %v1958_v28 = vld [vmem:[#allocation7 + $0x600] sm:$0xff]  ;;  %v5212_v15 = vpack.c.bf16 %v1997_v4, %v1995_v61 }
 0x28a   : > { %5105 = vmatprep.subr.bf16.mxu1 %v5104_v8  ;;  %v1855_v8 = vld [vmem:[#allocation7 + $0x518] sm:$0xff]  ;;  %5143 = vmatpush1.bf16.msra.mxu0 %v5142_v46  ;;  %v5178_v46 = vpack.c.bf16 %v1960_v7, %v1958_v28  ;;  %v1996_v28 = vld [vmem:[#allocation7 + $0x730] sm:$0xff] }
 0x28b   : > { %v5144_v19 = vpack.c.bf16 %v1855_v8, %v1853_v43  ;;  %v1963_v43 = vld [vmem:[#allocation7 + $0x628] sm:$0xff]  ;;  %v1965_v8 = vld [vmem:[#allocation7 + $0x638] sm:$0xff] }
 0x28c   : > { %v2001_v7 = vld [vmem:[#allocation7 + $0x758] sm:$0xff] }
 0x28d   : > { %5107 = vmatpush1.bf16.msra.mxu1 %v5106_v27  ;;  %v1852_v27 = vld [vmem:[#allocation7 + $0x500] sm:$0xff]  ;;  %5145 = vmatprep.subr.bf16.mxu0 %v5144_v19  ;;  %v5180_v19 = vpack.c.bf16 %v1965_v8, %v1963_v43  ;;  %v5214_v43 = vpack.c.bf16 %v1996_v28, %v1994_v22  ;;  %v2131_v22 = vld [vmem:[#allocation8 + $0x88] sm:$0xff] }
 0x28e   : > { %5109 = vmatprep.subr.bf16.mxu1 %v5108_v55  ;;  %v1859_v55 = vld [vmem:[#allocation7 + $0x538] sm:$0xff]  ;;  %v5146_v40 = vpack.c.bf16 %v1854_v35, %v1852_v27  ;;  %v1962_v27 = vld [vmem:[#allocation7 + $0x620] sm:$0xff]  ;;  %v1964_v35 = vld [vmem:[#allocation7 + $0x630] sm:$0xff] }
 0x28f   : > { %v5148_v59 = vpack.c.bf16 %v1859_v55, %v1857_v36  ;;  %v1967_v36 = vld [vmem:[#allocation7 + $0x648] sm:$0xff]  ;;  %v1969_v55 = vld [vmem:[#allocation7 + $0x658] sm:$0xff] }
 0x290   : > { %5147 = vmatpush1.bf16.msra.mxu0 %v5146_v40  ;;  %v5182_v40 = vpack.c.bf16 %v1964_v35, %v1962_v27  ;;  %v2003_v27 = vld [vmem:[#allocation7 + $0x768] sm:$0xff]  ;;  %v2005_v35 = vld [vmem:[#allocation7 + $0x778] sm:$0xff] }
 0x291   : > { %5111 = vmatpush1.bf16.msra.mxu1 %v5110_v41  ;;  %v1856_v41 = vld [vmem:[#allocation7 + $0x520] sm:$0xff]  ;;  %5149 = vmatprep.subr.bf16.mxu0 %v5148_v59  ;;  %v5184_v59 = vpack.c.bf16 %v1969_v55, %v1967_v36  ;;  %v5220_v55 = vpack.c.bf16 %v2005_v35, %v2003_v27  ;;  %v2132_v35 = vld [vmem:[#allocation8 + $0x90] sm:$0xff] }
 0x292   : > { %v5150_v5 = vpack.c.bf16 %v1858_v42, %v1856_v41  ;;  %5177 = vmatprep.subr.bf16.mxu1 %v5176_v37  ;;  %v1966_v41 = vld [vmem:[#allocation7 + $0x640] sm:$0xff]  ;;  %v1968_v42 = vld [vmem:[#allocation7 + $0x650] sm:$0xff]  ;;  %v1999_v37 = vld [vmem:[#allocation7 + $0x748] sm:$0xff] }
 0x293   : > { %v5216_v8 = vpack.c.bf16 %v2001_v7, %v1999_v37  ;;  %v2139_v37 = vld [vmem:[#allocation8 + $0xc8] sm:$0xff]  ;;  %v2133_v7 = vld [vmem:[#allocation8 + $0x98] sm:$0xff]  ;;  %v2138_v27 = vld [vmem:[#allocation8 + $0xc0] sm:$0xff] }
 0x294   : > { %5151 = vmatpush1.bf16.msra.mxu0 %v5150_v5  ;;  %v5186_v5 = vpack.c.bf16 %v1968_v42, %v1966_v41  ;;  %v2007_v41 = vld [vmem:[#allocation7 + $0x788] sm:$0xff]  ;;  %v2009_v42 = vld [vmem:[#allocation7 + $0x798] sm:$0xff] }
 0x295   : > { %5153 = vmatprep.subr.bf16.mxu0 %v5152_v9  ;;  %v5188_v9 = vpack.c.bf16 %v1973_v3, %v1971_v51  ;;  %v5224_v3 = vpack.c.bf16 %v2009_v42, %v2007_v41 }
 0x298   : > { %5155 = vmatpush1.bf16.msra.mxu0 %v5154_v14  ;;  %v5190_v14 = vpack.c.bf16 %v1972_v11, %v1970_v10  ;;  %v2011_v10 = vld [vmem:[#allocation7 + $0x7a8] sm:$0xff]  ;;  %v2013_v11 = vld [vmem:[#allocation7 + $0x7b8] sm:$0xff] }
 0x299   : > { %5157 = vmatprep.subr.bf16.mxu0 %v5156_v18  ;;  %v5192_v18 = vpack.c.bf16 %v1977_v13, %v1975_v12  ;;  %v5228_v13 = vpack.c.bf16 %v2013_v11, %v2011_v10  ;;  %v2154_v10 = vld [vmem:[#allocation8 + $0x140] sm:$0xff]  ;;  %v2148_v11 = vld [vmem:[#allocation8 + $0x110] sm:$0xff] }
 0x29c   : > { %5159 = vmatpush1.bf16.msra.mxu0 %v5158_v31  ;;  %v5194_v31 = vpack.c.bf16 %v1976_v21, %v1974_v20  ;;  %v2015_v20 = vld [vmem:[#allocation7 + $0x7c8] sm:$0xff]  ;;  %v2017_v21 = vld [vmem:[#allocation7 + $0x7d8] sm:$0xff] }
 0x29d   : > { %5161 = vmatprep.subr.bf16.mxu0 %v5160_v33  ;;  %v5196_v33 = vpack.c.bf16 %v1981_v30, %v1979_v26  ;;  %v5232_v30 = vpack.c.bf16 %v2017_v21, %v2015_v20  ;;  %v2165_v20 = vld [vmem:[#allocation8 + $0x198] sm:$0xff] }
 0x2a0   : > { %5163 = vmatpush1.bf16.msra.mxu0 %v5162_v63  ;;  %v5198_v63 = vpack.c.bf16 %v1980_v49, %v1978_v34 }
 0x2a1   : > { %5165 = vmatprep.subr.bf16.mxu0 %v5164_v2  ;;  %v5200_v2 = vpack.c.bf16 %v1985_v62, %v1983_v52 }
 0x2a4   : > { %5167 = vmatpush1.bf16.msra.mxu0 %v5166_v48  ;;  %v5202_v48 = vpack.c.bf16 %v1984_v38, %v1982_v29  ;;  %v2021_v29 = vld [vmem:[#allocation7 + $0x7f8] sm:$0xff] }
 0x2a5   : > { %5169 = vmatprep.subr.bf16.mxu0 %v5168_v56  ;;  %v5204_v56 = vpack.c.bf16 %v1989_v45, %v1987_v39  ;;  %v2018_v39 = vld [vmem:[#allocation7 + $0x7e0] sm:$0xff]  ;;  %v2020_v45 = vld [vmem:[#allocation7 + $0x7f0] sm:$0xff] }
 0x2a8   : > { %5171 = vmatpush1.bf16.msra.mxu0 %v5170_v53  ;;  %v1991_v53 = vld [vmem:[#allocation7 + $0x708] sm:$0xff] }
 0x2a9   : > { %5173 = vmatprep.subr.bf16.mxu0 %v5172_v60  ;;  %v1992_v60 = vld [vmem:[#allocation7 + $0x710] sm:$0xff] }
 0x2ac   : > { %5175 = vmatpush1.bf16.msra.mxu0 %v5174_v6  ;;  %v5210_v6 = vpack.c.bf16 %v1992_v60, %v1990_v1  ;;  %v2114_v1 = vld [vmem:[#allocation8] sm:$0xff] }
 0x2ad   : > { %v2122_v60 = vld [vmem:[#allocation8 + $0x40] sm:$0xff] }
 0x2ae   : > { %v5242_v4 = vpack.c.bf16 %v2122_v60, %v2114_v1  ;;  %v2205_v1 = vld [vmem:[#allocation8 + $0x2d8] sm:$0xff] }
 0x327   : > { %v1674_v54 = vpop.f32.mrb[2].mxu1 }
 0x328   : > { %v1676_v23 = vpop.f32.mrb[3].mxu1  ;;  %v7003_v57 = vmax.f32 %v6995_v50, %v1674_v54  ;;  %v1993_v54 = vld [vmem:[#allocation7 + $0x718] sm:$0xff] }
 0x329   : > { %v7000_v24 = vmax.f32 %v6993_v47, %v1676_v23  ;;  %v5206_v23 = vpack.c.bf16 %v1988_v17, %v1986_v16  ;;  %v5208_v58 = vpack.c.bf16 %v1993_v54, %v1991_v53  ;;  %v2117_v54 = vld [vmem:[#allocation8 + $0x18] sm:$0xff] }
 0x32b   : > { %1810 = vmatprep.mubr.f32.mxu1 %v7000_v24 }
 0x32c   : > { %1811 = vmatmul.mubr.f32.vlgmr.msra.gmra.mrb[4].mxu1 %v7003_v57 }
 0x32d   : > { %5179 = vmatpush1.bf16.msra.mxu1 %v5178_v46  ;;  %v1998_v46 = vld [vmem:[#allocation7 + $0x740] sm:$0xff] }
 0x32e   : > { %5181 = vmatprep.subr.bf16.mxu1 %v5180_v19  ;;  %v2000_v19 = vld [vmem:[#allocation7 + $0x750] sm:$0xff] }
 0x32f   : > { %v5218_v36 = vpack.c.bf16 %v2000_v19, %v1998_v46  ;;  %v2130_v19 = vld [vmem:[#allocation8 + $0x80] sm:$0xff] }
 0x331   : > { %5183 = vmatpush1.bf16.msra.mxu1 %v5182_v40  ;;  %v2002_v40 = vld [vmem:[#allocation7 + $0x760] sm:$0xff] }
 0x332   : > { %5185 = vmatprep.subr.bf16.mxu1 %v5184_v59  ;;  %v2004_v59 = vld [vmem:[#allocation7 + $0x770] sm:$0xff] }
 0x333   : > { %v5222_v51 = vpack.c.bf16 %v2004_v59, %v2002_v40  ;;  %v2147_v40 = vld [vmem:[#allocation8 + $0x108] sm:$0xff] }
 0x334   : > { %v2155_v59 = vld [vmem:[#allocation8 + $0x148] sm:$0xff] }
 0x335   : > { %5187 = vmatpush1.bf16.msra.mxu1 %v5186_v5  ;;  %v2006_v5 = vld [vmem:[#allocation7 + $0x780] sm:$0xff]  ;;  %v5248_v42 = vpack.c.bf16 %v2155_v59, %v2147_v40  ;;  %v2212_v40 = vld [vmem:[#allocation8 + $0x310] sm:$0xff] }
 0x336   : > { %5189 = vmatprep.subr.bf16.mxu1 %v5188_v9  ;;  %v2008_v9 = vld [vmem:[#allocation7 + $0x790] sm:$0xff] }
 0x337   : > { %v5226_v12 = vpack.c.bf16 %v2008_v9, %v2006_v5  ;;  %v2146_v5 = vld [vmem:[#allocation8 + $0x100] sm:$0xff] }
 0x339   : > { %5191 = vmatpush1.bf16.msra.mxu1 %v5190_v14  ;;  %v2010_v14 = vld [vmem:[#allocation7 + $0x7a0] sm:$0xff] }
 0x33a   : > { %5193 = vmatprep.subr.bf16.mxu1 %v5192_v18  ;;  %v2012_v18 = vld [vmem:[#allocation7 + $0x7b0] sm:$0xff] }
 0x33b   : > { %v5230_v26 = vpack.c.bf16 %v2012_v18, %v2010_v14  ;;  %v2163_v14 = vld [vmem:[#allocation8 + $0x188] sm:$0xff] }
 0x33c   : > { %v2171_v18 = vld [vmem:[#allocation8 + $0x1c8] sm:$0xff] }
 0x33d   : > { %5195 = vmatpush1.bf16.msra.mxu1 %v5194_v31  ;;  %v2014_v31 = vld [vmem:[#allocation7 + $0x7c0] sm:$0xff] }
 0x33e   : > { %5197 = vmatprep.subr.bf16.mxu1 %v5196_v33  ;;  %v2016_v33 = vld [vmem:[#allocation7 + $0x7d0] sm:$0xff] }
 0x33f   : > { %v5234_v34 = vpack.c.bf16 %v2016_v33, %v2014_v31  ;;  %v2162_v31 = vld [vmem:[#allocation8 + $0x180] sm:$0xff] }
 0x340   : > { %v2170_v33 = vld [vmem:[#allocation8 + $0x1c0] sm:$0xff] }
 0x341   : > { %5199 = vmatpush1.bf16.msra.mxu1 %v5198_v63 }
 0x342   : > { %5201 = vmatprep.subr.bf16.mxu1 %v5200_v2  ;;  %v2019_v2 = vld [vmem:[#allocation7 + $0x7e8] sm:$0xff] }
 0x343   : > { %v5236_v38 = vpack.c.bf16 %v2021_v29, %v2019_v2  ;;  %v2181_v2 = vld [vmem:[#allocation8 + $0x218] sm:$0xff] }
 0x344   : > { %v2189_v29 = vld [vmem:[#allocation8 + $0x258] sm:$0xff] }
 0x345   : > { %5203 = vmatpush1.bf16.msra.mxu1 %v5202_v48  ;;  %v5238_v48 = vpack.c.bf16 %v2020_v45, %v2018_v39 }
 0x346   : > { %5205 = vmatprep.subr.bf16.mxu1 %v5204_v56 }
 0x349   : > { %5207 = vmatpush1.bf16.msra.mxu1 %v5206_v23 }
 0x34a   : > { %5209 = vmatprep.subr.bf16.mxu1 %v5208_v58  ;;  %v2125_v58 = vld [vmem:[#allocation8 + $0x58] sm:$0xff] }
 0x34b   : > { %v5304_v61 = vpack.c.bf16 %v2125_v58, %v2117_v54  ;;  %v2195_v54 = vld [vmem:[#allocation8 + $0x288] sm:$0xff]  ;;  %v2197_v58 = vld [vmem:[#allocation8 + $0x298] sm:$0xff] }
 0x34d   : > { %5211 = vmatpush1.bf16.msra.mxu1 %v5210_v6  ;;  %v2116_v6 = vld [vmem:[#allocation8 + $0x10] sm:$0xff] }
 0x34e   : > { %5213 = vmatprep.subr.bf16.mxu1 %v5212_v15  ;;  %v2124_v15 = vld [vmem:[#allocation8 + $0x50] sm:$0xff] }
 0x34f   : > { %v5306_v28 = vpack.c.bf16 %v2124_v15, %v2116_v6  ;;  %v2194_v6 = vld [vmem:[#allocation8 + $0x280] sm:$0xff] }
 0x350   : > { %v2202_v15 = vld [vmem:[#allocation8 + $0x2c0] sm:$0xff] }
 0x351   : > { %5215 = vmatpush1.bf16.msra.mxu1 %v5214_v43  ;;  %v2141_v43 = vld [vmem:[#allocation8 + $0xd8] sm:$0xff] }
 0x352   : > { %5217 = vmatprep.subr.bf16.mxu1 %v5216_v8  ;;  %v5244_v8 = vpack.c.bf16 %v2139_v37, %v2131_v22  ;;  %v5308_v46 = vpack.c.bf16 %v2141_v43, %v2133_v7  ;;  %v2196_v22 = vld [vmem:[#allocation8 + $0x290] sm:$0xff]  ;;  %v2211_v7 = vld [vmem:[#allocation8 + $0x308] sm:$0xff] }
 0x353   : > { %v2204_v37 = vld [vmem:[#allocation8 + $0x2d0] sm:$0xff]  ;;  %v2219_v43 = vld [vmem:[#allocation8 + $0x348] sm:$0xff] }
 0x355   : > { %5219 = vmatpush1.bf16.msra.mxu1 %v5218_v36  ;;  %v5246_v36 = vpack.c.bf16 %v2138_v27, %v2130_v19  ;;  %v5262_v19 = vpack.c.bf16 %v2202_v15, %v2194_v6  ;;  %v5326_v27 = vpack.c.bf16 %v2204_v37, %v2196_v22  ;;  %v2285_v6 = vld [vmem:[#allocation8 + $0x558] sm:$0xff]  ;;  %v2274_v37 = vld [vmem:[#allocation8 + $0x500] sm:$0xff] }
 0x356   : > { %5221 = vmatprep.subr.bf16.mxu1 %v5220_v55  ;;  %v2140_v55 = vld [vmem:[#allocation8 + $0xd0] sm:$0xff] }
 0x357   : > { %v5310_v41 = vpack.c.bf16 %v2140_v55, %v2132_v35  ;;  %v5264_v35 = vpack.c.bf16 %v2219_v43, %v2211_v7  ;;  %v2218_v55 = vld [vmem:[#allocation8 + $0x340] sm:$0xff]  ;;  %v2276_v43 = vld [vmem:[#allocation8 + $0x510] sm:$0xff] }
 0x358   : > { %v2282_v7 = vld [vmem:[#allocation8 + $0x540] sm:$0xff] }
 0x359   : > { %5223 = vmatpush1.bf16.msra.mxu1 %v5222_v51  ;;  %v2149_v51 = vld [vmem:[#allocation8 + $0x118] sm:$0xff] }
 0x35a   : > { %5225 = vmatprep.subr.bf16.mxu1 %v5224_v3  ;;  %v2157_v3 = vld [vmem:[#allocation8 + $0x158] sm:$0xff] }
 0x35b   : > { %v5312_v9 = vpack.c.bf16 %v2157_v3, %v2149_v51  ;;  %v2235_v51 = vld [vmem:[#allocation8 + $0x3c8] sm:$0xff]  ;;  %v2229_v3 = vld [vmem:[#allocation8 + $0x398] sm:$0xff] }
 0x35d   : > { %5227 = vmatpush1.bf16.msra.mxu1 %v5226_v12  ;;  %v2156_v12 = vld [vmem:[#allocation8 + $0x150] sm:$0xff] }
 0x35e   : > { %5229 = vmatprep.subr.bf16.mxu1 %v5228_v13  ;;  %v5250_v13 = vpack.c.bf16 %v2154_v10, %v2146_v5  ;;  %v5314_v21 = vpack.c.bf16 %v2156_v12, %v2148_v11  ;;  %v2237_v5 = vld [vmem:[#allocation8 + $0x3d8] sm:$0xff]  ;;  %v2226_v12 = vld [vmem:[#allocation8 + $0x380] sm:$0xff] }
 0x361   : > { %5231 = vmatpush1.bf16.msra.mxu1 %v5230_v26  ;;  %v5252_v26 = vpack.c.bf16 %v2171_v18, %v2163_v14  ;;  %v2228_v14 = vld [vmem:[#allocation8 + $0x390] sm:$0xff]  ;;  %v5332_v18 = vpack.c.bf16 %v2237_v5, %v2229_v3 }
 0x362   : > { %5233 = vmatprep.subr.bf16.mxu1 %v5232_v30  ;;  %v2173_v30 = vld [vmem:[#allocation8 + $0x1d8] sm:$0xff]  ;;  %v2300_v5 = vld [vmem:[#allocation8 + $0x5d0] sm:$0xff] }
 0x365   : > { %5235 = vmatpush1.bf16.msra.mxu1 %v5234_v34  ;;  %v5316_v34 = vpack.c.bf16 %v2173_v30, %v2165_v20  ;;  %v2236_v20 = vld [vmem:[#allocation8 + $0x3d0] sm:$0xff]  ;;  %v2245_v30 = vld [vmem:[#allocation8 + $0x418] sm:$0xff] }
 0x366   : > { %5237 = vmatprep.subr.bf16.mxu1 %v5236_v38  ;;  %v5254_v38 = vpack.c.bf16 %v2170_v33, %v2162_v31  ;;  %v2253_v31 = vld [vmem:[#allocation8 + $0x458] sm:$0xff] }
 0x369   : > { %5239 = vmatpush1.bf16.msra.mxu1 %v5238_v48  ;;  %v2178_v48 = vld [vmem:[#allocation8 + $0x200] sm:$0xff] }
 0x36a   : > { %5305 = vmatprep.subr.bf16.mxu1 %v5304_v61 }
 0x3ff   : > { %v1812_v49 = vpop.f32.mrb[4].mxu1 }
 0x400   : > { %v1814_v52 = vpop.f32.mrb[5].mxu1  ;;  %v1817_v63 = vmax.f32 %v7003_v57, %v1812_v49  ;;  %v2123_v57 = vld [vmem:[#allocation8 + $0x48] sm:$0xff]  ;;  %v2164_v49 = vld [vmem:[#allocation8 + $0x190] sm:$0xff] }
 0x401   : > { %v1818_v62 = vmax.f32 %v7000_v24, %v1814_v52  ;;  %v2115_v24 = vld [vmem:[#allocation8 + $0x8] sm:$0xff]  ;;  %v2172_v52 = vld [vmem:[#allocation8 + $0x1d0] sm:$0xff] }
 0x402   : > { %v5240_v23 = vpack.c.bf16 %v2123_v57, %v2115_v24  ;;  %v5318_v39 = vpack.c.bf16 %v2172_v52, %v2164_v49  ;;  %v5320_v24 = vpack.c.bf16 %v2189_v29, %v2181_v2  ;;  %v2188_v57 = vld [vmem:[#allocation8 + $0x250] sm:$0xff]  ;;  %v2242_v52 = vld [vmem:[#allocation8 + $0x400] sm:$0xff]  ;;  %v5336_v2 = vpack.c.bf16 %v2253_v31, %v2245_v30 }
 0x403   : > { %1948 = vmatprep.mubr.f32.mxu0 %v1818_v62  ;;  %v2252_v29 = vld [vmem:[#allocation8 + $0x450] sm:$0xff] }
 0x404   : > { %1949 = vmatmul.mubr.f32.vlgmr.msra.gmra.mrb[2].mxu0 %v1817_v63  ;;  %5241 = vmatprep.subr.bf16.mxu0 %v5240_v23  ;;  %v2203_v23 = vld [vmem:[#allocation8 + $0x2c8] sm:$0xff]  ;;  %v6187_v30 = vld [vmem:[%s7403_s2] sm:$0xf] }
 0x405   : > { %5243 = vmatpush1.bf16.msra.mxu0 %v5242_v4  ;;  %v5260_v4 = vpack.c.bf16 %v2203_v23, %v2195_v54  ;;  %v2266_v54 = vld [vmem:[#allocation8 + $0x4c0] sm:$0xff]  ;;  %v2260_v23 = vld [vmem:[#allocation8 + $0x490] sm:$0xff] }
 0x406   : > { %5245 = vmatprep.subr.bf16.mxu0 %v5244_v8  ;;  %v2213_v8 = vld [vmem:[#allocation8 + $0x318] sm:$0xff] }
 0x409   : > { %5247 = vmatpush1.bf16.msra.mxu0 %v5246_v36  ;;  %v2210_v36 = vld [vmem:[#allocation8 + $0x300] sm:$0xff] }
 0x40a   : > { %5249 = vmatprep.subr.bf16.mxu0 %v5248_v42  ;;  %v2227_v42 = vld [vmem:[#allocation8 + $0x388] sm:$0xff] }
 0x40b   : > { %v5268_v11 = vpack.c.bf16 %v2235_v51, %v2227_v42  ;;  %v2298_v42 = vld [vmem:[#allocation8 + $0x5c0] sm:$0xff]  ;;  %v2292_v51 = vld [vmem:[#allocation8 + $0x590] sm:$0xff] }
 0x40d   : > { %5251 = vmatpush1.bf16.msra.mxu0 %v5250_v13  ;;  %v2234_v13 = vld [vmem:[#allocation8 + $0x3c0] sm:$0xff] }
 0x40e   : > { %5253 = vmatprep.subr.bf16.mxu0 %v5252_v26  ;;  %v2251_v26 = vld [vmem:[#allocation8 + $0x448] sm:$0xff]  ;;  %v5270_v33 = vpack.c.bf16 %v2234_v13, %v2226_v12  ;;  %v2317_v12 = vld [vmem:[#allocation8 + $0x658] sm:$0xff] }
 0x411   : > { %5255 = vmatpush1.bf16.msra.mxu0 %v5254_v38  ;;  %v2259_v38 = vld [vmem:[#allocation8 + $0x488] sm:$0xff] }
 0x4d7   : > { %v1950_v56 = vpop.f32.mrb[2].mxu0 }
 0x4d8   : > { %v1952_v16 = vpop.f32.mrb[3].mxu0  ;;  %v7011_v53 = vmax.f32 %v1817_v63, %v1950_v56  ;;  %v2187_v63 = vld [vmem:[#allocation8 + $0x248] sm:$0xff]  ;;  %v2186_v56 = vld [vmem:[#allocation8 + $0x240] sm:$0xff] }
 0x4d9   : > { %v7009_v17 = vmax.f32 %v1818_v62, %v1952_v16  ;;  %v2179_v62 = vld [vmem:[#allocation8 + $0x208] sm:$0xff]  ;;  %v2180_v16 = vld [vmem:[#allocation8 + $0x210] sm:$0xff]  ;;  %v5258_v60 = vpack.c.bf16 %v2186_v56, %v2178_v48  ;;  %v2269_v48 = vld [vmem:[#allocation8 + $0x4d8] sm:$0xff] }
 0x4da   : > { %v5256_v45 = vpack.c.bf16 %v2187_v63, %v2179_v62  ;;  %v5322_v61 = vpack.c.bf16 %v2188_v57, %v2180_v16  ;;  %v2250_v62 = vld [vmem:[#allocation8 + $0x440] sm:$0xff]  ;;  %v2244_v63 = vld [vmem:[#allocation8 + $0x410] sm:$0xff] }
 0x4db   : > { %2086 = vmatprep.mubr.f32.mxu1 %v7009_v17  ;;  %v5274_v56 = vpack.c.bf16 %v2250_v62, %v2242_v52  ;;  %v5338_v16 = vpack.c.bf16 %v2252_v29, %v2244_v63  ;;  %v2258_v57 = vld [vmem:[#allocation8 + $0x480] sm:$0xff] }
 0x4dc   : > { %2087 = vmatmul.mubr.f32.vlgmr.msra.gmra.mrb[6].mxu1 %v7011_v53  ;;  %5257 = vmatprep.subr.bf16.mxu0 %v5256_v45  ;;  %v2261_v45 = vld [vmem:[#allocation8 + $0x498] sm:$0xff]  ;;  %v5278_v15 = vpack.c.bf16 %v2266_v54, %v2258_v57  ;;  %v2322_v54 = vld [vmem:[#allocation8 + $0x680] sm:$0xff] }
 0x4dd   : > { %5307 = vmatpush1.bf16.msra.mxu1 %v5306_v28  ;;  %v5324_v28 = vpack.c.bf16 %v2205_v1, %v2197_v58  ;;  %5259 = vmatpush1.bf16.msra.mxu0 %v5258_v60  ;;  %v5340_v58 = vpack.c.bf16 %v2269_v48, %v2261_v45  ;;  %v2268_v1 = vld [vmem:[#allocation8 + $0x4d0] sm:$0xff]  ;;  %v2275_v60 = vld [vmem:[#allocation8 + $0x508] sm:$0xff]  ;;  %v2333_v57 = vld [vmem:[#allocation8 + $0x6d8] sm:$0xff] }
 0x4de   : > { %5309 = vmatprep.subr.bf16.mxu1 %v5308_v46  ;;  %v2221_v46 = vld [vmem:[#allocation8 + $0x358] sm:$0xff]  ;;  %5261 = vmatprep.subr.bf16.mxu0 %v5260_v4  ;;  %v5342_v22 = vpack.c.bf16 %v2268_v1, %v2260_v23  ;;  %v2316_v48 = vld [vmem:[#allocation8 + $0x650] sm:$0xff]  ;;  %v2330_v23 = vld [vmem:[#allocation8 + $0x6c0] sm:$0xff] }
 0x4df   : > { %v5328_v59 = vpack.c.bf16 %v2221_v46, %v2213_v8  ;;  %v2277_v4 = vld [vmem:[#allocation8 + $0x518] sm:$0xff]  ;;  %v2284_v46 = vld [vmem:[#allocation8 + $0x550] sm:$0xff]  ;;  %v5294_v1 = vpack.c.bf16 %v2330_v23, %v2322_v54 }
 0x4e0   : > { %v5344_v8 = vpack.c.bf16 %v2285_v6, %v2277_v4  ;;  %v2339_v6 = vld [vmem:[#allocation8 + $0x708] sm:$0xff] }
 0x4e1   : > { %5311 = vmatpush1.bf16.msra.mxu1 %v5310_v41  ;;  %v2220_v41 = vld [vmem:[#allocation8 + $0x350] sm:$0xff]  ;;  %5263 = vmatpush1.bf16.msra.mxu0 %v5262_v19  ;;  %v2291_v19 = vld [vmem:[#allocation8 + $0x588] sm:$0xff] }
 0x4e2   : > { %5313 = vmatprep.subr.bf16.mxu1 %v5312_v9  ;;  %v5266_v9 = vpack.c.bf16 %v2218_v55, %v2210_v36  ;;  %5265 = vmatprep.subr.bf16.mxu0 %v5264_v35  ;;  %v5330_v10 = vpack.c.bf16 %v2220_v41, %v2212_v40  ;;  %v2293_v35 = vld [vmem:[#allocation8 + $0x598] sm:$0xff]  ;;  %v5282_v55 = vpack.c.bf16 %v2282_v7, %v2274_v37  ;;  %v2290_v41 = vld [vmem:[#allocation8 + $0x580] sm:$0xff] }
 0x4e3   : > { %v2301_v36 = vld [vmem:[#allocation8 + $0x5d8] sm:$0xff]  ;;  %v5346_v40 = vpack.c.bf16 %v2284_v46, %v2276_v43  ;;  %v5286_v13 = vpack.c.bf16 %v2298_v42, %v2290_v41  ;;  %v2338_v7 = vld [vmem:[#allocation8 + $0x700] sm:$0xff] }
 0x4e4   : > { %v5348_v3 = vpack.c.bf16 %v2301_v36, %v2293_v35  ;;  %v2349_v37 = vld [vmem:[#allocation8 + $0x758] sm:$0xff]  ;;  %v2346_v43 = vld [vmem:[#allocation8 + $0x740] sm:$0xff]  ;;  %v2355_v35 = vld [vmem:[#allocation8 + $0x788] sm:$0xff] }
 0x4e5   : > { %5315 = vmatpush1.bf16.msra.mxu1 %v5314_v21  ;;  %v2243_v21 = vld [vmem:[#allocation8 + $0x408] sm:$0xff]  ;;  %5267 = vmatpush1.bf16.msra.mxu0 %v5266_v9  ;;  %v5298_v46 = vpack.c.bf16 %v2346_v43, %v2338_v7  ;;  %v2160_v7 = vld [vmem:[#allocation8 + $0x170] sm:$0xff] }
 0x4e6   : > { %5317 = vmatprep.subr.bf16.mxu1 %v5316_v34  ;;  %5269 = vmatprep.subr.bf16.mxu0 %v5268_v11  ;;  %v5334_v34 = vpack.c.bf16 %v2236_v20, %v2228_v14  ;;  %v5272_v49 = vpack.c.bf16 %v2251_v26, %v2243_v21  ;;  %v2307_v9 = vld [vmem:[#allocation8 + $0x608] sm:$0xff]  ;;  %v2309_v11 = vld [vmem:[#allocation8 + $0x618] sm:$0xff]  ;;  %v5350_v14 = vpack.c.bf16 %v2300_v5, %v2292_v51  ;;  %v436_v21 = vsub.s32 0, %v6982_v32  ;;  %v2354_v51 = vld [vmem:[#allocation8 + $0x780] sm:$0xff] }
 0x4e7   : > { %v5352_v20 = vpack.c.bf16 %v2317_v12, %v2309_v11  ;;  %v440_v26 = vsub.s32 1, %v6982_v32  ;;  %v2356_v5 = vld [vmem:[#allocation8 + $0x790] sm:$0xff]  ;;  %v2119_v12 = vld [vmem:[#allocation8 + $0x28] sm:$0xff] }
 0x4e8   : > { %v437_v31 = vrot.slane %v6187_v30, %v436_v21  ;;  %v2167_v43 = vld [vmem:[#allocation8 + $0x1a8] sm:$0xff] }
 0x4e9   : > { %5319 = vmatpush1.bf16.msra.mxu1 %v5318_v39  ;;  %v2267_v39 = vld [vmem:[#allocation8 + $0x4c8] sm:$0xff]  ;;  %5271 = vmatpush1.bf16.msra.mxu0 %v5270_v33  ;;  %v441_v33 = vrot.slane %v6187_v30, %v440_v26 }
 0x4ea   : > { %5321 = vmatprep.subr.bf16.mxu1 %v5320_v24  ;;  %5273 = vmatprep.subr.bf16.mxu0 %v5272_v49  ;;  %v5276_v24 = vpack.c.bf16 %v2267_v39, %v2259_v38  ;;  %v6024_v49 = vadd.f32 %v6989_v25, %v437_v31  ;;  %v2306_v25 = vld [vmem:[#allocation8 + $0x600] sm:$0xff] }
 0x4eb   : > { %v6025_v63 = vadd.f32 %v6991_v44, %v441_v33  ;;  %v2314_v39 = vld [vmem:[#allocation8 + $0x640] sm:$0xff]  ;;  %v2323_v44 = vld [vmem:[#allocation8 + $0x688] sm:$0xff] }
 0x4ec   : > { %v5290_v45 = vpack.c.bf16 %v2314_v39, %v2306_v25  ;;  %v2135_v25 = vld [vmem:[#allocation8 + $0xa8] sm:$0xff] }
 0x4ed   : > { %5323 = vmatpush1.bf16.msra.mxu1 %v5322_v61  ;;  %v2283_v61 = vld [vmem:[#allocation8 + $0x548] sm:$0xff]  ;;  %5275 = vmatpush1.bf16.msra.mxu0 %v5274_v56 }
 0x4ee   : > { %5325 = vmatprep.subr.bf16.mxu1 %v5324_v28  ;;  %5277 = vmatprep.subr.bf16.mxu0 %v5276_v24  ;;  %v5280_v28 = vpack.c.bf16 %v2283_v61, %v2275_v60  ;;  %v2324_v60 = vld [vmem:[#allocation8 + $0x690] sm:$0xff]  ;;  %v2143_v39 = vld [vmem:[#allocation8 + $0xe8] sm:$0xff] }
 0x4ef   : > { %v2332_v61 = vld [vmem:[#allocation8 + $0x6d0] sm:$0xff]  ;;  %v5372_v54 = vpack.c.bf16 %v2143_v39, %v2135_v25 }
 0x4f0   : > { %v5358_v4 = vpack.c.bf16 %v2332_v61, %v2324_v60  ;;  %v2161_v60 = vld [vmem:[#allocation8 + $0x178] sm:$0xff] }
 0x4f1   : > { %5327 = vmatpush1.bf16.msra.mxu1 %v5326_v27  ;;  %v2299_v27 = vld [vmem:[#allocation8 + $0x5c8] sm:$0xff]  ;;  %5279 = vmatpush1.bf16.msra.mxu0 %v5278_v15 }
 0x4f2   : > { %5329 = vmatprep.subr.bf16.mxu1 %v5328_v59  ;;  %5281 = vmatprep.subr.bf16.mxu0 %v5280_v28  ;;  %v5284_v59 = vpack.c.bf16 %v2299_v27, %v2291_v19  ;;  %v2347_v15 = vld [vmem:[#allocation8 + $0x748] sm:$0xff]  ;;  %v2340_v19 = vld [vmem:[#allocation8 + $0x710] sm:$0xff] }
 0x4f3   : > { %v5296_v28 = vpack.c.bf16 %v2347_v15, %v2339_v6  ;;  %v2348_v27 = vld [vmem:[#allocation8 + $0x750] sm:$0xff]  ;;  %v2150_v6 = vld [vmem:[#allocation8 + $0x120] sm:$0xff] }
 0x4f4   : > { %v5362_v36 = vpack.c.bf16 %v2348_v27, %v2340_v19  ;;  %v2158_v15 = vld [vmem:[#allocation8 + $0x160] sm:$0xff]  ;;  %v2177_v19 = vld [vmem:[#allocation8 + $0x1f8] sm:$0xff] }
 0x4f5   : > { %5331 = vmatpush1.bf16.msra.mxu1 %v5330_v10  ;;  %v2315_v10 = vld [vmem:[#allocation8 + $0x648] sm:$0xff]  ;;  %5283 = vmatpush1.bf16.msra.mxu0 %v5282_v55  ;;  %v5378_v27 = vpack.c.bf16 %v2158_v15, %v2150_v6  ;;  %v2241_v6 = vld [vmem:[#allocation8 + $0x3f8] sm:$0xff] }
 0x4f6   : > { %5333 = vmatprep.subr.bf16.mxu1 %v5332_v18  ;;  %5285 = vmatprep.subr.bf16.mxu0 %v5284_v59  ;;  %v5288_v18 = vpack.c.bf16 %v2315_v10, %v2307_v9  ;;  %v2363_v55 = vld [vmem:[#allocation8 + $0x7c8] sm:$0xff]  ;;  %v2365_v59 = vld [vmem:[#allocation8 + $0x7d8] sm:$0xff]  ;;  %v2364_v10 = vld [vmem:[#allocation8 + $0x7d0] sm:$0xff] }
 0x4f7   : > { %v5300_v41 = vpack.c.bf16 %v2363_v55, %v2355_v35  ;;  %v5366_v11 = vpack.c.bf16 %v2364_v10, %v2356_v5  ;;  %v2174_v55 = vld [vmem:[#allocation8 + $0x1e0] sm:$0xff]  ;;  %v2185_v5 = vld [vmem:[#allocation8 + $0x238] sm:$0xff] }
 0x4f9   : > { %5335 = vmatpush1.bf16.msra.mxu1 %v5334_v34  ;;  %5287 = vmatpush1.bf16.msra.mxu0 %v5286_v13  ;;  %v2127_v13 = vld [vmem:[#allocation8 + $0x68] sm:$0xff] }
 0x4fa   : > { %5337 = vmatprep.subr.bf16.mxu1 %v5336_v2  ;;  %5289 = vmatprep.subr.bf16.mxu0 %v5288_v18  ;;  %v5368_v18 = vpack.c.bf16 %v2127_v13, %v2119_v12  ;;  %v2182_v12 = vld [vmem:[#allocation8 + $0x220] sm:$0xff] }
 0x4fb   : > { %v2190_v13 = vld [vmem:[#allocation8 + $0x260] sm:$0xff] }
 0x4fd   : > { %5339 = vmatpush1.bf16.msra.mxu1 %v5338_v16  ;;  %5291 = vmatpush1.bf16.msra.mxu0 %v5290_v45  ;;  %v2325_v16 = vld [vmem:[#allocation8 + $0x698] sm:$0xff] }
 0x4fe   : > { %5341 = vmatprep.subr.bf16.mxu1 %v5340_v58  ;;  %v5356_v58 = vpack.c.bf16 %v2333_v57, %v2325_v16  ;;  %v2145_v45 = vld [vmem:[#allocation8 + $0xf8] sm:$0xff]  ;;  %v2151_v57 = vld [vmem:[#allocation8 + $0x128] sm:$0xff] }
 0x501   : > { %5343 = vmatpush1.bf16.msra.mxu1 %v5342_v22  ;;  %v2341_v22 = vld [vmem:[#allocation8 + $0x718] sm:$0xff] }
 0x502   : > { %5345 = vmatprep.subr.bf16.mxu1 %v5344_v8  ;;  %v5360_v8 = vpack.c.bf16 %v2349_v37, %v2341_v22  ;;  %v2152_v37 = vld [vmem:[#allocation8 + $0x130] sm:$0xff] }
 0x503   : > { %v5442_v35 = vpack.c.bf16 %v2160_v7, %v2152_v37  ;;  %v2238_v37 = vld [vmem:[#allocation8 + $0x3e0] sm:$0xff] }
 0x505   : > { %5347 = vmatpush1.bf16.msra.mxu1 %v5346_v40  ;;  %v2357_v40 = vld [vmem:[#allocation8 + $0x798] sm:$0xff] }
 0x506   : > { %5349 = vmatprep.subr.bf16.mxu1 %v5348_v3  ;;  %v5364_v42 = vpack.c.bf16 %v2365_v59, %v2357_v40  ;;  %v2362_v3 = vld [vmem:[#allocation8 + $0x7c0] sm:$0xff] }
 0x507   : > { %v5302_v9 = vpack.c.bf16 %v2362_v3, %v2354_v51  ;;  %v2183_v51 = vld [vmem:[#allocation8 + $0x228] sm:$0xff] }
 0x508   : > { %v2191_v3 = vld [vmem:[#allocation8 + $0x268] sm:$0xff] }
 0x509   : > { %5351 = vmatpush1.bf16.msra.mxu1 %v5350_v14  ;;  %v2121_v14 = vld [vmem:[#allocation8 + $0x38] sm:$0xff] }
 0x50a   : > { %5353 = vmatprep.subr.bf16.mxu1 %v5352_v20  ;;  %v2129_v20 = vld [vmem:[#allocation8 + $0x78] sm:$0xff] }
 0x50b   : > { %v5432_v21 = vpack.c.bf16 %v2129_v20, %v2121_v14  ;;  %v5384_v14 = vpack.c.bf16 %v2191_v3, %v2183_v51  ;;  %v2184_v20 = vld [vmem:[#allocation8 + $0x230] sm:$0xff] }
 0x50c   : > { %v2248_v3 = vld [vmem:[#allocation8 + $0x430] sm:$0xff] }
 0x5af   : > { %v2088_v34 = vpop.f32.mrb[6].mxu1 }
 0x5b0   : > { %v7022_v52 = vmax.f32 %v7011_v53, %v2088_v34  ;;  %v2090_v62 = vpop.f32.mrb[7].mxu1  ;;  %v2308_v53 = vld [vmem:[#allocation8 + $0x610] sm:$0xff] }
 0x5b1   : > { %v7026_v2 = vmax.f32 %v7009_v17, %v2090_v62  ;;  %v5354_v56 = vpack.c.bf16 %v2316_v48, %v2308_v53  ;;  %v2331_v17 = vld [vmem:[#allocation8 + $0x6c8] sm:$0xff]  ;;  %v2126_v62 = vld [vmem:[#allocation8 + $0x60] sm:$0xff]  ;;  %v2137_v53 = vld [vmem:[#allocation8 + $0xb8] sm:$0xff] }
 0x5b2   : > { %v7029_v32 = vadd.f32 %v6024_v49, %v7022_v52  ;;  %v5292_v24 = vpack.c.bf16 %v2331_v17, %v2323_v44  ;;  %v2118_v49 = vld [vmem:[#allocation8 + $0x20] sm:$0xff]  ;;  %v5436_v23 = vpack.c.bf16 %v2145_v45, %v2137_v53  ;;  %v2200_v53 = vld [vmem:[#allocation8 + $0x2b0] sm:$0xff] }
 0x5b3   : > { %v7032_v29 = vadd.f32 %v6025_v63, %v7026_v2  ;;  %5355 = vmatpush1.bf16.msra.mxu1 %v5354_v56  ;;  %v2120_v63 = vld [vmem:[#allocation8 + $0x30] sm:$0xff]  ;;  %v5370_v56 = vpack.c.bf16 %v2126_v62, %v2118_v49  ;;  %v2142_v17 = vld [vmem:[#allocation8 + $0xe0] sm:$0xff]  ;;  %v5386_v49 = vpack.c.bf16 %v2190_v13, %v2182_v12  ;;  %v2273_v12 = vld [vmem:[#allocation8 + $0x4f8] sm:$0xff] }
 0x5b4   : > { %5293 = vmatprep.subr.bf16.mxu0 %v5292_v24  ;;  %5357 = vmatprep.subr.bf16.mxu1 %v5356_v58  ;;  %v2144_v24 = vld [vmem:[#allocation8 + $0xf0] sm:$0xff]  ;;  %v2159_v58 = vld [vmem:[#allocation8 + $0x168] sm:$0xff] }
 0x5b5   : > { %v2097_v38 = vmax.f32 %v7029_v32, %v7032_v29  ;;  %5295 = vmatpush1.bf16.msra.mxu0 %v5294_v1  ;;  %v2153_v1 = vld [vmem:[#allocation8 + $0x138] sm:$0xff]  ;;  %v5376_v22 = vpack.c.bf16 %v2159_v58, %v2151_v57  ;;  %v2208_v45 = vld [vmem:[#allocation8 + $0x2f0] sm:$0xff]  ;;  %v2222_v57 = vld [vmem:[#allocation8 + $0x360] sm:$0xff] }
 0x5b6   : > { %5297 = vmatprep.subr.bf16.mxu0 %v5296_v28  ;;  %v5440_v28 = vpack.c.bf16 %v2161_v60, %v2153_v1  ;;  %v2216_v58 = vld [vmem:[#allocation8 + $0x330] sm:$0xff]  ;;  %v2231_v60 = vld [vmem:[#allocation8 + $0x3a8] sm:$0xff] }
 0x5b7   : > { %2098 = vmax.xlane.f32.xlu0 %v2097_v38  ;;  %5359 = vmatpush1.bf16.msra.mxu1 %v5358_v4  ;;  %v2128_v38 = vld [vmem:[#allocation8 + $0x70] sm:$0xff] }
 0x5b8   : > { %5361 = vmatprep.subr.bf16.mxu1 %v5360_v8  ;;  %v5434_v44 = vpack.c.bf16 %v2128_v38, %v2120_v63  ;;  %v2175_v8 = vld [vmem:[#allocation8 + $0x1e8] sm:$0xff]  ;;  %v2198_v63 = vld [vmem:[#allocation8 + $0x2a0] sm:$0xff]  ;;  %v2224_v1 = vld [vmem:[#allocation8 + $0x370] sm:$0xff] }
 0x5b9   : > { %5299 = vmatpush1.bf16.msra.mxu0 %v5298_v46  ;;  %v2169_v46 = vld [vmem:[#allocation8 + $0x1b8] sm:$0xff]  ;;  %v5380_v40 = vpack.c.bf16 %v2175_v8, %v2167_v43  ;;  %v2206_v38 = vld [vmem:[#allocation8 + $0x2e0] sm:$0xff]  ;;  %v2232_v8 = vld [vmem:[#allocation8 + $0x3b0] sm:$0xff] }
 0x5ba   : > { %5301 = vmatprep.subr.bf16.mxu0 %v5300_v41  ;;  %v5444_v59 = vpack.c.bf16 %v2177_v19, %v2169_v46  ;;  %v2168_v41 = vld [vmem:[#allocation8 + $0x1b0] sm:$0xff]  ;;  %v2247_v19 = vld [vmem:[#allocation8 + $0x428] sm:$0xff] }
 0x5bb   : > { %5363 = vmatpush1.bf16.msra.mxu1 %v5362_v36  ;;  %v2166_v36 = vld [vmem:[#allocation8 + $0x1a0] sm:$0xff]  ;;  %v2240_v46 = vld [vmem:[#allocation8 + $0x3f0] sm:$0xff] }
 0x5bc   : > { %5365 = vmatprep.subr.bf16.mxu1 %v5364_v42  ;;  %v2176_v42 = vld [vmem:[#allocation8 + $0x1f0] sm:$0xff]  ;;  %v5382_v10 = vpack.c.bf16 %v2174_v55, %v2166_v36  ;;  %v2257_v36 = vld [vmem:[#allocation8 + $0x478] sm:$0xff] }
 0x5bd   : > { %5303 = vmatpush1.bf16.msra.mxu0 %v5302_v9  ;;  %v2193_v9 = vld [vmem:[#allocation8 + $0x278] sm:$0xff] }
 0x5be   : > { %5369 = vmatprep.subr.bf16.mxu0 %v5368_v18  ;;  %v5448_v18 = vpack.c.bf16 %v2193_v9, %v2185_v5  ;;  %v2256_v5 = vld [vmem:[#allocation8 + $0x470] sm:$0xff]  ;;  %v2263_v9 = vld [vmem:[#allocation8 + $0x4a8] sm:$0xff] }
 0x5bf   : > { %5367 = vmatpush1.bf16.msra.mxu1 %v5366_v11  ;;  %v5446_v11 = vpack.c.bf16 %v2176_v42, %v2168_v41  ;;  %v2254_v41 = vld [vmem:[#allocation8 + $0x460] sm:$0xff] }
 0x5c0   : > { %5433 = vmatprep.subr.bf16.mxu1 %v5432_v21  ;;  %v2192_v21 = vld [vmem:[#allocation8 + $0x270] sm:$0xff] }
 0x5c1   : > { %v5450_v62 = vpack.c.bf16 %v2192_v21, %v2184_v20  ;;  %v2270_v20 = vld [vmem:[#allocation8 + $0x4e0] sm:$0xff] }
 0x644   : > { %v7036_v26 = vpop.xlane.xlu0 %2098 }
 0x645   : > { %v2100_v30 = vsub.f32 %v7029_v32, %v7036_v26  ;;  %v2101_v31 = vsub.f32 %v7032_v29, %v7036_v26  ;;  %v2134_v32 = vld [vmem:[#allocation8 + $0xa0] sm:$0xff]  ;;  %v2136_v29 = vld [vmem:[#allocation8 + $0xb0] sm:$0xff] }
 0x646   : > { %v5374_v61 = vpack.c.bf16 %v2142_v17, %v2134_v32  ;;  %v5438_v4 = vpack.c.bf16 %v2144_v24, %v2136_v29  ;;  %v2217_v32 = vld [vmem:[#allocation8 + $0x338] sm:$0xff]  ;;  %v5454_v29 = vpack.c.bf16 %v2208_v45, %v2200_v53  ;;  %v2214_v24 = vld [vmem:[#allocation8 + $0x320] sm:$0xff] }
 0x647   : > { %v2102_v33 = vmul.f32 1.442695, %v2100_v30  ;;  %v2104_v34 = vmul.f32 1.442695, %v2101_v31  ;;  %v2199_v30 = vld [vmem:[#allocation8 + $0x2a8] sm:$0xff]  ;;  %v2225_v17 = vld [vmem:[#allocation8 + $0x378] sm:$0xff]  ;;  %v5394_v15 = vpack.c.bf16 %v2222_v57, %v2214_v24 }
 0x648   : > { %v2207_v31 = vld [vmem:[#allocation8 + $0x2e8] sm:$0xff]  ;;  %v2286_v53 = vld [vmem:[#allocation8 + $0x560] sm:$0xff]  ;;  %v2305_v24 = vld [vmem:[#allocation8 + $0x5f8] sm:$0xff] }
 0x649   : > { %6177 = vpow2.f32 %v2102_v33  ;;  %v2201_v33 = vld [vmem:[#allocation8 + $0x2b8] sm:$0xff]  ;;  %v5388_v25 = vpack.c.bf16 %v2207_v31, %v2199_v30  ;;  %v2264_v31 = vld [vmem:[#allocation8 + $0x4b0] sm:$0xff] }
 0x64a   : > { %6179 = vpow2.f32 %v2104_v34  ;;  %v2209_v34 = vld [vmem:[#allocation8 + $0x2f8] sm:$0xff] }
 0x64b   : > { %v5452_v39 = vpack.c.bf16 %v2209_v34, %v2201_v33  ;;  %v2272_v33 = vld [vmem:[#allocation8 + $0x4f0] sm:$0xff]  ;;  %v2279_v34 = vld [vmem:[#allocation8 + $0x528] sm:$0xff] }
 0x653   : > { %v7042_v48 = vpop.eup %6177 }
 0x654   : > { %v6180_v16 = vpop.eup %6179 }
 0x655   : > { %2434 = vmatprep.mubr.f32.mxu0 %v6180_v16  ;;  %2505 = vmatprep.mubr.f32.mxu1 %v6180_v16 }
 0x656   : > { %2435 = vmatmul.mubr.f32.vlgmr.msra.gmra.mrb[4].mxu0 %v7042_v48  ;;  %2506 = vmatmul.mubr.f32.vlgmr.msra.gmra.mrb[8].mxu1 %v7042_v48 }
 0x657   : > { %5371 = vmatpush1.bf16.msra.mxu0 %v5370_v56  ;;  %5435 = vmatpush1.bf16.msra.mxu1 %v5434_v44  ;;  %v2215_v56 = vld [vmem:[#allocation8 + $0x328] sm:$0xff] }
 0x658   : > { %2576 = vmatprep.mubr.f32.mxu0 %v6180_v16  ;;  %2647 = vmatprep.mubr.f32.mxu1 %v6180_v16  ;;  %v2223_v44 = vld [vmem:[#allocation8 + $0x368] sm:$0xff]  ;;  %v5390_v16 = vpack.c.bf16 %v2206_v38, %v2198_v63  ;;  %v2289_v63 = vld [vmem:[#allocation8 + $0x578] sm:$0xff] }
 0x659   : > { %5373 = vmatprep.subr.bf16.mxu0 %v5372_v54  ;;  %5437 = vmatprep.subr.bf16.mxu1 %v5436_v23  ;;  %v5392_v54 = vpack.c.bf16 %v2223_v44, %v2215_v56  ;;  %v5456_v23 = vpack.c.bf16 %v2225_v17, %v2217_v32  ;;  %v2280_v44 = vld [vmem:[#allocation8 + $0x530] sm:$0xff]  ;;  %v2295_v17 = vld [vmem:[#allocation8 + $0x5a8] sm:$0xff] }
 0x65a   : > { %v2288_v32 = vld [vmem:[#allocation8 + $0x570] sm:$0xff] }
 0x65b   : > { %5375 = vmatpush1.bf16.msra.mxu0 %v5374_v61  ;;  %5439 = vmatpush1.bf16.msra.mxu1 %v5438_v4  ;;  %v2239_v61 = vld [vmem:[#allocation8 + $0x3e8] sm:$0xff]  ;;  %v2233_v4 = vld [vmem:[#allocation8 + $0x3b8] sm:$0xff] }
 0x65c   : > { %5377 = vmatprep.subr.bf16.mxu0 %v5376_v22  ;;  %5441 = vmatprep.subr.bf16.mxu1 %v5440_v28  ;;  %v5458_v22 = vpack.c.bf16 %v2224_v1, %v2216_v58  ;;  %v2230_v28 = vld [vmem:[#allocation8 + $0x3a0] sm:$0xff]  ;;  %v5396_v7 = vpack.c.bf16 %v2239_v61, %v2231_v60  ;;  %v5460_v43 = vpack.c.bf16 %v2241_v6, %v2233_v4  ;;  %v2296_v61 = vld [vmem:[#allocation8 + $0x5b0] sm:$0xff]  ;;  %v2311_v6 = vld [vmem:[#allocation8 + $0x628] sm:$0xff] }
 0x65d   : > { %v5398_v55 = vpack.c.bf16 %v2238_v37, %v2230_v28  ;;  %v2302_v58 = vld [vmem:[#allocation8 + $0x5e0] sm:$0xff]  ;;  %v2304_v4 = vld [vmem:[#allocation8 + $0x5f0] sm:$0xff]  ;;  %v2321_v28 = vld [vmem:[#allocation8 + $0x678] sm:$0xff] }
 0x65f   : > { %5379 = vmatpush1.bf16.msra.mxu0 %v5378_v27  ;;  %5443 = vmatpush1.bf16.msra.mxu1 %v5442_v35  ;;  %v2255_v27 = vld [vmem:[#allocation8 + $0x468] sm:$0xff]  ;;  %v2249_v35 = vld [vmem:[#allocation8 + $0x438] sm:$0xff] }
 0x660   : > { %5381 = vmatprep.subr.bf16.mxu0 %v5380_v40  ;;  %5445 = vmatprep.subr.bf16.mxu1 %v5444_v59  ;;  %v5462_v40 = vpack.c.bf16 %v2240_v46, %v2232_v8  ;;  %v2246_v59 = vld [vmem:[#allocation8 + $0x420] sm:$0xff]  ;;  %v5400_v42 = vpack.c.bf16 %v2255_v27, %v2247_v19  ;;  %v5464_v51 = vpack.c.bf16 %v2257_v36, %v2249_v35  ;;  %v2312_v35 = vld [vmem:[#allocation8 + $0x630] sm:$0xff] }
 0x661   : > { %v5402_v13 = vpack.c.bf16 %v2254_v41, %v2246_v59  ;;  %v2318_v8 = vld [vmem:[#allocation8 + $0x660] sm:$0xff]  ;;  %v2107_v46 = vsub.f32 %v6993_v47, %v7026_v2  ;;  %v2320_v36 = vld [vmem:[#allocation8 + $0x670] sm:$0xff]  ;;  %v2329_v59 = vld [vmem:[#allocation8 + $0x6b8] sm:$0xff] }
 0x662   : > { %v2337_v41 = vld [vmem:[#allocation8 + $0x6f8] sm:$0xff] }
 0x663   : > { %5383 = vmatpush1.bf16.msra.mxu0 %v5382_v10  ;;  %5447 = vmatpush1.bf16.msra.mxu1 %v5446_v11  ;;  %v2271_v10 = vld [vmem:[#allocation8 + $0x4e8] sm:$0xff]  ;;  %v2265_v11 = vld [vmem:[#allocation8 + $0x4b8] sm:$0xff]  ;;  %v5484_v2 = vpack.c.bf16 %v2337_v41, %v2329_v59  ;;  %v2680_v59 = vld [vmem:[#allocation10 + $0xd0] sm:$0xff] }
 0x664   : > { %5385 = vmatprep.subr.bf16.mxu0 %v5384_v14  ;;  %5449 = vmatprep.subr.bf16.mxu1 %v5448_v18  ;;  %v5466_v14 = vpack.c.bf16 %v2256_v5, %v2248_v3  ;;  %v2262_v18 = vld [vmem:[#allocation8 + $0x4a0] sm:$0xff]  ;;  %v5404_v21 = vpack.c.bf16 %v2271_v10, %v2263_v9  ;;  %v5468_v30 = vpack.c.bf16 %v2273_v12, %v2265_v11  ;;  %v2109_v9 = vmin.f32 %v2107_v46, 60.0  ;;  %v2328_v10 = vld [vmem:[#allocation8 + $0x6b0] sm:$0xff]  ;;  %v2343_v12 = vld [vmem:[#allocation8 + $0x728] sm:$0xff] }
 0x665   : > { %v5406_v38 = vpack.c.bf16 %v2270_v20, %v2262_v18  ;;  %v2326_v3 = vld [vmem:[#allocation8 + $0x6a0] sm:$0xff]  ;;  %v2336_v11 = vld [vmem:[#allocation8 + $0x6f0] sm:$0xff]  ;;  %v2353_v18 = vld [vmem:[#allocation8 + $0x778] sm:$0xff] }
 0x666   : > { %v2334_v5 = vld [vmem:[#allocation8 + $0x6e0] sm:$0xff]  ;;  %v2687_v41 = vld [vmem:[#allocation10 + $0x108] sm:$0xff] }
 0x667   : > { %5387 = vmatpush1.bf16.msra.mxu0 %v5386_v49  ;;  %5451 = vmatpush1.bf16.msra.mxu1 %v5450_v62  ;;  %v2287_v49 = vld [vmem:[#allocation8 + $0x568] sm:$0xff]  ;;  %v2281_v62 = vld [vmem:[#allocation8 + $0x538] sm:$0xff]  ;;  %v5422_v20 = vpack.c.bf16 %v2334_v5, %v2326_v3 }
 0x668   : > { %5389 = vmatprep.subr.bf16.mxu0 %v5388_v25  ;;  %5453 = vmatprep.subr.bf16.mxu1 %v5452_v39  ;;  %v5470_v25 = vpack.c.bf16 %v2272_v33, %v2264_v31  ;;  %v2278_v39 = vld [vmem:[#allocation8 + $0x520] sm:$0xff]  ;;  %v5408_v45 = vpack.c.bf16 %v2287_v49, %v2279_v34  ;;  %v5472_v56 = vpack.c.bf16 %v2289_v63, %v2281_v62  ;;  %v2112_v33 = vmul.f32 1.442695, %v2109_v9  ;;  %v2344_v62 = vld [vmem:[#allocation8 + $0x730] sm:$0xff]  ;;  %v2689_v3 = vld [vmem:[#allocation10 + $0x118] sm:$0xff] }
 0x669   : > { %v5410_v57 = vpack.c.bf16 %v2286_v53, %v2278_v39  ;;  %v2350_v31 = vld [vmem:[#allocation8 + $0x760] sm:$0xff]  ;;  %v2352_v63 = vld [vmem:[#allocation8 + $0x770] sm:$0xff]  ;;  %v2361_v39 = vld [vmem:[#allocation8 + $0x7b8] sm:$0xff] }
 0x66a   : > { %v2369_v53 = vld [vmem:[#allocation8 + $0x7f8] sm:$0xff]  ;;  %6181 = vpow2.f32 %v2112_v33 }
 0x66b   : > { %5391 = vmatpush1.bf16.msra.mxu0 %v5390_v16  ;;  %5455 = vmatpush1.bf16.msra.mxu1 %v5454_v29  ;;  %v2303_v16 = vld [vmem:[#allocation8 + $0x5e8] sm:$0xff]  ;;  %v2297_v29 = vld [vmem:[#allocation8 + $0x5b8] sm:$0xff] }
 0x66c   : > { %5393 = vmatprep.subr.bf16.mxu0 %v5392_v54  ;;  %5457 = vmatprep.subr.bf16.mxu1 %v5456_v23  ;;  %v5474_v54 = vpack.c.bf16 %v2288_v32, %v2280_v44  ;;  %v2294_v23 = vld [vmem:[#allocation8 + $0x5a0] sm:$0xff]  ;;  %v5412_v1 = vpack.c.bf16 %v2303_v16, %v2295_v17  ;;  %v5476_v60 = vpack.c.bf16 %v2305_v24, %v2297_v29  ;;  %v2360_v29 = vld [vmem:[#allocation8 + $0x7b0] sm:$0xff]  ;;  %v2697_v5 = vld [vmem:[#allocation10 + $0x158] sm:$0xff] }
 0x66d   : > { %v5414_v37 = vpack.c.bf16 %v2302_v58, %v2294_v23  ;;  %v2358_v44 = vld [vmem:[#allocation8 + $0x7a0] sm:$0xff]  ;;  %v5492_v16 = vpack.c.bf16 %v2369_v53, %v2361_v39  ;;  %v2368_v24 = vld [vmem:[#allocation8 + $0x7f0] sm:$0xff]  ;;  %v2657_v23 = vld [vmem:[#allocation10 + $0x18] sm:$0xff] }
 0x66e   : > { %v2366_v32 = vld [vmem:[#allocation8 + $0x7e0] sm:$0xff]  ;;  %v2665_v58 = vld [vmem:[#allocation10 + $0x58] sm:$0xff]  ;;  %v2727_v39 = vld [vmem:[#allocation10 + $0x248] sm:$0xff] }
 0x66f   : > { %5395 = vmatpush1.bf16.msra.mxu0 %v5394_v15  ;;  %5459 = vmatpush1.bf16.msra.mxu1 %v5458_v22  ;;  %v2319_v15 = vld [vmem:[#allocation8 + $0x668] sm:$0xff]  ;;  %v2313_v22 = vld [vmem:[#allocation8 + $0x638] sm:$0xff] }
 0x670   : > { %5397 = vmatprep.subr.bf16.mxu0 %v5396_v7  ;;  %5461 = vmatprep.subr.bf16.mxu1 %v5460_v43  ;;  %v5478_v7 = vpack.c.bf16 %v2304_v4, %v2296_v61  ;;  %v2310_v43 = vld [vmem:[#allocation8 + $0x620] sm:$0xff]  ;;  %v5416_v19 = vpack.c.bf16 %v2319_v15, %v2311_v6  ;;  %v5480_v27 = vpack.c.bf16 %v2321_v28, %v2313_v22  ;;  %v2656_v22 = vld [vmem:[#allocation10 + $0x10] sm:$0xff]  ;;  %v2721_v53 = vld [vmem:[#allocation10 + $0x218] sm:$0xff] }
 0x671   : > { %v5560_v4 = vpack.c.bf16 %v2665_v58, %v2657_v23  ;;  %v2654_v6 = vld [vmem:[#allocation10] sm:$0xff]  ;;  %v2664_v28 = vld [vmem:[#allocation10 + $0x50] sm:$0xff]  ;;  %v2743_v23 = vld [vmem:[#allocation10 + $0x2c8] sm:$0xff] }
 0x672   : > { %v2662_v15 = vld [vmem:[#allocation10 + $0x40] sm:$0xff]  ;;  %v2737_v58 = vld [vmem:[#allocation10 + $0x298] sm:$0xff] }
 0x673   : > { %5399 = vmatpush1.bf16.msra.mxu0 %v5398_v55  ;;  %5463 = vmatpush1.bf16.msra.mxu1 %v5462_v40  ;;  %v2327_v55 = vld [vmem:[#allocation8 + $0x6a8] sm:$0xff]  ;;  %v5498_v46 = vpack.c.bf16 %v2662_v15, %v2654_v6  ;;  %v2734_v6 = vld [vmem:[#allocation10 + $0x280] sm:$0xff] }
 0x674   : > { %5401 = vmatprep.subr.bf16.mxu0 %v5400_v42  ;;  %5465 = vmatprep.subr.bf16.mxu1 %v5464_v51  ;;  %v2335_v40 = vld [vmem:[#allocation8 + $0x6e8] sm:$0xff]  ;;  %v5418_v42 = vpack.c.bf16 %v2318_v8, %v2310_v43  ;;  %v5482_v51 = vpack.c.bf16 %v2320_v36, %v2312_v35  ;;  %v2673_v43 = vld [vmem:[#allocation10 + $0x98] sm:$0xff]  ;;  %v2678_v35 = vld [vmem:[#allocation10 + $0xc0] sm:$0xff] }
 0x675   : > { %v5420_v47 = vpack.c.bf16 %v2335_v40, %v2327_v55  ;;  %v2681_v8 = vld [vmem:[#allocation10 + $0xd8] sm:$0xff]  ;;  %v2672_v36 = vld [vmem:[#allocation10 + $0x90] sm:$0xff]  ;;  %v2742_v15 = vld [vmem:[#allocation10 + $0x2c0] sm:$0xff] }
 0x676   : > { %v5564_v40 = vpack.c.bf16 %v2681_v8, %v2673_v43  ;;  %v2759_v43 = vld [vmem:[#allocation10 + $0x348] sm:$0xff]  ;;  %v2753_v8 = vld [vmem:[#allocation10 + $0x318] sm:$0xff] }
 0x677   : > { %5403 = vmatpush1.bf16.msra.mxu0 %v5402_v13  ;;  %5467 = vmatpush1.bf16.msra.mxu1 %v5466_v14  ;;  %v2351_v13 = vld [vmem:[#allocation8 + $0x768] sm:$0xff]  ;;  %v2345_v14 = vld [vmem:[#allocation8 + $0x738] sm:$0xff] }
 0x678   : > { %5405 = vmatprep.subr.bf16.mxu0 %v5404_v21  ;;  %5469 = vmatprep.subr.bf16.mxu1 %v5468_v30  ;;  %v5486_v21 = vpack.c.bf16 %v2336_v11, %v2328_v10  ;;  %v2342_v30 = vld [vmem:[#allocation8 + $0x720] sm:$0xff]  ;;  %v5424_v34 = vpack.c.bf16 %v2351_v13, %v2343_v12  ;;  %v5488_v49 = vpack.c.bf16 %v2353_v18, %v2345_v14  ;;  %v2688_v12 = vld [vmem:[#allocation10 + $0x110] sm:$0xff]  ;;  %v2703_v18 = vld [vmem:[#allocation10 + $0x188] sm:$0xff] }
 0x679   : > { %v2686_v10 = vld [vmem:[#allocation10 + $0x100] sm:$0xff]  ;;  %v5568_v13 = vpack.c.bf16 %v2697_v5, %v2689_v3  ;;  %v2696_v14 = vld [vmem:[#allocation10 + $0x150] sm:$0xff]  ;;  %v2775_v3 = vld [vmem:[#allocation10 + $0x3c8] sm:$0xff] }
 0x67a   : > { %v2694_v11 = vld [vmem:[#allocation10 + $0x140] sm:$0xff]  ;;  %v2769_v5 = vld [vmem:[#allocation10 + $0x398] sm:$0xff] }
 0x67b   : > { %5407 = vmatpush1.bf16.msra.mxu0 %v5406_v38  ;;  %5471 = vmatpush1.bf16.msra.mxu1 %v5470_v25  ;;  %v2359_v38 = vld [vmem:[#allocation8 + $0x7a8] sm:$0xff] }
 0x67c   : > { %5409 = vmatprep.subr.bf16.mxu0 %v5408_v45  ;;  %5473 = vmatprep.subr.bf16.mxu1 %v5472_v56  ;;  %v2367_v25 = vld [vmem:[#allocation8 + $0x7e8] sm:$0xff]  ;;  %v5426_v45 = vpack.c.bf16 %v2350_v31, %v2342_v30  ;;  %v5490_v56 = vpack.c.bf16 %v2352_v63, %v2344_v62  ;;  %v5506_v30 = vpack.c.bf16 %v2694_v11, %v2686_v10  ;;  %v2704_v62 = vld [vmem:[#allocation10 + $0x190] sm:$0xff]  ;;  %v2766_v11 = vld [vmem:[#allocation10 + $0x380] sm:$0xff] }
 0x67d   : > { %v5428_v17 = vpack.c.bf16 %v2367_v25, %v2359_v38  ;;  %v5570_v31 = vpack.c.bf16 %v2696_v14, %v2688_v12  ;;  %v2712_v38 = vld [vmem:[#allocation10 + $0x1d0] sm:$0xff]  ;;  %v2719_v25 = vld [vmem:[#allocation10 + $0x208] sm:$0xff]  ;;  %v2774_v12 = vld [vmem:[#allocation10 + $0x3c0] sm:$0xff] }
 0x67f   : > { %5411 = vmatpush1.bf16.msra.mxu0 %v5410_v57  ;;  %5475 = vmatpush1.bf16.msra.mxu1 %v5474_v54  ;;  %v2655_v57 = vld [vmem:[#allocation10 + $0x8] sm:$0xff] }
 0x680   : > { %5413 = vmatprep.subr.bf16.mxu0 %v5412_v1  ;;  %5477 = vmatprep.subr.bf16.mxu1 %v5476_v60  ;;  %v2663_v54 = vld [vmem:[#allocation10 + $0x48] sm:$0xff]  ;;  %v5430_v1 = vpack.c.bf16 %v2366_v32, %v2358_v44  ;;  %v5494_v60 = vpack.c.bf16 %v2368_v24, %v2360_v29  ;;  %v5574_v44 = vpack.c.bf16 %v2712_v38, %v2704_v62  ;;  %v2720_v29 = vld [vmem:[#allocation10 + $0x210] sm:$0xff]  ;;  %v2790_v62 = vld [vmem:[#allocation10 + $0x440] sm:$0xff] }
 0x681   : > { %v5496_v61 = vpack.c.bf16 %v2663_v54, %v2655_v57  ;;  %v5512_v32 = vpack.c.bf16 %v2727_v39, %v2719_v25  ;;  %v2728_v57 = vld [vmem:[#allocation10 + $0x250] sm:$0xff]  ;;  %v2735_v54 = vld [vmem:[#allocation10 + $0x288] sm:$0xff] }
 0x682   : > { %v2792_v25 = vld [vmem:[#allocation10 + $0x450] sm:$0xff]  ;;  %v2799_v39 = vld [vmem:[#allocation10 + $0x488] sm:$0xff] }
 0x683   : > { %5415 = vmatpush1.bf16.msra.mxu0 %v5414_v37  ;;  %5479 = vmatpush1.bf16.msra.mxu1 %v5478_v7  ;;  %v2671_v37 = vld [vmem:[#allocation10 + $0x88] sm:$0xff] }
 0x684   : > { %5417 = vmatprep.subr.bf16.mxu0 %v5416_v19  ;;  %5481 = vmatprep.subr.bf16.mxu1 %v5480_v27  ;;  %v2679_v7 = vld [vmem:[#allocation10 + $0xc8] sm:$0xff]  ;;  %v5562_v19 = vpack.c.bf16 %v2664_v28, %v2656_v22  ;;  %v2670_v27 = vld [vmem:[#allocation10 + $0x80] sm:$0xff]  ;;  %v2736_v22 = vld [vmem:[#allocation10 + $0x290] sm:$0xff] }
 0x685   : > { %v5500_v55 = vpack.c.bf16 %v2679_v7, %v2671_v37  ;;  %v5502_v9 = vpack.c.bf16 %v2678_v35, %v2670_v27  ;;  %v2744_v37 = vld [vmem:[#allocation10 + $0x2d0] sm:$0xff]  ;;  %v2751_v7 = vld [vmem:[#allocation10 + $0x308] sm:$0xff] }
 0x686   : > { %v5582_v27 = vpack.c.bf16 %v2744_v37, %v2736_v22  ;;  %v5520_v35 = vpack.c.bf16 %v2759_v43, %v2751_v7  ;;  %v2822_v22 = vld [vmem:[#allocation10 + $0x540] sm:$0xff]  ;;  %v2824_v7 = vld [vmem:[#allocation10 + $0x550] sm:$0xff]  ;;  %v2831_v43 = vld [vmem:[#allocation10 + $0x588] sm:$0xff] }
 0x687   : > { %5419 = vmatpush1.bf16.msra.mxu0 %v5418_v42  ;;  %5483 = vmatpush1.bf16.msra.mxu1 %v5482_v51  ;;  %v2695_v42 = vld [vmem:[#allocation10 + $0x148] sm:$0xff]  ;;  %v7048_v51 = vpop.eup %6181 }
 0x688   : > { %5421 = vmatprep.subr.bf16.mxu0 %v5420_v47  ;;  %5485 = vmatprep.subr.bf16.mxu1 %v5484_v2  ;;  %v5566_v47 = vpack.c.bf16 %v2680_v59, %v2672_v36  ;;  %v5504_v2 = vpack.c.bf16 %v2695_v42, %v2687_v41  ;;  %v2750_v36 = vld [vmem:[#allocation10 + $0x300] sm:$0xff]  ;;  %v2760_v41 = vld [vmem:[#allocation10 + $0x350] sm:$0xff]  ;;  %v2767_v42 = vld [vmem:[#allocation10 + $0x388] sm:$0xff] }
 0x689   : > { %v5524_v10 = vpack.c.bf16 %v2775_v3, %v2767_v42  ;;  %v2840_v42 = vld [vmem:[#allocation10 + $0x5d0] sm:$0xff]  ;;  %v2847_v3 = vld [vmem:[#allocation10 + $0x608] sm:$0xff] }
 0x68b   : > { %5423 = vmatpush1.bf16.msra.mxu0 %v5422_v20  ;;  %5487 = vmatpush1.bf16.msra.mxu1 %v5486_v21  ;;  %v2705_v20 = vld [vmem:[#allocation10 + $0x198] sm:$0xff] }
 0x68c   : > { %5425 = vmatprep.subr.bf16.mxu0 %v5424_v34  ;;  %5489 = vmatprep.subr.bf16.mxu1 %v5488_v49  ;;  %v2713_v21 = vld [vmem:[#allocation10 + $0x1d8] sm:$0xff]  ;;  %v2702_v34 = vld [vmem:[#allocation10 + $0x180] sm:$0xff] }
 0x68d   : > { %v2710_v49 = vld [vmem:[#allocation10 + $0x1c0] sm:$0xff]  ;;  %v5572_v63 = vpack.c.bf16 %v2713_v21, %v2705_v20  ;;  %v2791_v20 = vld [vmem:[#allocation10 + $0x448] sm:$0xff]  ;;  %v2785_v21 = vld [vmem:[#allocation10 + $0x418] sm:$0xff] }
 0x68f   : > { %5427 = vmatpush1.bf16.msra.mxu0 %v5426_v45  ;;  %5491 = vmatpush1.bf16.msra.mxu1 %v5490_v56  ;;  %v2729_v45 = vld [vmem:[#allocation10 + $0x258] sm:$0xff]  ;;  %v5510_v56 = vpack.c.bf16 %v2710_v49, %v2702_v34  ;;  %v2782_v49 = vld [vmem:[#allocation10 + $0x400] sm:$0xff] }
 0x690   : > { %5429 = vmatprep.subr.bf16.mxu0 %v5428_v17  ;;  %5493 = vmatprep.subr.bf16.mxu1 %v5492_v16  ;;  %v2718_v17 = vld [vmem:[#allocation10 + $0x200] sm:$0xff]  ;;  %v5576_v24 = vpack.c.bf16 %v2729_v45, %v2721_v53  ;;  %v2807_v53 = vld [vmem:[#allocation10 + $0x4c8] sm:$0xff]  ;;  %v2801_v45 = vld [vmem:[#allocation10 + $0x498] sm:$0xff] }
 0x691   : > { %v2726_v16 = vld [vmem:[#allocation10 + $0x240] sm:$0xff] }
 0x693   : > { %5431 = vmatpush1.bf16.msra.mxu0 %v5430_v1  ;;  %5495 = vmatpush1.bf16.msra.mxu1 %v5494_v60  ;;  %v2745_v1 = vld [vmem:[#allocation10 + $0x2d8] sm:$0xff]  ;;  %v5514_v60 = vpack.c.bf16 %v2726_v16, %v2718_v17  ;;  %v5532_v17 = vpack.c.bf16 %v2807_v53, %v2799_v39  ;;  %v2798_v16 = vld [vmem:[#allocation10 + $0x480] sm:$0xff]  ;;  %v2872_v39 = vld [vmem:[#allocation10 + $0x6d0] sm:$0xff] }
 0x694   : > { %5497 = vmatprep.subr.bf16.mxu0 %v5496_v61  ;;  %5561 = vmatprep.subr.bf16.mxu1 %v5560_v4  ;;  %v5578_v61 = vpack.c.bf16 %v2728_v57, %v2720_v29  ;;  %v5516_v4 = vpack.c.bf16 %v2743_v23, %v2735_v54  ;;  %v5580_v28 = vpack.c.bf16 %v2745_v1, %v2737_v58  ;;  %v2806_v29 = vld [vmem:[#allocation10 + $0x4c0] sm:$0xff]  ;;  %v2808_v54 = vld [vmem:[#allocation10 + $0x4d0] sm:$0xff]  ;;  %v2815_v23 = vld [vmem:[#allocation10 + $0x508] sm:$0xff] }
 0x695   : > { %v2823_v58 = vld [vmem:[#allocation10 + $0x548] sm:$0xff]  ;;  %v2817_v1 = vld [vmem:[#allocation10 + $0x518] sm:$0xff] }
 0x696   : > { %2577 = vmatmul.mubr.f32.vlgmr.msra.gmra.mrb[6].mxu0 %v7042_v48  ;;  %2648 = vmatmul.mubr.f32.vlgmr.msra.gmra.mrb[10].mxu1 %v7042_v48  ;;  %v2711_v48 = vld [vmem:[#allocation10 + $0x1c8] sm:$0xff] }
 0x697   : > { %5499 = vmatpush1.bf16.msra.mxu0 %v5498_v46  ;;  %2974 = vmatprep.mubr.f32.mxu0 %v7048_v51  ;;  %v5508_v33 = vpack.c.bf16 %v2711_v48, %v2703_v18  ;;  %v2761_v46 = vld [vmem:[#allocation10 + $0x358] sm:$0xff]  ;;  %v2776_v18 = vld [vmem:[#allocation10 + $0x3d0] sm:$0xff]  ;;  %v2783_v48 = vld [vmem:[#allocation10 + $0x408] sm:$0xff] }
 0x698   : > { %5563 = vmatpush1.bf16.msra.mxu1 %v5562_v19  ;;  %3045 = vmatprep.mubr.f32.mxu1 %v7048_v51  ;;  %v5518_v19 = vpack.c.bf16 %v2742_v15, %v2734_v6  ;;  %v5584_v59 = vpack.c.bf16 %v2761_v46, %v2753_v8  ;;  %v5528_v34 = vpack.c.bf16 %v2791_v20, %v2783_v48  ;;  %v2814_v15 = vld [vmem:[#allocation10 + $0x500] sm:$0xff]  ;;  %v2839_v8 = vld [vmem:[#allocation10 + $0x5c8] sm:$0xff]  ;;  %v2833_v46 = vld [vmem:[#allocation10 + $0x598] sm:$0xff] }
 0x699   : > { %5501 = vmatprep.subr.bf16.mxu0 %v5500_v55  ;;  %5565 = vmatprep.subr.bf16.mxu1 %v5564_v40  ;;  %v2758_v55 = vld [vmem:[#allocation10 + $0x340] sm:$0xff]  ;;  %v2752_v40 = vld [vmem:[#allocation10 + $0x310] sm:$0xff]  ;;  %v5536_v6 = vpack.c.bf16 %v2823_v58, %v2815_v23  ;;  %v2879_v53 = vld [vmem:[#allocation10 + $0x708] sm:$0xff] }
 0x69a   : > { %v2856_v20 = vld [vmem:[#allocation10 + $0x650] sm:$0xff] }
 0x69b   : > { %5503 = vmatpush1.bf16.msra.mxu0 %v5502_v9  ;;  %v2777_v9 = vld [vmem:[#allocation10 + $0x3d8] sm:$0xff]  ;;  %v2888_v58 = vld [vmem:[#allocation10 + $0x750] sm:$0xff] }
 0x69c   : > { %5567 = vmatpush1.bf16.msra.mxu1 %v5566_v47  ;;  %5505 = vmatprep.subr.bf16.mxu0 %v5504_v2  ;;  %v5522_v47 = vpack.c.bf16 %v2758_v55, %v2750_v36  ;;  %v5586_v2 = vpack.c.bf16 %v2760_v41, %v2752_v40  ;;  %v5588_v14 = vpack.c.bf16 %v2777_v9, %v2769_v5  ;;  %v2830_v55 = vld [vmem:[#allocation10 + $0x580] sm:$0xff]  ;;  %v2855_v5 = vld [vmem:[#allocation10 + $0x648] sm:$0xff]  ;;  %v2849_v9 = vld [vmem:[#allocation10 + $0x618] sm:$0xff] }
 0x69d   : > { %5569 = vmatprep.subr.bf16.mxu1 %v5568_v13  ;;  %v2768_v13 = vld [vmem:[#allocation10 + $0x390] sm:$0xff]  ;;  %v5540_v36 = vpack.c.bf16 %v2839_v8, %v2831_v43  ;;  %v2838_v40 = vld [vmem:[#allocation10 + $0x5c0] sm:$0xff] }
 0x69e   : > { %v2904_v8 = vld [vmem:[#allocation10 + $0x7d0] sm:$0xff] }
 0x69f   : > { %5507 = vmatpush1.bf16.msra.mxu0 %v5506_v30  ;;  %v2793_v30 = vld [vmem:[#allocation10 + $0x458] sm:$0xff] }
 0x6a0   : > { %5571 = vmatpush1.bf16.msra.mxu1 %v5570_v31  ;;  %5509 = vmatprep.subr.bf16.mxu0 %v5508_v33  ;;  %v5526_v31 = vpack.c.bf16 %v2774_v12, %v2766_v11  ;;  %v5590_v33 = vpack.c.bf16 %v2776_v18, %v2768_v13  ;;  %v5592_v38 = vpack.c.bf16 %v2793_v30, %v2785_v21  ;;  %v2846_v13 = vld [vmem:[#allocation10 + $0x600] sm:$0xff]  ;;  %v2848_v18 = vld [vmem:[#allocation10 + $0x610] sm:$0xff]  ;;  %v2863_v21 = vld [vmem:[#allocation10 + $0x688] sm:$0xff] }
 0x6a1   : > { %5573 = vmatprep.subr.bf16.mxu1 %v5572_v63  ;;  %v2784_v63 = vld [vmem:[#allocation10 + $0x410] sm:$0xff]  ;;  %v5544_v12 = vpack.c.bf16 %v2855_v5, %v2847_v3  ;;  %v2871_v30 = vld [vmem:[#allocation10 + $0x6c8] sm:$0xff] }
 0x6a2   : > { %v2660_v3 = vld [vmem:[#allocation10 + $0x30] sm:$0xff] }
 0x6a3   : > { %5511 = vmatpush1.bf16.msra.mxu0 %v5510_v56  ;;  %v2809_v56 = vld [vmem:[#allocation10 + $0x4d8] sm:$0xff]  ;;  %v2668_v5 = vld [vmem:[#allocation10 + $0x70] sm:$0xff] }
 0x6a4   : > { %5575 = vmatpush1.bf16.msra.mxu1 %v5574_v44  ;;  %5513 = vmatprep.subr.bf16.mxu0 %v5512_v32  ;;  %v5530_v44 = vpack.c.bf16 %v2790_v62, %v2782_v49  ;;  %v5594_v32 = vpack.c.bf16 %v2792_v25, %v2784_v63  ;;  %v5596_v57 = vpack.c.bf16 %v2809_v56, %v2801_v45  ;;  %v2862_v62 = vld [vmem:[#allocation10 + $0x680] sm:$0xff]  ;;  %v2887_v45 = vld [vmem:[#allocation10 + $0x748] sm:$0xff]  ;;  %v2881_v56 = vld [vmem:[#allocation10 + $0x718] sm:$0xff] }
 0x6a5   : > { %5577 = vmatprep.subr.bf16.mxu1 %v5576_v24  ;;  %v2800_v24 = vld [vmem:[#allocation10 + $0x490] sm:$0xff]  ;;  %v2870_v63 = vld [vmem:[#allocation10 + $0x6c0] sm:$0xff] }
 0x6a7   : > { %5515 = vmatpush1.bf16.msra.mxu0 %v5514_v60  ;;  %v2825_v60 = vld [vmem:[#allocation10 + $0x558] sm:$0xff] }
 0x6a8   : > { %5579 = vmatpush1.bf16.msra.mxu1 %v5578_v61  ;;  %5517 = vmatprep.subr.bf16.mxu0 %v5516_v4  ;;  %v5534_v61 = vpack.c.bf16 %v2806_v29, %v2798_v16  ;;  %v5598_v4 = vpack.c.bf16 %v2808_v54, %v2800_v24  ;;  %v5600_v37 = vpack.c.bf16 %v2825_v60, %v2817_v1  ;;  %v2878_v24 = vld [vmem:[#allocation10 + $0x700] sm:$0xff]  ;;  %v2880_v54 = vld [vmem:[#allocation10 + $0x710] sm:$0xff]  ;;  %v2895_v1 = vld [vmem:[#allocation10 + $0x788] sm:$0xff] }
 0x6a9   : > { %5581 = vmatprep.subr.bf16.mxu1 %v5580_v28  ;;  %v2816_v28 = vld [vmem:[#allocation10 + $0x510] sm:$0xff]  ;;  %v5552_v29 = vpack.c.bf16 %v2887_v45, %v2879_v53  ;;  %v2903_v60 = vld [vmem:[#allocation10 + $0x7c8] sm:$0xff] }
 0x6aa   : > { %v2700_v53 = vld [vmem:[#allocation10 + $0x170] sm:$0xff]  ;;  %v2707_v45 = vld [vmem:[#allocation10 + $0x1a8] sm:$0xff] }
 0x6ab   : > { %5519 = vmatpush1.bf16.msra.mxu0 %v5518_v19  ;;  %v2841_v19 = vld [vmem:[#allocation10 + $0x5d8] sm:$0xff] }
 0x6ac   : > { %5583 = vmatpush1.bf16.msra.mxu1 %v5582_v27  ;;  %5521 = vmatprep.subr.bf16.mxu0 %v5520_v35  ;;  %v5538_v27 = vpack.c.bf16 %v2822_v22, %v2814_v15  ;;  %v5602_v35 = vpack.c.bf16 %v2824_v7, %v2816_v28  ;;  %v5604_v41 = vpack.c.bf16 %v2841_v19, %v2833_v46  ;;  %v2894_v28 = vld [vmem:[#allocation10 + $0x780] sm:$0xff]  ;;  %v2896_v7 = vld [vmem:[#allocation10 + $0x790] sm:$0xff]  ;;  %v2659_v46 = vld [vmem:[#allocation10 + $0x28] sm:$0xff] }
 0x6ad   : > { %5585 = vmatprep.subr.bf16.mxu1 %v5584_v59  ;;  %v2832_v59 = vld [vmem:[#allocation10 + $0x590] sm:$0xff]  ;;  %v5618_v15 = vpack.c.bf16 %v2888_v58, %v2880_v54  ;;  %v5556_v22 = vpack.c.bf16 %v2903_v60, %v2895_v1  ;;  %v2667_v19 = vld [vmem:[#allocation10 + $0x68] sm:$0xff]  ;;  %v2725_v60 = vld [vmem:[#allocation10 + $0x238] sm:$0xff] }
 0x6ae   : > { %v5606_v11 = vpack.c.bf16 %v2840_v42, %v2832_v59  ;;  %v2658_v59 = vld [vmem:[#allocation10 + $0x20] sm:$0xff]  ;;  %v2708_v54 = vld [vmem:[#allocation10 + $0x1b0] sm:$0xff]  ;;  %v2723_v58 = vld [vmem:[#allocation10 + $0x228] sm:$0xff] }
 0x6af   : > { %5523 = vmatpush1.bf16.msra.mxu0 %v5522_v47  ;;  %v2857_v47 = vld [vmem:[#allocation10 + $0x658] sm:$0xff]  ;;  %v2731_v1 = vld [vmem:[#allocation10 + $0x268] sm:$0xff] }
 0x6b0   : > { %5587 = vmatpush1.bf16.msra.mxu1 %v5586_v2  ;;  %5525 = vmatprep.subr.bf16.mxu0 %v5524_v10  ;;  %v2106_v2 = vsub.f32 %v6995_v50, %v7022_v52  ;;  %v5542_v10 = vpack.c.bf16 %v2838_v40, %v2830_v55  ;;  %v5608_v48 = vpack.c.bf16 %v2857_v47, %v2849_v9  ;;  %v2675_v9 = vld [vmem:[#allocation10 + $0xa8] sm:$0xff] }
 0x6b1   : > { %5589 = vmatprep.subr.bf16.mxu1 %v5588_v14  ;;  %v2854_v14 = vld [vmem:[#allocation10 + $0x640] sm:$0xff]  ;;  %v5610_v50 = vpack.c.bf16 %v2856_v20, %v2848_v18  ;;  %v5548_v52 = vpack.c.bf16 %v2871_v30, %v2863_v21  ;;  %v5622_v55 = vpack.c.bf16 %v2904_v8, %v2896_v7  ;;  %v5624_v40 = vpack.c.bf16 %v2667_v19, %v2659_v46  ;;  %v2683_v47 = vld [vmem:[#allocation10 + $0xe8] sm:$0xff]  ;;  %v2676_v18 = vld [vmem:[#allocation10 + $0xb0] sm:$0xff] }
 0x6b2   : > { %v5546_v49 = vpack.c.bf16 %v2854_v14, %v2846_v13  ;;  %v2674_v13 = vld [vmem:[#allocation10 + $0xa0] sm:$0xff]  ;;  %v5628_v20 = vpack.c.bf16 %v2683_v47, %v2675_v9  ;;  %v2684_v21 = vld [vmem:[#allocation10 + $0xf0] sm:$0xff]  ;;  %v2691_v30 = vld [vmem:[#allocation10 + $0x128] sm:$0xff] }
 0x6b3   : > { %5527 = vmatpush1.bf16.msra.mxu0 %v5526_v31  ;;  %v2865_v31 = vld [vmem:[#allocation10 + $0x698] sm:$0xff]  ;;  %v2682_v14 = vld [vmem:[#allocation10 + $0xe0] sm:$0xff]  ;;  %v2739_v8 = vld [vmem:[#allocation10 + $0x2a8] sm:$0xff] }
 0x6b4   : > { %5591 = vmatpush1.bf16.msra.mxu1 %v5590_v33  ;;  %5529 = vmatprep.subr.bf16.mxu0 %v5528_v34  ;;  %v2873_v33 = vld [vmem:[#allocation10 + $0x6d8] sm:$0xff]  ;;  %v2108_v34 = vmin.f32 %v2106_v2, 60.0  ;;  %v2747_v46 = vld [vmem:[#allocation10 + $0x2e8] sm:$0xff] }
 0x6b5   : > { %5593 = vmatprep.subr.bf16.mxu1 %v5592_v38  ;;  %v2864_v38 = vld [vmem:[#allocation10 + $0x690] sm:$0xff]  ;;  %v5612_v25 = vpack.c.bf16 %v2873_v33, %v2865_v31  ;;  %v2699_v31 = vld [vmem:[#allocation10 + $0x168] sm:$0xff]  ;;  %v2741_v19 = vld [vmem:[#allocation10 + $0x2b8] sm:$0xff] }
 0x6b6   : > { %v5614_v16 = vpack.c.bf16 %v2872_v39, %v2864_v38  ;;  %v2698_v38 = vld [vmem:[#allocation10 + $0x160] sm:$0xff]  ;;  %v2763_v9 = vld [vmem:[#allocation10 + $0x368] sm:$0xff]  ;;  %v2757_v47 = vld [vmem:[#allocation10 + $0x338] sm:$0xff] }
 0x6b7   : > { %5531 = vmatpush1.bf16.msra.mxu0 %v5530_v44  ;;  %v2889_v44 = vld [vmem:[#allocation10 + $0x758] sm:$0xff] }
 0x6b8   : > { %5595 = vmatpush1.bf16.msra.mxu1 %v5594_v32  ;;  %5533 = vmatprep.subr.bf16.mxu0 %v5532_v17  ;;  %v2110_v32 = vmul.f32 1.442695, %v2108_v34  ;;  %v5550_v17 = vpack.c.bf16 %v2870_v63, %v2862_v62  ;;  %v5616_v23 = vpack.c.bf16 %v2889_v44, %v2881_v56  ;;  %v2693_v34 = vld [vmem:[#allocation10 + $0x138] sm:$0xff]  ;;  %v5632_v62 = vpack.c.bf16 %v2699_v31, %v2691_v30  ;;  %v2690_v63 = vld [vmem:[#allocation10 + $0x120] sm:$0xff]  ;;  %v2715_v56 = vld [vmem:[#allocation10 + $0x1e8] sm:$0xff] }
 0x6b9   : > { %5597 = vmatprep.subr.bf16.mxu1 %v5596_v57  ;;  %v2886_v57 = vld [vmem:[#allocation10 + $0x740] sm:$0xff]  ;;  %v2709_v44 = vld [vmem:[#allocation10 + $0x1b8] sm:$0xff]  ;;  %v2771_v30 = vld [vmem:[#allocation10 + $0x3a8] sm:$0xff] }
 0x6ba   : > { %6183 = vpow2.f32 %v2110_v32  ;;  %v2717_v32 = vld [vmem:[#allocation10 + $0x1f8] sm:$0xff]  ;;  %v2779_v31 = vld [vmem:[#allocation10 + $0x3e8] sm:$0xff] }
 0x6bb   : > { %5535 = vmatpush1.bf16.msra.mxu0 %v5534_v61  ;;  %v2897_v61 = vld [vmem:[#allocation10 + $0x798] sm:$0xff] }
 0x6bc   : > { %5599 = vmatpush1.bf16.msra.mxu1 %v5598_v4  ;;  %5537 = vmatprep.subr.bf16.mxu0 %v5536_v6  ;;  %v2905_v4 = vld [vmem:[#allocation10 + $0x7d8] sm:$0xff]  ;;  %v5554_v6 = vpack.c.bf16 %v2886_v57, %v2878_v24  ;;  %v2706_v24 = vld [vmem:[#allocation10 + $0x1a0] sm:$0xff] }
 0x6bd   : > { %5601 = vmatprep.subr.bf16.mxu1 %v5600_v37  ;;  %v2902_v37 = vld [vmem:[#allocation10 + $0x7c0] sm:$0xff]  ;;  %v5620_v43 = vpack.c.bf16 %v2905_v4, %v2897_v61  ;;  %v2733_v61 = vld [vmem:[#allocation10 + $0x278] sm:$0xff] }
 0x6be   : > { %v2714_v57 = vld [vmem:[#allocation10 + $0x1e0] sm:$0xff]  ;;  %v5704_v7 = vpack.c.bf16 %v2733_v61, %v2725_v60  ;;  %v2813_v60 = vld [vmem:[#allocation10 + $0x4f8] sm:$0xff] }
 0x6bf   : > { %5539 = vmatpush1.bf16.msra.mxu0 %v5538_v27  ;;  %v2661_v27 = vld [vmem:[#allocation10 + $0x38] sm:$0xff]  ;;  %v5638_v4 = vpack.c.bf16 %v2714_v57, %v2706_v24  ;;  %v2794_v24 = vld [vmem:[#allocation10 + $0x460] sm:$0xff]  ;;  %v2788_v57 = vld [vmem:[#allocation10 + $0x430] sm:$0xff] }
 0x6c0   : > { %5603 = vmatpush1.bf16.msra.mxu1 %v5602_v35  ;;  %5541 = vmatprep.subr.bf16.mxu0 %v5540_v36  ;;  %v2669_v35 = vld [vmem:[#allocation10 + $0x78] sm:$0xff]  ;;  %v5558_v36 = vpack.c.bf16 %v2902_v37, %v2894_v28  ;;  %v2730_v28 = vld [vmem:[#allocation10 + $0x260] sm:$0xff]  ;;  %v2724_v37 = vld [vmem:[#allocation10 + $0x230] sm:$0xff] }
 0x6c1   : > { %5605 = vmatprep.subr.bf16.mxu1 %v5604_v41  ;;  %v2666_v41 = vld [vmem:[#allocation10 + $0x60] sm:$0xff]  ;;  %v5688_v42 = vpack.c.bf16 %v2669_v35, %v2661_v27  ;;  %v2749_v27 = vld [vmem:[#allocation10 + $0x2f8] sm:$0xff] }
 0x6c2   : > { %v5626_v2 = vpack.c.bf16 %v2666_v41, %v2658_v59  ;;  %v2746_v59 = vld [vmem:[#allocation10 + $0x2e0] sm:$0xff]  ;;  %v2740_v41 = vld [vmem:[#allocation10 + $0x2b0] sm:$0xff] }
 0x6c3   : > { %5543 = vmatpush1.bf16.msra.mxu0 %v5542_v10  ;;  %v2677_v10 = vld [vmem:[#allocation10 + $0xb8] sm:$0xff] }
 0x6c4   : > { %5607 = vmatpush1.bf16.msra.mxu1 %v5606_v11  ;;  %5545 = vmatprep.subr.bf16.mxu0 %v5544_v12  ;;  %v2685_v11 = vld [vmem:[#allocation10 + $0xf8] sm:$0xff]  ;;  %v5690_v12 = vpack.c.bf16 %v2668_v5, %v2660_v3  ;;  %v2748_v3 = vld [vmem:[#allocation10 + $0x2f0] sm:$0xff]  ;;  %v2755_v5 = vld [vmem:[#allocation10 + $0x328] sm:$0xff] }
 0x6c5   : > { %5609 = vmatprep.subr.bf16.mxu1 %v5608_v48  ;;  %v7056_v48 = vpop.eup %6183  ;;  %v5692_v33 = vpack.c.bf16 %v2685_v11, %v2677_v10  ;;  %v5710_v11 = vpack.c.bf16 %v2748_v3, %v2740_v41  ;;  %v2835_v3 = vld [vmem:[#allocation10 + $0x5a8] sm:$0xff] }
 0x6c7   : > { %5547 = vmatpush1.bf16.msra.mxu0 %v5546_v49  ;;  %v2701_v49 = vld [vmem:[#allocation10 + $0x178] sm:$0xff] }
 0x6c8   : > { %5611 = vmatpush1.bf16.msra.mxu1 %v5610_v50  ;;  %5549 = vmatprep.subr.bf16.mxu0 %v5548_v52  ;;  %v5630_v50 = vpack.c.bf16 %v2682_v14, %v2674_v13  ;;  %v5694_v52 = vpack.c.bf16 %v2684_v21, %v2676_v18  ;;  %v5696_v39 = vpack.c.bf16 %v2701_v49, %v2693_v34  ;;  %v2754_v13 = vld [vmem:[#allocation10 + $0x320] sm:$0xff]  ;;  %v2756_v18 = vld [vmem:[#allocation10 + $0x330] sm:$0xff]  ;;  %v2781_v34 = vld [vmem:[#allocation10 + $0x3f8] sm:$0xff] }
 0x6c9   : > { %5613 = vmatprep.subr.bf16.mxu1 %v5612_v25  ;;  %v2692_v25 = vld [vmem:[#allocation10 + $0x130] sm:$0xff]  ;;  %v2762_v14 = vld [vmem:[#allocation10 + $0x360] sm:$0xff] }
 0x6ca   : > { %v2764_v21 = vld [vmem:[#allocation10 + $0x370] sm:$0xff]  ;;  %v5650_v49 = vpack.c.bf16 %v2762_v14, %v2754_v13  ;;  %v2842_v13 = vld [vmem:[#allocation10 + $0x5e0] sm:$0xff] }
 0x6cb   : > { %5551 = vmatpush1.bf16.msra.mxu0 %v5550_v17  ;;  %v5634_v17 = vpack.c.bf16 %v2698_v38, %v2690_v63  ;;  %v2778_v63 = vld [vmem:[#allocation10 + $0x3e0] sm:$0xff]  ;;  %v2772_v38 = vld [vmem:[#allocation10 + $0x3b0] sm:$0xff] }
 0x6cc   : > { %5615 = vmatpush1.bf16.msra.mxu1 %v5614_v16  ;;  %5553 = vmatprep.subr.bf16.mxu0 %v5552_v29  ;;  %v5698_v16 = vpack.c.bf16 %v2700_v53, %v2692_v25  ;;  %v5636_v29 = vpack.c.bf16 %v2715_v56, %v2707_v45  ;;  %v2787_v53 = vld [vmem:[#allocation10 + $0x428] sm:$0xff]  ;;  %v2789_v56 = vld [vmem:[#allocation10 + $0x438] sm:$0xff]  ;;  %v2836_v14 = vld [vmem:[#allocation10 + $0x5b0] sm:$0xff] }
 0x6cd   : > { %5617 = vmatprep.subr.bf16.mxu1 %v5616_v23  ;;  %v5700_v23 = vpack.c.bf16 %v2717_v32, %v2709_v44  ;;  %v2795_v45 = vld [vmem:[#allocation10 + $0x468] sm:$0xff]  ;;  %v2797_v44 = vld [vmem:[#allocation10 + $0x478] sm:$0xff] }
 0x6cf   : > { %5555 = vmatpush1.bf16.msra.mxu0 %v5554_v6 }
 0x6d0   : > { %5619 = vmatpush1.bf16.msra.mxu1 %v5618_v15  ;;  %5557 = vmatprep.subr.bf16.mxu0 %v5556_v22  ;;  %v5640_v15 = vpack.c.bf16 %v2731_v1, %v2723_v58  ;;  %v2722_v22 = vld [vmem:[#allocation10 + $0x220] sm:$0xff]  ;;  %v2811_v58 = vld [vmem:[#allocation10 + $0x4e8] sm:$0xff]  ;;  %v2805_v1 = vld [vmem:[#allocation10 + $0x4b8] sm:$0xff] }
 0x6d1   : > { %5621 = vmatprep.subr.bf16.mxu1 %v5620_v43  ;;  %v2732_v43 = vld [vmem:[#allocation10 + $0x270] sm:$0xff]  ;;  %v5642_v35 = vpack.c.bf16 %v2730_v28, %v2722_v22  ;;  %v2810_v22 = vld [vmem:[#allocation10 + $0x4e0] sm:$0xff] }
 0x6d2   : > { %v2804_v28 = vld [vmem:[#allocation10 + $0x4b0] sm:$0xff] }
 0x6d3   : > { %5559 = vmatpush1.bf16.msra.mxu0 %v5558_v36  ;;  %v5706_v36 = vpack.c.bf16 %v2732_v43, %v2724_v37  ;;  %v5724_v37 = vpack.c.bf16 %v2813_v60, %v2805_v1  ;;  %v2819_v43 = vld [vmem:[#allocation10 + $0x528] sm:$0xff]  ;;  %v2893_v1 = vld [vmem:[#allocation10 + $0x778] sm:$0xff] }
 0x6d4   : > { %5623 = vmatpush1.bf16.msra.mxu1 %v5622_v55  ;;  %5625 = vmatprep.subr.bf16.mxu0 %v5624_v40  ;;  %v5644_v55 = vpack.c.bf16 %v2747_v46, %v2739_v8  ;;  %v2738_v40 = vld [vmem:[#allocation10 + $0x2a0] sm:$0xff]  ;;  %v2827_v8 = vld [vmem:[#allocation10 + $0x568] sm:$0xff]  ;;  %v2821_v46 = vld [vmem:[#allocation10 + $0x538] sm:$0xff] }
 0x6d5   : > { %5689 = vmatprep.subr.bf16.mxu1 %v5688_v42  ;;  %v5708_v42 = vpack.c.bf16 %v2749_v27, %v2741_v19  ;;  %v5646_v10 = vpack.c.bf16 %v2746_v59, %v2738_v40  ;;  %v2829_v19 = vld [vmem:[#allocation10 + $0x578] sm:$0xff]  ;;  %v2826_v40 = vld [vmem:[#allocation10 + $0x560] sm:$0xff]  ;;  %v2820_v59 = vld [vmem:[#allocation10 + $0x530] sm:$0xff] }
 0x6d6   : > { %2975 = vmatmul.mubr.f32.vlgmr.msra.gmra.mrb[8].mxu0 %v7056_v48  ;;  %v5728_v41 = vpack.c.bf16 %v2829_v19, %v2821_v46  ;;  %v2909_v46 = vld [vmem:[#allocation10 + $0x7f8] sm:$0xff] }
 0x6d7   : > { %3046 = vmatmul.mubr.f32.vlgmr.msra.gmra.mrb[12].mxu1 %v7056_v48  ;;  %5627 = vmatpush1.bf16.msra.mxu0 %v5626_v2  ;;  %v2765_v2 = vld [vmem:[#allocation10 + $0x378] sm:$0xff] }
 0x6d8   : > { %3116 = vmatprep.mubr.f32.mxu0 %v7048_v51  ;;  %5691 = vmatpush1.bf16.msra.mxu1 %v5690_v12  ;;  %v5648_v12 = vpack.c.bf16 %v2763_v9, %v2755_v5  ;;  %v2843_v5 = vld [vmem:[#allocation10 + $0x5e8] sm:$0xff]  ;;  %v2837_v9 = vld [vmem:[#allocation10 + $0x5b8] sm:$0xff] }
 0x6d9   : > { %3187 = vmatprep.mubr.f32.mxu1 %v7048_v51  ;;  %5629 = vmatprep.subr.bf16.mxu0 %v5628_v20  ;;  %v2716_v51 = vld [vmem:[#allocation10 + $0x1f0] sm:$0xff]  ;;  %v5712_v20 = vpack.c.bf16 %v2765_v2, %v2757_v47  ;;  %v2845_v47 = vld [vmem:[#allocation10 + $0x5f8] sm:$0xff] }
 0x6da   : > { %5693 = vmatprep.subr.bf16.mxu1 %v5692_v33  ;;  %v5702_v6 = vpack.c.bf16 %v2716_v51, %v2708_v54  ;;  %v2773_v33 = vld [vmem:[#allocation10 + $0x3b8] sm:$0xff]  ;;  %v5720_v54 = vpack.c.bf16 %v2797_v44, %v2789_v56  ;;  %v2803_v51 = vld [vmem:[#allocation10 + $0x4a8] sm:$0xff] }
 0x6db   : > { %5631 = vmatpush1.bf16.msra.mxu0 %v5630_v50  ;;  %v5714_v50 = vpack.c.bf16 %v2764_v21, %v2756_v18  ;;  %v5716_v25 = vpack.c.bf16 %v2781_v34, %v2773_v33  ;;  %v5732_v18 = vpack.c.bf16 %v2845_v47, %v2837_v9  ;;  %v2851_v21 = vld [vmem:[#allocation10 + $0x628] sm:$0xff]  ;;  %v2861_v33 = vld [vmem:[#allocation10 + $0x678] sm:$0xff] }
 0x6dc   : > { %5695 = vmatpush1.bf16.msra.mxu1 %v5694_v52  ;;  %5633 = vmatprep.subr.bf16.mxu0 %v5632_v62  ;;  %v5652_v52 = vpack.c.bf16 %v2779_v31, %v2771_v30  ;;  %v2770_v62 = vld [vmem:[#allocation10 + $0x3a0] sm:$0xff]  ;;  %v2859_v30 = vld [vmem:[#allocation10 + $0x668] sm:$0xff]  ;;  %v2853_v31 = vld [vmem:[#allocation10 + $0x638] sm:$0xff] }
 0x6dd   : > { %5697 = vmatprep.subr.bf16.mxu1 %v5696_v39  ;;  %v2780_v39 = vld [vmem:[#allocation10 + $0x3f0] sm:$0xff]  ;;  %v5654_v32 = vpack.c.bf16 %v2778_v63, %v2770_v62  ;;  %v2858_v62 = vld [vmem:[#allocation10 + $0x660] sm:$0xff]  ;;  %v2877_v56 = vld [vmem:[#allocation10 + $0x6f8] sm:$0xff] }
 0x6de   : > { %v2852_v63 = vld [vmem:[#allocation10 + $0x630] sm:$0xff] }
 0x6df   : > { %5635 = vmatpush1.bf16.msra.mxu0 %v5634_v17  ;;  %v5718_v17 = vpack.c.bf16 %v2780_v39, %v2772_v38  ;;  %v5736_v38 = vpack.c.bf16 %v2861_v33, %v2853_v31  ;;  %v2867_v39 = vld [vmem:[#allocation10 + $0x6a8] sm:$0xff] }
 0x6e0   : > { %5699 = vmatpush1.bf16.msra.mxu1 %v5698_v16  ;;  %5637 = vmatprep.subr.bf16.mxu0 %v5636_v29  ;;  %v5656_v16 = vpack.c.bf16 %v2795_v45, %v2787_v53  ;;  %v2786_v29 = vld [vmem:[#allocation10 + $0x420] sm:$0xff]  ;;  %v2875_v53 = vld [vmem:[#allocation10 + $0x6e8] sm:$0xff]  ;;  %v2869_v45 = vld [vmem:[#allocation10 + $0x6b8] sm:$0xff] }
 0x6e1   : > { %5701 = vmatprep.subr.bf16.mxu1 %v5700_v23  ;;  %v2796_v23 = vld [vmem:[#allocation10 + $0x470] sm:$0xff]  ;;  %v5658_v61 = vpack.c.bf16 %v2794_v24, %v2786_v29  ;;  %v2874_v29 = vld [vmem:[#allocation10 + $0x6e0] sm:$0xff] }
 0x6e2   : > { %v2868_v24 = vld [vmem:[#allocation10 + $0x6b0] sm:$0xff] }
 0x6e3   : > { %5639 = vmatpush1.bf16.msra.mxu0 %v5638_v4  ;;  %v5722_v4 = vpack.c.bf16 %v2796_v23, %v2788_v57  ;;  %v5740_v57 = vpack.c.bf16 %v2877_v56, %v2869_v45  ;;  %v2883_v23 = vld [vmem:[#allocation10 + $0x728] sm:$0xff]  ;;  %v3210_v56 = vld [vmem:[#allocation11 + $0x40] sm:$0xff] }
 0x6e4   : > { %5703 = vmatpush1.bf16.msra.mxu1 %v5702_v6  ;;  %5641 = vmatprep.subr.bf16.mxu0 %v5640_v15  ;;  %v5660_v6 = vpack.c.bf16 %v2811_v58, %v2803_v51  ;;  %v2802_v15 = vld [vmem:[#allocation10 + $0x4a0] sm:$0xff]  ;;  %v2891_v51 = vld [vmem:[#allocation10 + $0x768] sm:$0xff]  ;;  %v2885_v58 = vld [vmem:[#allocation10 + $0x738] sm:$0xff] }
 0x6e5   : > { %5705 = vmatprep.subr.bf16.mxu1 %v5704_v7  ;;  %v2812_v7 = vld [vmem:[#allocation10 + $0x4f0] sm:$0xff]  ;;  %v5662_v27 = vpack.c.bf16 %v2810_v22, %v2802_v15  ;;  %v2890_v15 = vld [vmem:[#allocation10 + $0x760] sm:$0xff] }
 0x6e6   : > { %v2884_v22 = vld [vmem:[#allocation10 + $0x730] sm:$0xff] }
 0x6e7   : > { %5643 = vmatpush1.bf16.msra.mxu0 %v5642_v35  ;;  %v5726_v35 = vpack.c.bf16 %v2812_v7, %v2804_v28  ;;  %v5744_v28 = vpack.c.bf16 %v2893_v1, %v2885_v58  ;;  %v2899_v7 = vld [vmem:[#allocation10 + $0x7a8] sm:$0xff] }
 0x6e8   : > { %5707 = vmatpush1.bf16.msra.mxu1 %v5706_v36  ;;  %5645 = vmatprep.subr.bf16.mxu0 %v5644_v55  ;;  %v5664_v36 = vpack.c.bf16 %v2827_v8, %v2819_v43  ;;  %v2818_v55 = vld [vmem:[#allocation10 + $0x520] sm:$0xff]  ;;  %v2907_v43 = vld [vmem:[#allocation10 + $0x7e8] sm:$0xff]  ;;  %v2901_v8 = vld [vmem:[#allocation10 + $0x7b8] sm:$0xff] }
 0x6e9   : > { %5709 = vmatprep.subr.bf16.mxu1 %v5708_v42  ;;  %v2828_v42 = vld [vmem:[#allocation10 + $0x570] sm:$0xff]  ;;  %v5666_v2 = vpack.c.bf16 %v2826_v40, %v2818_v55  ;;  %v2906_v55 = vld [vmem:[#allocation10 + $0x7e0] sm:$0xff]  ;;  %v5748_v40 = vpack.c.bf16 %v2909_v46, %v2901_v8  ;;  %v3217_v8 = vld [vmem:[#allocation11 + $0x78] sm:$0xff] }
 0x6ea   : > { %v3250_v46 = vld [vmem:[#allocation11 + $0x180] sm:$0xff] }
 0x6eb   : > { %5647 = vmatpush1.bf16.msra.mxu0 %v5646_v10  ;;  %v5730_v10 = vpack.c.bf16 %v2828_v42, %v2820_v59  ;;  %v2900_v59 = vld [vmem:[#allocation10 + $0x7b0] sm:$0xff]  ;;  %v3218_v42 = vld [vmem:[#allocation11 + $0x80] sm:$0xff] }
 0x6ec   : > { %5711 = vmatpush1.bf16.msra.mxu1 %v5710_v11  ;;  %5649 = vmatprep.subr.bf16.mxu0 %v5648_v12  ;;  %v5668_v11 = vpack.c.bf16 %v2843_v5, %v2835_v3  ;;  %v2834_v12 = vld [vmem:[#allocation10 + $0x5a0] sm:$0xff]  ;;  %v3219_v3 = vld [vmem:[#allocation11 + $0x88] sm:$0xff] }
 0x6ed   : > { %5713 = vmatprep.subr.bf16.mxu1 %v5712_v20  ;;  %v2844_v20 = vld [vmem:[#allocation10 + $0x5f0] sm:$0xff]  ;;  %v5670_v34 = vpack.c.bf16 %v2842_v13, %v2834_v12  ;;  %v5752_v47 = vpack.c.bf16 %v3219_v3, %v3218_v42  ;;  %v3221_v12 = vld [vmem:[#allocation11 + $0x98] sm:$0xff] }
 0x6ee   : > { %v3284_v3 = vld [vmem:[#allocation11 + $0x290] sm:$0xff] }
 0x6ef   : > { %5651 = vmatpush1.bf16.msra.mxu0 %v5650_v49  ;;  %v5734_v49 = vpack.c.bf16 %v2844_v20, %v2836_v14  ;;  %v3205_v20 = vld [vmem:[#allocation11 + $0x18] sm:$0xff] }
 0x6f0   : > { %5715 = vmatpush1.bf16.msra.mxu1 %v5714_v50  ;;  %5653 = vmatprep.subr.bf16.mxu0 %v5652_v52  ;;  %v5672_v50 = vpack.c.bf16 %v2859_v30, %v2851_v21  ;;  %v2850_v52 = vld [vmem:[#allocation10 + $0x620] sm:$0xff]  ;;  %v3223_v30 = vld [vmem:[#allocation11 + $0xa8] sm:$0xff] }
 0x6f1   : > { %5717 = vmatprep.subr.bf16.mxu1 %v5716_v25  ;;  %v2860_v25 = vld [vmem:[#allocation10 + $0x670] sm:$0xff]  ;;  %v5674_v44 = vpack.c.bf16 %v2858_v62, %v2850_v52  ;;  %v3222_v21 = vld [vmem:[#allocation11 + $0xa0] sm:$0xff]  ;;  %v3225_v52 = vld [vmem:[#allocation11 + $0xb8] sm:$0xff] }
 0x6f2   : > { %v5760_v33 = vpack.c.bf16 %v3223_v30, %v3222_v21  ;;  %v3288_v21 = vld [vmem:[#allocation11 + $0x2b0] sm:$0xff]  ;;  %v3289_v30 = vld [vmem:[#allocation11 + $0x2b8] sm:$0xff] }
 0x6f3   : > { %5655 = vmatpush1.bf16.msra.mxu0 %v5654_v32  ;;  %v5738_v32 = vpack.c.bf16 %v2860_v25, %v2852_v63  ;;  %v3209_v25 = vld [vmem:[#allocation11 + $0x38] sm:$0xff] }
 0x6f4   : > { %5719 = vmatpush1.bf16.msra.mxu1 %v5718_v17  ;;  %5657 = vmatprep.subr.bf16.mxu0 %v5656_v16  ;;  %v5676_v17 = vpack.c.bf16 %v2875_v53, %v2867_v39  ;;  %v2866_v16 = vld [vmem:[#allocation10 + $0x6a0] sm:$0xff]  ;;  %v3227_v53 = vld [vmem:[#allocation11 + $0xc8] sm:$0xff] }
 0x6f5   : > { %5721 = vmatprep.subr.bf16.mxu1 %v5720_v54  ;;  %v2876_v54 = vld [vmem:[#allocation10 + $0x6f0] sm:$0xff]  ;;  %v5678_v60 = vpack.c.bf16 %v2874_v29, %v2866_v16  ;;  %v3226_v39 = vld [vmem:[#allocation11 + $0xc0] sm:$0xff] }
 0x6f7   : > { %5659 = vmatpush1.bf16.msra.mxu0 %v5658_v61  ;;  %v5742_v61 = vpack.c.bf16 %v2876_v54, %v2868_v24  ;;  %v3212_v24 = vld [vmem:[#allocation11 + $0x50] sm:$0xff]  ;;  %v3230_v54 = vld [vmem:[#allocation11 + $0xe0] sm:$0xff] }
 0x6f8   : > { %5723 = vmatpush1.bf16.msra.mxu1 %v5722_v4  ;;  %5661 = vmatprep.subr.bf16.mxu0 %v5660_v6  ;;  %v5680_v4 = vpack.c.bf16 %v2891_v51, %v2883_v23  ;;  %v2882_v6 = vld [vmem:[#allocation10 + $0x720] sm:$0xff]  ;;  %v3231_v23 = vld [vmem:[#allocation11 + $0xe8] sm:$0xff] }
 0x6f9   : > { %5725 = vmatprep.subr.bf16.mxu1 %v5724_v37  ;;  %v2892_v37 = vld [vmem:[#allocation10 + $0x770] sm:$0xff]  ;;  %v5682_v19 = vpack.c.bf16 %v2890_v15, %v2882_v6 }
 0x6fb   : > { %5663 = vmatpush1.bf16.msra.mxu0 %v5662_v27  ;;  %v5746_v27 = vpack.c.bf16 %v2892_v37, %v2884_v22  ;;  %v3232_v22 = vld [vmem:[#allocation11 + $0xf0] sm:$0xff] }
 0x6fc   : > { %5727 = vmatpush1.bf16.msra.mxu1 %v5726_v35  ;;  %5665 = vmatprep.subr.bf16.mxu0 %v5664_v36  ;;  %v5684_v35 = vpack.c.bf16 %v2907_v43, %v2899_v7  ;;  %v2898_v36 = vld [vmem:[#allocation10 + $0x7a0] sm:$0xff]  ;;  %v3216_v43 = vld [vmem:[#allocation11 + $0x70] sm:$0xff] }
 0x6fd   : > { %5729 = vmatprep.subr.bf16.mxu1 %v5728_v41  ;;  %v2908_v41 = vld [vmem:[#allocation10 + $0x7f0] sm:$0xff]  ;;  %v5686_v5 = vpack.c.bf16 %v2906_v55, %v2898_v36  ;;  %v3282_v36 = vld [vmem:[#allocation11 + $0x280] sm:$0xff]  ;;  %v3283_v55 = vld [vmem:[#allocation11 + $0x288] sm:$0xff] }
 0x6fe   : > { %v5750_v9 = vpack.c.bf16 %v2908_v41, %v2900_v59  ;;  %v3266_v59 = vld [vmem:[#allocation11 + $0x200] sm:$0xff]  ;;  %v3267_v41 = vld [vmem:[#allocation11 + $0x208] sm:$0xff] }
 0x6ff   : > { %5667 = vmatpush1.bf16.msra.mxu0 %v5666_v2  ;;  %v3202_v2 = vld [vmem:[#allocation11] sm:$0xff]  ;;  %v5818_v42 = vpack.c.bf16 %v3267_v41, %v3266_v59 }
 0x700   : > { %5731 = vmatpush1.bf16.msra.mxu1 %v5730_v10  ;;  %5669 = vmatprep.subr.bf16.mxu0 %v5668_v11  ;;  %v3203_v10 = vld [vmem:[#allocation11 + $0x8] sm:$0xff]  ;;  %v3220_v11 = vld [vmem:[#allocation11 + $0x90] sm:$0xff] }
 0x701   : > { %5733 = vmatprep.subr.bf16.mxu1 %v5732_v18  ;;  %v5754_v13 = vpack.c.bf16 %v3203_v10, %v3202_v2  ;;  %v5756_v14 = vpack.c.bf16 %v3221_v12, %v3220_v11  ;;  %v3204_v18 = vld [vmem:[#allocation11 + $0x10] sm:$0xff]  ;;  %v3269_v2 = vld [vmem:[#allocation11 + $0x218] sm:$0xff]  ;;  %v3286_v11 = vld [vmem:[#allocation11 + $0x2a0] sm:$0xff] }
 0x702   : > { %v5758_v31 = vpack.c.bf16 %v3205_v20, %v3204_v18  ;;  %v3287_v12 = vld [vmem:[#allocation11 + $0x2a8] sm:$0xff] }
 0x703   : > { %5671 = vmatpush1.bf16.msra.mxu0 %v5670_v34  ;;  %v3206_v34 = vld [vmem:[#allocation11 + $0x20] sm:$0xff]  ;;  %v3271_v18 = vld [vmem:[#allocation11 + $0x228] sm:$0xff] }
 0x704   : > { %5735 = vmatpush1.bf16.msra.mxu1 %v5734_v49  ;;  %5673 = vmatprep.subr.bf16.mxu0 %v5672_v50  ;;  %v3207_v49 = vld [vmem:[#allocation11 + $0x28] sm:$0xff]  ;;  %v3224_v50 = vld [vmem:[#allocation11 + $0xb0] sm:$0xff] }
 0x705   : > { %5737 = vmatprep.subr.bf16.mxu1 %v5736_v38  ;;  %v5762_v62 = vpack.c.bf16 %v3207_v49, %v3206_v34  ;;  %v5764_v63 = vpack.c.bf16 %v3225_v52, %v3224_v50  ;;  %v3208_v38 = vld [vmem:[#allocation11 + $0x30] sm:$0xff]  ;;  %v3273_v34 = vld [vmem:[#allocation11 + $0x238] sm:$0xff]  ;;  %v3290_v50 = vld [vmem:[#allocation11 + $0x2c0] sm:$0xff] }
 0x706   : > { %v5766_v45 = vpack.c.bf16 %v3209_v25, %v3208_v38  ;;  %v3291_v52 = vld [vmem:[#allocation11 + $0x2c8] sm:$0xff] }
 0x707   : > { %5675 = vmatpush1.bf16.msra.mxu0 %v5674_v44  ;;  %v3211_v44 = vld [vmem:[#allocation11 + $0x48] sm:$0xff] }
 0x708   : > { %5739 = vmatpush1.bf16.msra.mxu1 %v5738_v32  ;;  %5677 = vmatprep.subr.bf16.mxu0 %v5676_v17  ;;  %v3228_v32 = vld [vmem:[#allocation11 + $0xd0] sm:$0xff]  ;;  %v3229_v17 = vld [vmem:[#allocation11 + $0xd8] sm:$0xff]  ;;  %v5770_v16 = vpack.c.bf16 %v3211_v44, %v3210_v56  ;;  %v3275_v38 = vld [vmem:[#allocation11 + $0x248] sm:$0xff] }
 0x709   : > { %5741 = vmatprep.subr.bf16.mxu1 %v5740_v57  ;;  %v5772_v29 = vpack.c.bf16 %v3229_v17, %v3228_v32  ;;  %v3213_v57 = vld [vmem:[#allocation11 + $0x58] sm:$0xff]  ;;  %v3294_v32 = vld [vmem:[#allocation11 + $0x2e0] sm:$0xff]  ;;  %v3295_v17 = vld [vmem:[#allocation11 + $0x2e8] sm:$0xff] }
 0x70a   : > { %v5774_v51 = vpack.c.bf16 %v3213_v57, %v3212_v24  ;;  %v3277_v56 = vld [vmem:[#allocation11 + $0x258] sm:$0xff]  ;;  %v3279_v24 = vld [vmem:[#allocation11 + $0x268] sm:$0xff] }
 0x70b   : > { %5679 = vmatpush1.bf16.msra.mxu0 %v5678_v60  ;;  %v5776_v60 = vpack.c.bf16 %v3231_v23, %v3230_v54 }
 0x70c   : > { %5743 = vmatpush1.bf16.msra.mxu1 %v5742_v61  ;;  %5681 = vmatprep.subr.bf16.mxu0 %v5680_v4  ;;  %v3214_v61 = vld [vmem:[#allocation11 + $0x60] sm:$0xff]  ;;  %v3215_v4 = vld [vmem:[#allocation11 + $0x68] sm:$0xff] }
 0x70d   : > { %5745 = vmatprep.subr.bf16.mxu1 %v5744_v28  ;;  %v3233_v28 = vld [vmem:[#allocation11 + $0xf8] sm:$0xff]  ;;  %v5778_v37 = vpack.c.bf16 %v3215_v4, %v3214_v61 }
 0x70e   : > { %v5780_v7 = vpack.c.bf16 %v3233_v28, %v3232_v22  ;;  %v3280_v28 = vld [vmem:[#allocation11 + $0x270] sm:$0xff] }
 0x70f   : > { %5683 = vmatpush1.bf16.msra.mxu0 %v5682_v19  ;;  %v3251_v19 = vld [vmem:[#allocation11 + $0x188] sm:$0xff] }
 0x710   : > { %5747 = vmatpush1.bf16.msra.mxu1 %v5746_v27  ;;  %5685 = vmatprep.subr.bf16.mxu0 %v5684_v35  ;;  %v5782_v27 = vpack.c.bf16 %v3217_v8, %v3216_v43  ;;  %v5784_v35 = vpack.c.bf16 %v3251_v19, %v3250_v46  ;;  %v3234_v43 = vld [vmem:[#allocation11 + $0x100] sm:$0xff]  ;;  %v3235_v8 = vld [vmem:[#allocation11 + $0x108] sm:$0xff]  ;;  %v3252_v19 = vld [vmem:[#allocation11 + $0x190] sm:$0xff] }
 0x711   : > { %5749 = vmatprep.subr.bf16.mxu1 %v5748_v40  ;;  %v5816_v40 = vpack.c.bf16 %v3283_v55, %v3282_v36 }
 0x713   : > { %5687 = vmatpush1.bf16.msra.mxu0 %v5686_v5  ;;  %v3285_v5 = vld [vmem:[#allocation11 + $0x298] sm:$0xff] }
 0x714   : > { %5751 = vmatpush1.bf16.msra.mxu1 %v5750_v9  ;;  %5817 = vmatprep.subr.bf16.mxu0 %v5816_v40  ;;  %v5820_v9 = vpack.c.bf16 %v3285_v5, %v3284_v3 }
 0x715   : > { %5753 = vmatprep.subr.bf16.mxu1 %v5752_v47  ;;  %v3268_v47 = vld [vmem:[#allocation11 + $0x210] sm:$0xff] }
 0x716   : > { %3117 = vmatmul.mubr.f32.vlgmr.msra.gmra.mrb[10].mxu0 %v7056_v48  ;;  %v5822_v10 = vpack.c.bf16 %v3269_v2, %v3268_v47  ;;  %v3237_v47 = vld [vmem:[#allocation11 + $0x118] sm:$0xff]  ;;  %v3254_v2 = vld [vmem:[#allocation11 + $0x1a0] sm:$0xff] }
 0x717   : > { %3188 = vmatmul.mubr.f32.vlgmr.msra.gmra.mrb[14].mxu1 %v7056_v48  ;;  %v5768_v48 = vpack.c.bf16 %v3227_v53, %v3226_v39  ;;  %5819 = vmatpush3.bf16.msra.mxu0 %v5818_v42  ;;  %v3292_v39 = vld [vmem:[#allocation11 + $0x2d0] sm:$0xff]  ;;  %v3293_v53 = vld [vmem:[#allocation11 + $0x2d8] sm:$0xff]  ;;  %v5786_v42 = vpack.c.bf16 %v3235_v8, %v3234_v43 }
 0x718   : > { %5755 = vmatpush3.bf16.msra.mxu1 %v5754_v13  ;;  %5821 = vmatprep.subr.bf16.mxu0 %v5820_v9  ;;  %v5824_v13 = vpack.c.bf16 %v3287_v12, %v3286_v11  ;;  %v3236_v9 = vld [vmem:[#allocation11 + $0x110] sm:$0xff]  ;;  %v3239_v12 = vld [vmem:[#allocation11 + $0x128] sm:$0xff]  ;;  %v3317_v8 = vld [vmem:[#allocation11 + $0x398] sm:$0xff] }
 0x719   : > { %5757 = vmatprep.subr.bf16.mxu1 %v5756_v14  ;;  %v3270_v14 = vld [vmem:[#allocation11 + $0x220] sm:$0xff]  ;;  %v3316_v43 = vld [vmem:[#allocation11 + $0x390] sm:$0xff] }
 0x71a   : > { %v5826_v20 = vpack.c.bf16 %v3271_v18, %v3270_v14  ;;  %v3240_v18 = vld [vmem:[#allocation11 + $0x130] sm:$0xff] }
 0x71b   : > { %5823 = vmatpush3.bf16.msra.mxu0 %v5822_v10  ;;  %v3255_v10 = vld [vmem:[#allocation11 + $0x1a8] sm:$0xff] }
 0x71c   : > { %5759 = vmatpush3.bf16.msra.mxu1 %v5758_v31  ;;  %5825 = vmatprep.subr.bf16.mxu0 %v5824_v13  ;;  %v5828_v31 = vpack.c.bf16 %v3289_v30, %v3288_v21  ;;  %v5792_v11 = vpack.c.bf16 %v3255_v10, %v3254_v2  ;;  %v3256_v13 = vld [vmem:[#allocation11 + $0x1b0] sm:$0xff]  ;;  %v3258_v21 = vld [vmem:[#allocation11 + $0x1c0] sm:$0xff]  ;;  %v3259_v30 = vld [vmem:[#allocation11 + $0x1c8] sm:$0xff] }
 0x71d   : > { %5761 = vmatprep.subr.bf16.mxu1 %v5760_v33  ;;  %v3272_v33 = vld [vmem:[#allocation11 + $0x230] sm:$0xff] }
 0x71e   : > { %v5830_v49 = vpack.c.bf16 %v3273_v34, %v3272_v33  ;;  %v5800_v33 = vpack.c.bf16 %v3259_v30, %v3258_v21  ;;  %v3242_v34 = vld [vmem:[#allocation11 + $0x140] sm:$0xff]  ;;  %v3304_v10 = vld [vmem:[#allocation11 + $0x330] sm:$0xff]  ;;  %v3309_v30 = vld [vmem:[#allocation11 + $0x358] sm:$0xff] }
 0x71f   : > { %5827 = vmatpush3.bf16.msra.mxu0 %v5826_v20  ;;  %v3241_v20 = vld [vmem:[#allocation11 + $0x138] sm:$0xff]  ;;  %v3308_v21 = vld [vmem:[#allocation11 + $0x350] sm:$0xff] }
 0x720   : > { %5763 = vmatpush3.bf16.msra.mxu1 %v5762_v62  ;;  %5829 = vmatprep.subr.bf16.mxu0 %v5828_v31  ;;  %v5832_v62 = vpack.c.bf16 %v3291_v52, %v3290_v50  ;;  %v5798_v31 = vpack.c.bf16 %v3241_v20, %v3240_v18  ;;  %v3260_v50 = vld [vmem:[#allocation11 + $0x1d0] sm:$0xff]  ;;  %v3261_v52 = vld [vmem:[#allocation11 + $0x1d8] sm:$0xff] }
 0x721   : > { %5765 = vmatprep.subr.bf16.mxu1 %v5764_v63  ;;  %v3274_v63 = vld [vmem:[#allocation11 + $0x240] sm:$0xff] }
 0x722   : > { %v5834_v25 = vpack.c.bf16 %v3275_v38, %v3274_v63  ;;  %v5804_v63 = vpack.c.bf16 %v3261_v52, %v3260_v50  ;;  %v3244_v38 = vld [vmem:[#allocation11 + $0x150] sm:$0xff]  ;;  %v3310_v50 = vld [vmem:[#allocation11 + $0x360] sm:$0xff]  ;;  %v3311_v52 = vld [vmem:[#allocation11 + $0x368] sm:$0xff] }
 0x723   : > { %5831 = vmatpush3.bf16.msra.mxu0 %v5830_v49  ;;  %v3243_v49 = vld [vmem:[#allocation11 + $0x148] sm:$0xff] }
 0x724   : > { %5767 = vmatpush3.bf16.msra.mxu1 %v5766_v45  ;;  %5833 = vmatprep.subr.bf16.mxu0 %v5832_v62  ;;  %v5836_v45 = vpack.c.bf16 %v3293_v53, %v3292_v39  ;;  %v5802_v62 = vpack.c.bf16 %v3243_v49, %v3242_v34  ;;  %v3262_v39 = vld [vmem:[#allocation11 + $0x1e0] sm:$0xff]  ;;  %v3263_v53 = vld [vmem:[#allocation11 + $0x1e8] sm:$0xff]  ;;  %v5870_v34 = vpack.c.bf16 %v3309_v30, %v3308_v21 }
 0x725   : > { %5769 = vmatprep.subr.bf16.mxu1 %v5768_v48  ;;  %v3276_v48 = vld [vmem:[#allocation11 + $0x250] sm:$0xff]  ;;  %v3622_v21 = vld [vmem:[#allocation13 + $0x60] sm:$0xff]  ;;  %v3623_v30 = vld [vmem:[#allocation13 + $0x68] sm:$0xff] }
 0x726   : > { %v5838_v44 = vpack.c.bf16 %v3277_v56, %v3276_v48  ;;  %v5808_v48 = vpack.c.bf16 %v3263_v53, %v3262_v39  ;;  %v3246_v56 = vld [vmem:[#allocation11 + $0x160] sm:$0xff]  ;;  %v3312_v39 = vld [vmem:[#allocation11 + $0x370] sm:$0xff]  ;;  %v3313_v53 = vld [vmem:[#allocation11 + $0x378] sm:$0xff] }
 0x727   : > { %5835 = vmatpush3.bf16.msra.mxu0 %v5834_v25  ;;  %v3245_v25 = vld [vmem:[#allocation11 + $0x158] sm:$0xff] }
 0x728   : > { %5771 = vmatpush3.bf16.msra.mxu1 %v5770_v16  ;;  %5837 = vmatprep.subr.bf16.mxu0 %v5836_v45  ;;  %v5840_v16 = vpack.c.bf16 %v3295_v17, %v3294_v32  ;;  %v5806_v45 = vpack.c.bf16 %v3245_v25, %v3244_v38  ;;  %v3264_v32 = vld [vmem:[#allocation11 + $0x1f0] sm:$0xff]  ;;  %v3265_v17 = vld [vmem:[#allocation11 + $0x1f8] sm:$0xff]  ;;  %v5874_v38 = vpack.c.bf16 %v3311_v52, %v3310_v50 }
 0x729   : > { %v7064_v58 = vpop.f32.mrb[4].mxu0  ;;  %v7066_v1 = vpop.f32.mrb[8].mxu1  ;;  %5773 = vmatprep.subr.bf16.mxu1 %v5772_v29  ;;  %v3278_v29 = vld [vmem:[#allocation11 + $0x260] sm:$0xff]  ;;  %v3625_v50 = vld [vmem:[#allocation13 + $0x78] sm:$0xff] }
 0x72a   : > { %v7068_v6 = vpop.f32.mrb[5].mxu0  ;;  %v7070_v15 = vpop.f32.mrb[9].mxu1  ;;  %v5842_v57 = vpack.c.bf16 %v3279_v24, %v3278_v29  ;;  %v5812_v29 = vpack.c.bf16 %v3265_v17, %v3264_v32  ;;  %v3248_v24 = vld [vmem:[#allocation11 + $0x170] sm:$0xff] }
 0x72b   : > { %5839 = vmatpush3.bf16.msra.mxu0 %v5838_v44  ;;  %v3247_v44 = vld [vmem:[#allocation11 + $0x168] sm:$0xff] }
 0x72c   : > { %5775 = vmatpush3.bf16.msra.mxu1 %v5774_v51  ;;  %5841 = vmatprep.subr.bf16.mxu0 %v5840_v16  ;;  %v3296_v51 = vld [vmem:[#allocation11 + $0x2f0] sm:$0xff]  ;;  %v5810_v16 = vpack.c.bf16 %v3247_v44, %v3246_v56 }
 0x72d   : > { %5777 = vmatprep.subr.bf16.mxu1 %v5776_v60  ;;  %v3297_v60 = vld [vmem:[#allocation11 + $0x2f8] sm:$0xff] }
 0x72e   : > { %v5844_v22 = vpack.c.bf16 %v3297_v60, %v3296_v51  ;;  %v3314_v51 = vld [vmem:[#allocation11 + $0x380] sm:$0xff]  ;;  %v3315_v60 = vld [vmem:[#allocation11 + $0x388] sm:$0xff] }
 0x72f   : > { %5843 = vmatpush3.bf16.msra.mxu0 %v5842_v57  ;;  %v3249_v57 = vld [vmem:[#allocation11 + $0x178] sm:$0xff] }
 0x730   : > { %5779 = vmatpush3.bf16.msra.mxu1 %v5778_v37  ;;  %v3281_v37 = vld [vmem:[#allocation11 + $0x278] sm:$0xff]  ;;  %5845 = vmatprep.subr.bf16.mxu0 %v5844_v22  ;;  %v5814_v22 = vpack.c.bf16 %v3249_v57, %v3248_v24  ;;  %v3610_v57 = vld [vmem:[#allocation13] sm:$0xff] }
 0x731   : > { %5781 = vmatprep.subr.bf16.mxu1 %v5780_v7  ;;  %v5846_v7 = vpack.c.bf16 %v3281_v37, %v3280_v28  ;;  %v5848_v28 = vpack.c.bf16 %v3315_v60, %v3314_v51  ;;  %v3298_v37 = vld [vmem:[#allocation11 + $0x300] sm:$0xff]  ;;  %v3611_v51 = vld [vmem:[#allocation13 + $0x8] sm:$0xff]  ;;  %v3612_v60 = vld [vmem:[#allocation13 + $0x10] sm:$0xff] }
 0x733   : > { %5847 = vmatpush3.bf16.msra.mxu0 %v5846_v7  ;;  %v3299_v7 = vld [vmem:[#allocation11 + $0x308] sm:$0xff] }
 0x734   : > { %5783 = vmatpush3.bf16.msra.mxu1 %v5782_v27  ;;  %v3253_v27 = vld [vmem:[#allocation11 + $0x198] sm:$0xff] }
 0x735   : > { %5785 = vmatprep.subr.bf16.mxu1 %v5784_v35  ;;  %v5788_v5 = vpack.c.bf16 %v3253_v27, %v3252_v19  ;;  %v5852_v19 = vpack.c.bf16 %v3317_v8, %v3316_v43  ;;  %v3300_v27 = vld [vmem:[#allocation11 + $0x310] sm:$0xff] }
 0x769   : > { %v7072_v54 = vpop.f32.mrb[6].mxu0  ;;  %v7074_v23 = vpop.f32.mrb[10].mxu1 }
 0x76a   : > { %v7076_v61 = vpop.f32.mrb[7].mxu0  ;;  %v7078_v4 = vpop.f32.mrb[11].mxu1 }
 0x7a9   : > { %v2976_v46 = vpop.f32.mrb[8].mxu0 }
 0x7aa   : > { %v3194_v35 = vmul.f32 %v2976_v46, %v7064_v58  ;;  %v3047_v36 = vpop.f32.mrb[12].mxu1  ;;  %v2978_v55 = vpop.f32.mrb[9].mxu0  ;;  %v5790_v58 = vpack.c.bf16 %v3237_v47, %v3236_v9  ;;  %v5850_v46 = vpack.c.bf16 %v3299_v7, %v3298_v37  ;;  %v3321_v9 = vld [vmem:[#allocation11 + $0x3b8] sm:$0xff]  ;;  %v3614_v7 = vld [vmem:[#allocation13 + $0x20] sm:$0xff] }
 0x7ab   : > { %v7082_v40 = vmul.f32 %v3047_v36, %v7066_v1  ;;  %v3195_v59 = vmul.f32 %v2978_v55, %v7068_v6  ;;  %v3049_v41 = vpop.f32.mrb[13].mxu1  ;;  %v3238_v1 = vld [vmem:[#allocation11 + $0x120] sm:$0xff]  ;;  %v3257_v6 = vld [vmem:[#allocation11 + $0x1b8] sm:$0xff]  ;;  %v3319_v55 = vld [vmem:[#allocation11 + $0x3a8] sm:$0xff]  ;;  %v3639_v8 = vand.u32 4294901760, %v3614_v7 }
 0x7ac   : > { %v3197_v3 = vmul.f32 %v3049_v41, %v7070_v15  ;;  %v5794_v14 = vpack.c.bf16 %v3239_v12, %v3238_v1  ;;  %v5796_v15 = vpack.c.bf16 %v3257_v6, %v3256_v13  ;;  %v3318_v36 = vld [vmem:[#allocation11 + $0x3a0] sm:$0xff]  ;;  %v3323_v1 = vld [vmem:[#allocation11 + $0x3c8] sm:$0xff]  ;;  %v3613_v37 = vld [vmem:[#allocation13 + $0x18] sm:$0xff] }
 0x7ad   : > { %3394 = vmatprep.mubr.f32.mxu1 %v3195_v59  ;;  %v5856_v41 = vpack.c.bf16 %v3319_v55, %v3318_v36  ;;  %v3306_v13 = vld [vmem:[#allocation11 + $0x340] sm:$0xff]  ;;  %v3307_v6 = vld [vmem:[#allocation11 + $0x348] sm:$0xff]  ;;  %v3636_v43 = vand.u32 4294901760, %v3613_v37 }
 0x7ae   : > { %3395 = vmatmul.mubr.f32.vlgmr.msra.gmra.mrb[16].mxu1 %v3194_v35  ;;  %v3301_v35 = vld [vmem:[#allocation11 + $0x318] sm:$0xff]  ;;  %v5866_v18 = vpack.c.bf16 %v3307_v6, %v3306_v13  ;;  %v3620_v6 = vld [vmem:[#allocation13 + $0x50] sm:$0xff] }
 0x7af   : > { %5787 = vmatpush3.bf16.msra.mxu1 %v5786_v42  ;;  %3464 = vmatprep.mubr.f32.mxu1 %v3197_v3  ;;  %v5854_v59 = vpack.c.bf16 %v3301_v35, %v3300_v27  ;;  %v3302_v42 = vld [vmem:[#allocation11 + $0x320] sm:$0xff]  ;;  %v3303_v3 = vld [vmem:[#allocation11 + $0x328] sm:$0xff] }
 0x7b0   : > { %5789 = vmatprep.subr.bf16.mxu1 %v5788_v5  ;;  %v3320_v5 = vld [vmem:[#allocation11 + $0x3b0] sm:$0xff]  ;;  %v5858_v47 = vpack.c.bf16 %v3303_v3, %v3302_v42 }
 0x7b1   : > { %v5860_v2 = vpack.c.bf16 %v3321_v9, %v3320_v5 }
 0x7b3   : > { %5791 = vmatpush3.bf16.msra.mxu1 %v5790_v58  ;;  %v3305_v58 = vld [vmem:[#allocation11 + $0x338] sm:$0xff] }
 0x7b4   : > { %5793 = vmatprep.subr.bf16.mxu1 %v5792_v11  ;;  %v3322_v11 = vld [vmem:[#allocation11 + $0x3c0] sm:$0xff]  ;;  %v5862_v12 = vpack.c.bf16 %v3305_v58, %v3304_v10 }
 0x7b7   : > { %5795 = vmatpush3.bf16.msra.mxu1 %v5794_v14  ;;  %v3324_v14 = vld [vmem:[#allocation11 + $0x3d0] sm:$0xff] }
 0x7b8   : > { %5797 = vmatprep.subr.bf16.mxu1 %v5796_v15  ;;  %v3325_v15 = vld [vmem:[#allocation11 + $0x3d8] sm:$0xff] }
 0x7b9   : > { %v5868_v20 = vpack.c.bf16 %v3325_v15, %v3324_v14  ;;  %v3621_v14 = vld [vmem:[#allocation13 + $0x58] sm:$0xff]  ;;  %v3657_v15 = vand.u32 4294901760, %v3620_v6 }
 0x7bb   : > { %5799 = vmatpush3.bf16.msra.mxu1 %v5798_v31  ;;  %v3326_v31 = vld [vmem:[#allocation11 + $0x3e0] sm:$0xff] }
 0x7bc   : > { %5801 = vmatprep.subr.bf16.mxu1 %v5800_v33  ;;  %v3327_v33 = vld [vmem:[#allocation11 + $0x3e8] sm:$0xff] }
 0x7bd   : > { %v5872_v49 = vpack.c.bf16 %v3327_v33, %v3326_v31  ;;  %v3663_v31 = vand.u32 4294901760, %v3622_v21  ;;  %v3666_v33 = vand.u32 4294901760, %v3623_v30 }
 0x7bf   : > { %5803 = vmatpush3.bf16.msra.mxu1 %v5802_v62  ;;  %v3328_v62 = vld [vmem:[#allocation11 + $0x3f0] sm:$0xff] }
 0x7c0   : > { %5805 = vmatprep.subr.bf16.mxu1 %v5804_v63  ;;  %v3329_v63 = vld [vmem:[#allocation11 + $0x3f8] sm:$0xff] }
 0x7c1   : > { %v5876_v25 = vpack.c.bf16 %v3329_v63, %v3328_v62  ;;  %v7138_v63 = vsub.f32 %v3620_v6, %v3657_v15 }
 0x7c3   : > { %5807 = vmatpush3.bf16.msra.mxu1 %v5806_v45  ;;  %v5878_v45 = vpack.c.bf16 %v3313_v53, %v3312_v39  ;;  %v7145_v39 = vsub.f32 %v3623_v30, %v3666_v33 }
 0x7c4   : > { %5809 = vmatprep.subr.bf16.mxu1 %v5808_v48 }
 0x7c7   : > { %5811 = vmatpush3.bf16.msra.mxu1 %v5810_v16 }
 0x7c8   : > { %5813 = vmatprep.subr.bf16.mxu1 %v5812_v29 }
 0x7cb   : > { %5815 = vmatpush3.bf16.msra.mxu1 %v5814_v22  ;;  %v6483_v22 = vmov 0.0|0.0  }
 0x7cc   : > { %5849 = vmatprep.subr.bf16.mxu1 %v5848_v28  ;;  %5880 = vmatprep.subr.bf16.mxu0 %v6483_v22  ;;  %v3630_v28 = vand.u32 4294901760, %v3611_v51 }
 0x7ce   : > { %3465 = vmatmul.mubr.f32.vlgmr.msra.gmra.mrb[18].mxu1 %v7082_v40  ;;  %v5864_v40 = vpack.c.bf16 %v3323_v1, %v3322_v11  ;;  %v7096_v36 = vsub.f32 %v3611_v51, %v3630_v28  ;;  %v3618_v11 = vld [vmem:[#allocation13 + $0x40] sm:$0xff]  ;;  %v3619_v1 = vld [vmem:[#allocation13 + $0x48] sm:$0xff] }
 0x7cf   : > { %5851 = vmatpush3.bf16.msra.mxu1 %v5850_v46 }
 0x7d0   : > { %5853 = vmatprep.subr.bf16.mxu1 %v5852_v19  ;;  %v3617_v19 = vld [vmem:[#allocation13 + $0x38] sm:$0xff] }
 0x7d1   : > { %v3648_v9 = vand.u32 4294901760, %v3617_v19 }
 0x7d3   : > { %5855 = vmatpush3.bf16.msra.mxu1 %v5854_v59  ;;  %v7100_v59 = vsub.f32 %v3613_v37, %v3636_v43 }
 0x7d4   : > { %5857 = vmatprep.subr.bf16.mxu1 %v5856_v41  ;;  %v7102_v41 = vsub.f32 %v3614_v7, %v3639_v8 }
 0x7d7   : > { %5859 = vmatpush3.bf16.msra.mxu1 %v5858_v47 }
 0x7d8   : > { %5861 = vmatprep.subr.bf16.mxu1 %v5860_v2  ;;  %v7112_v2 = vsub.f32 %v3617_v19, %v3648_v9 }
 0x7db   : > { %5863 = vmatpush3.bf16.msra.mxu1 %v5862_v12  ;;  %v3651_v12 = vand.u32 4294901760, %v3618_v11 }
 0x7dc   : > { %5865 = vmatprep.subr.bf16.mxu1 %v5864_v40  ;;  %v3654_v40 = vand.u32 4294901760, %v3619_v1 }
 0x7dd   : > { %v7134_v52 = vsub.f32 %v3618_v11, %v3651_v12 }
 0x7de   : > { %v7124_v13 = vpack.c.bf16 %v3654_v40, %v3651_v12  ;;  %v7136_v62 = vsub.f32 %v3619_v1, %v3654_v40 }
 0x7df   : > { %5867 = vmatpush3.bf16.msra.mxu1 %v5866_v18  ;;  %v3660_v18 = vand.u32 4294901760, %v3621_v14 }
 0x7e0   : > { %5869 = vmatprep.subr.bf16.mxu1 %v5868_v20 }
 0x7e1   : > { %v7128_v20 = vpack.c.bf16 %v3660_v18, %v3657_v15  ;;  %v7424_v15 = vand.u32 4294901760, %v7134_v52 }
 0x7e3   : > { %5871 = vmatpush3.bf16.msra.mxu1 %v5870_v34  ;;  %v7132_v34 = vpack.c.bf16 %v3666_v33, %v3663_v31  ;;  %v3777_v30 = vsub.f32 %v7134_v52, %v7424_v15 }
 0x7e4   : > { %5873 = vmatprep.subr.bf16.mxu1 %v5872_v49  ;;  %v3624_v49 = vld [vmem:[#allocation13 + $0x70] sm:$0xff] }
 0x7e5   : > { %v3669_v53 = vand.u32 4294901760, %v3624_v49  ;;  %v3778_v33 = vand.u32 4294901760, %v3777_v30 }
 0x7e7   : > { %5875 = vmatpush3.bf16.msra.mxu1 %v5874_v38  ;;  %v7140_v38 = vsub.f32 %v3621_v14, %v3660_v18  ;;  %v7423_v18 = vand.u32 4294901760, %v7136_v62 }
 0x7e8   : > { %5877 = vmatprep.subr.bf16.mxu1 %v5876_v25  ;;  %v7143_v25 = vsub.f32 %v3622_v21, %v3663_v31 }
 0x7e9   : > { %v3118_v48 = vpop.f32.mrb[10].mxu0  ;;  %v3784_v31 = vsub.f32 %v7136_v62, %v7423_v18 }
 0x7ea   : > { %v3198_v56 = vmul.f32 %v3118_v48, %v7072_v54  ;;  %v3189_v44 = vpop.f32.mrb[14].mxu1  ;;  %v3120_v32 = vpop.f32.mrb[11].mxu0  ;;  %v3627_v54 = vand.u32 4294901760, %v3610_v57 }
 0x7eb   : > { %v3200_v17 = vmul.f32 %v3189_v44, %v7074_v23  ;;  %v3199_v16 = vmul.f32 %v3120_v32, %v7076_v61  ;;  %v3191_v29 = vpop.f32.mrb[15].mxu1  ;;  %5879 = vmatpush3.bf16.msra.mxu1 %v5878_v45  ;;  %v3633_v23 = vand.u32 4294901760, %v3612_v60  ;;  %v3615_v61 = vld [vmem:[#allocation13 + $0x28] sm:$0xff]  ;;  %v3672_v45 = vand.u32 4294901760, %v3625_v50 }
 0x7ec   : > { %v3201_v24 = vmul.f32 %v3191_v29, %v7078_v4  ;;  %v3642_v46 = vand.u32 4294901760, %v3615_v61  ;;  %v3616_v4 = vld [vmem:[#allocation13 + $0x30] sm:$0xff]  ;;  %v7092_v27 = vpack.c.bf16 %v3630_v28, %v3627_v54  ;;  %v7094_v35 = vsub.f32 %v3610_v57, %v3627_v54 }
 0x7ed   : > { %3534 = vmatprep.mubr.f32.mxu0 %v3199_v16  ;;  %v7098_v55 = vsub.f32 %v3612_v60, %v3633_v23  ;;  %v7105_v42 = vpack.c.bf16 %v3636_v43, %v3633_v23  ;;  %v3645_v5 = vand.u32 4294901760, %v3616_v4  ;;  %v7150_v44 = vpack.c.bf16 %v3672_v45, %v3669_v53 }
 0x7ee   : > { %3604 = vmatprep.mubr.f32.mxu1 %v3201_v24  ;;  %3535 = vmatmul.mubr.f32.vlgmr.msra.gmra.mrb[12].mxu0 %v3198_v56  ;;  %v7107_v3 = vsub.f32 %v3615_v61, %v3642_v46  ;;  %v7115_v10 = vpack.c.bf16 %v3642_v46, %v3639_v8  ;;  %v3720_v48 = vand.u32 4294901760, %v7094_v35  ;;  %v3727_v56 = vand.u32 4294901760, %v7096_v36 }
 0x7ef   : > { %3605 = vmatmul.mubr.f32.vlgmr.msra.gmra.mrb[20].mxu1 %v3200_v17  ;;  %5882 = vmatpush3.bf16.msra.mxu0 %v7092_v27  ;;  %v7110_v47 = vsub.f32 %v3616_v4, %v3645_v5  ;;  %v7119_v58 = vpack.c.bf16 %v3648_v9, %v3645_v5  ;;  %v7152_v32 = vsub.f32 %v3624_v49, %v3669_v53  ;;  %v3734_v24 = vand.u32 4294901760, %v7098_v55 }
 0x7f0   : > { %5883 = vmatprep.subr.bf16.mxu0 %v6483_v22  ;;  %v7154_v17 = vsub.f32 %v3625_v50, %v3672_v45  ;;  %4710 = vmatprep.mubr.msk.f32.mxu0 %vm6484_vm2, %v6481_v0  ;;  %v3721_v16 = vsub.f32 %v7094_v35, %v3720_v48  ;;  %v3728_v29 = vsub.f32 %v7096_v36, %v3727_v56  ;;  %v7429_v57 = vand.u32 4294901760, %v7100_v59 }
 0x7f1   : > { %v3735_v54 = vsub.f32 %v7098_v55, %v3734_v24  ;;  %v7428_v61 = vand.u32 4294901760, %v7102_v41  ;;  %v7427_v43 = vand.u32 4294901760, %v7107_v3  ;;  %v7426_v5 = vand.u32 4294901760, %v7110_v47 }
 0x7f2   : > { %v3722_v51 = vand.u32 4294901760, %v3721_v16  ;;  %v3729_v60 = vand.u32 4294901760, %v3728_v29  ;;  %v3742_v28 = vsub.f32 %v7100_v59, %v7429_v57  ;;  %v7425_v9 = vand.u32 4294901760, %v7112_v2 }
 0x7f3   : > { %5885 = vmatpush3.bf16.msra.mxu0 %v7105_v42  ;;  %v3736_v23 = vand.u32 4294901760, %v3735_v54  ;;  %v3749_v46 = vsub.f32 %v7102_v41, %v7428_v61  ;;  %v3756_v4 = vsub.f32 %v7107_v3, %v7427_v43  ;;  %v3763_v1 = vsub.f32 %v7110_v47, %v7426_v5 }
 0x7f4   : > { %5886 = vmatprep.subr.bf16.mxu0 %v6483_v22  ;;  %v7174_v37 = vpack.c.bf16 %v3729_v60, %v3722_v51  ;;  %v3743_v7 = vand.u32 4294901760, %v3742_v28  ;;  %v3770_v12 = vsub.f32 %v7112_v2, %v7425_v9  ;;  %v3785_v49 = vand.u32 4294901760, %v3784_v31 }
 0x7f5   : > { %v3750_v19 = vand.u32 4294901760, %v3749_v46  ;;  %v3757_v11 = vand.u32 4294901760, %v3756_v4  ;;  %v3764_v6 = vand.u32 4294901760, %v3763_v1  ;;  %v7422_v50 = vand.u32 4294901760, %v7138_v63 }
 0x7f6   : > { %v7178_v8 = vpack.c.bf16 %v3743_v7, %v3736_v23  ;;  %v3771_v14 = vand.u32 4294901760, %v3770_v12  ;;  %v7421_v53 = vand.u32 4294901760, %v7140_v38  ;;  %v5917_v45 = vpack.c.bf16 %v3785_v49, %v3778_v33 }
 0x7f7   : > { %5888 = vmatpush3.bf16.msra.mxu0 %v7115_v10  ;;  %v7194_v40 = vpack.c.bf16 %v3757_v11, %v3750_v19  ;;  %v3791_v16 = vsub.f32 %v7138_v63, %v7422_v50  ;;  %v7420_v54 = vand.u32 4294901760, %v7143_v25  ;;  %v7419_v28 = vand.u32 4294901760, %v7145_v39 }
 0x7f8   : > { %5889 = vmatprep.subr.bf16.mxu0 %v6483_v22  ;;  %v5914_v21 = vpack.c.bf16 %v3771_v14, %v3764_v6  ;;  %v3798_v29 = vsub.f32 %v7140_v38, %v7421_v53  ;;  %v7418_v11 = vand.u32 4294901760, %v7152_v32  ;;  %v7417_v1 = vand.u32 4294901760, %v7154_v17 }
 0x7f9   : > { %v3792_v51 = vand.u32 4294901760, %v3791_v16  ;;  %v3805_v7 = vsub.f32 %v7143_v25, %v7420_v54  ;;  %v3812_v46 = vsub.f32 %v7145_v39, %v7419_v28  ;;  %v5929_v49 = vpack.c.bf16 %v7096_v36, %v7094_v35 }
 0x7fa   : > { %v3799_v60 = vand.u32 4294901760, %v3798_v29  ;;  %v3819_v6 = vsub.f32 %v7152_v32, %v7418_v11  ;;  %v3826_v14 = vsub.f32 %v7154_v17, %v7417_v1  ;;  %v5932_v16 = vpack.c.bf16 %v7100_v59, %v7098_v55 }
 0x7fb   : > { %5891 = vmatpush3.bf16.msra.mxu0 %v7119_v58  ;;  %v3806_v4 = vand.u32 4294901760, %v3805_v7  ;;  %v3813_v19 = vand.u32 4294901760, %v3812_v46  ;;  %v5935_v29 = vpack.c.bf16 %v7107_v3, %v7102_v41  ;;  %v5941_v7 = vpack.c.bf16 %v7136_v62, %v7134_v52 }
 0x7fc   : > { %5892 = vmatprep.subr.bf16.mxu0 %v6483_v22  ;;  %v5920_v23 = vpack.c.bf16 %v3799_v60, %v3792_v51  ;;  %v3820_v30 = vand.u32 4294901760, %v3819_v6  ;;  %v3827_v31 = vand.u32 4294901760, %v3826_v14  ;;  %v5938_v51 = vpack.c.bf16 %v7112_v2, %v7110_v47 }
 0x7fd   : > { %v5923_v12 = vpack.c.bf16 %v3813_v19, %v3806_v4  ;;  %v5944_v19 = vpack.c.bf16 %v7140_v38, %v7138_v63  ;;  %v5947_v6 = vpack.c.bf16 %v7145_v39, %v7143_v25  ;;  %v5950_v14 = vpack.c.bf16 %v7154_v17, %v7152_v32 }
 0x7fe   : > { %v5926_v33 = vpack.c.bf16 %v3827_v31, %v3820_v30  ;;  %v7453_v35 = vand.u32 4294901760, %v7102_v41  ;;  %v7454_v36 = vand.u32 4294901760, %v7107_v3  ;;  %v7456_v55 = vand.u32 4294901760, %v7112_v2 }
 0x7ff   : > { %5894 = vmatpush3.bf16.msra.mxu0 %v7124_v13  ;;  %v7459_v41 = vand.u32 4294901760, %v7138_v63  ;;  %v7460_v3 = vand.u32 4294901760, %v7140_v38  ;;  %v7462_v2 = vand.u32 4294901760, %v7145_v39 }
 0x800   : > { %5895 = vmatprep.subr.bf16.mxu0 %v6483_v22 }
 0x803   : > { %5897 = vmatpush3.bf16.msra.mxu0 %v7128_v20 }
 0x804   : > { %5898 = vmatprep.subr.bf16.mxu0 %v6483_v22 }
 0x807   : > { %5900 = vmatpush3.bf16.msra.mxu0 %v7132_v34 }
 0x808   : > { %5901 = vmatprep.subr.bf16.mxu0 %v6483_v22 }
 0x80b   : > { %5903 = vmatpush3.bf16.msra.mxu0 %v7150_v44 }
 0x80c   : > { %5904 = vmatprep.subr.bf16.mxu0 %v6483_v22 }
 0x881   : > { %v4468_v60 = vpop.f32.mrb[16].mxu1 }
 0x882   : > { %v4469_v46 = vpop.f32.mrb[17].mxu1 }
 0x883   : > { %v4470_v4 = vadd.f32 %v4469_v46, %v4468_v60 }
 0x8a1   : > { %v4503_v30 = vpop.f32.mrb[18].mxu1 }
 0x8a2   : > { %v4504_v31 = vpop.f32.mrb[19].mxu1 }
 0x8a3   : > { %v4505_v1 = vadd.f32 %v4504_v31, %v4503_v30 }
 0x8a5   : > { %v3467_v11 = vadd.f32 %v4505_v1, %v4470_v4 }
 0x8c1   : > { %v4538_v28 = vpop.f32.mrb[12].mxu0 }
 0x8c2   : > { %v4573_v54 = vpop.f32.mrb[20].mxu1  ;;  %v4539_v53 = vpop.f32.mrb[13].mxu0 }
 0x8c3   : > { %v4540_v50 = vadd.f32 %v4539_v53, %v4538_v28  ;;  %v4574_v18 = vpop.f32.mrb[21].mxu1 }
 0x8c4   : > { %v4575_v15 = vadd.f32 %v4574_v18, %v4573_v54 }
 0x8c5   : > { %v3537_v60 = vadd.f32 %v4540_v50, %v3467_v11 }
 0x8c7   : > { %v3607_v46 = vadd.f32 %v4575_v15, %v3537_v60 }
 0x8c9   : > { %v7244_v9 = vand.u32 4294901760, %v3607_v46 }
 0x8cb   : > { %v3708_v5 = vsub.f32 %v3607_v46, %v7244_v9 }
 0x8cd   : > { %v3709_v43 = vand.u32 4294901760, %v3708_v5 }
 0x8cf   : > { %v3710_v61 = vsub.f32 %v3708_v5, %v3709_v43 }
 0x8d1   : > { %v3711_v57 = vand.u32 4294901760, %v3710_v61 }
 0x8d3   : > { %4711 = vmatmul.mubr.f32.vlgmr.msra.gmra.mrb[14].mxu0 %v3711_v57  ;;  %v5977_v57 = vpack.c.bf16 %v3727_v56, %v3720_v48  ;;  %v5983_v48 = vpack.c.bf16 %v7454_v36, %v7453_v35  ;;  %v7455_v56 = vand.u32 4294901760, %v7110_v47  ;;  %v7461_v47 = vand.u32 4294901760, %v7143_v25 }
 0x8d4   : > { %5906 = vmatpush3.bf16.msra.mxu0 %v7174_v37  ;;  %4745 = vmatprep.mubr.msk.f32.mxu0 %vm6484_vm2, %v6481_v0  ;;  %v7452_v37 = vand.u32 4294901760, %v7100_v59 }
 0x8d5   : > { %5907 = vmatprep.subr.bf16.mxu0 %v6483_v22  ;;  %v5986_v59 = vpack.c.bf16 %v7456_v55, %v7455_v56 }
 0x8d6   : > { %v5980_v61 = vpack.c.bf16 %v7452_v37, %v3734_v24  ;;  %v7457_v24 = vand.u32 4294901760, %v7134_v52  ;;  %v7463_v52 = vand.u32 4294901760, %v7152_v32 }
 0x8d8   : > { %5909 = vmatpush3.bf16.msra.mxu0 %v7178_v8 }
 0x8d9   : > { %5910 = vmatprep.subr.bf16.mxu0 %v6483_v22 }
 0x8dc   : > { %5912 = vmatpush3.bf16.msra.mxu0 %v7194_v40  ;;  %v5995_v40 = vpack.c.bf16 %v7462_v2, %v7461_v47 }
 0x8dd   : > { %5913 = vmatprep.subr.bf16.mxu0 %v6483_v22 }
 0x8e0   : > { %5915 = vmatpush3.bf16.msra.mxu0 %v5914_v21 }
 0x8e1   : > { %5916 = vmatprep.subr.bf16.mxu0 %v6483_v22 }
 0x8e4   : > { %5918 = vmatpush3.bf16.msra.mxu0 %v5917_v45 }
 0x8e5   : > { %5919 = vmatprep.subr.bf16.mxu0 %v6483_v22 }
 0x8e8   : > { %5921 = vmatpush3.bf16.msra.mxu0 %v5920_v23 }
 0x8e9   : > { %5922 = vmatprep.subr.bf16.mxu0 %v6483_v22 }
 0x8ec   : > { %5924 = vmatpush3.bf16.msra.mxu0 %v5923_v12 }
 0x8ed   : > { %5925 = vmatprep.subr.bf16.mxu0 %v6483_v22 }
 0x8f0   : > { %5927 = vmatpush3.bf16.msra.mxu0 %v5926_v33 }
 0x8f1   : > { %5928 = vmatprep.subr.bf16.mxu0 %v6483_v22 }
 0x8f3   : > { %4746 = vmatmul.mubr.f32.vlgmr.msra.gmra.mrb[14].mxu0 %v7244_v9 }
 0x8f4   : > { %5930 = vmatpush3.bf16.msra.mxu0 %v5929_v49  ;;  %4780 = vmatprep.mubr.msk.f32.mxu0 %vm6484_vm2, %v6481_v0 }
 0x8f5   : > { %5931 = vmatprep.subr.bf16.mxu0 %v6483_v22 }
 0x8f8   : > { %5933 = vmatpush3.bf16.msra.mxu0 %v5932_v16 }
 0x8f9   : > { %5934 = vmatprep.subr.bf16.mxu0 %v6483_v22 }
 0x8fc   : > { %5936 = vmatpush3.bf16.msra.mxu0 %v5935_v29 }
 0x8fd   : > { %5937 = vmatprep.subr.bf16.mxu0 %v6483_v22 }
 0x900   : > { %5939 = vmatpush3.bf16.msra.mxu0 %v5938_v51 }
 0x901   : > { %5940 = vmatprep.subr.bf16.mxu0 %v6483_v22 }
 0x904   : > { %5942 = vmatpush3.bf16.msra.mxu0 %v5941_v7 }
 0x905   : > { %5943 = vmatprep.subr.bf16.mxu0 %v6483_v22 }
 0x908   : > { %5945 = vmatpush3.bf16.msra.mxu0 %v5944_v19 }
 0x909   : > { %5946 = vmatprep.subr.bf16.mxu0 %v6483_v22 }
 0x90c   : > { %5948 = vmatpush3.bf16.msra.mxu0 %v5947_v6 }
 0x90d   : > { %5949 = vmatprep.subr.bf16.mxu0 %v6483_v22 }
 0x910   : > { %5951 = vmatpush3.bf16.msra.mxu0 %v5950_v14 }
 0x911   : > { %5952 = vmatprep.subr.bf16.mxu0 %v6483_v22 }
 0x913   : > { %4781 = vmatmul.mubr.f32.vlgmr.msra.gmra.mrb[14].mxu0 %v3708_v5  ;;  %v5992_v5 = vpack.c.bf16 %v7460_v3, %v7459_v41 }
 0x914   : > { %5954 = vmatpush3.bf16.msra.mxu0 %v7092_v27  ;;  %4815 = vmatprep.mubr.msk.f32.mxu0 %vm6484_vm2, %v6481_v0 }
 0x915   : > { %5955 = vmatprep.subr.bf16.mxu0 %v6483_v22 }
 0x918   : > { %5957 = vmatpush3.bf16.msra.mxu0 %v7105_v42 }
 0x919   : > { %5958 = vmatprep.subr.bf16.mxu0 %v6483_v22 }
 0x91c   : > { %5960 = vmatpush3.bf16.msra.mxu0 %v7115_v10 }
 0x91d   : > { %5961 = vmatprep.subr.bf16.mxu0 %v6483_v22 }
 0x920   : > { %5963 = vmatpush3.bf16.msra.mxu0 %v7119_v58 }
 0x921   : > { %5964 = vmatprep.subr.bf16.mxu0 %v6483_v22 }
 0x924   : > { %5966 = vmatpush3.bf16.msra.mxu0 %v7124_v13 }
 0x925   : > { %5967 = vmatprep.subr.bf16.mxu0 %v6483_v22 }
 0x928   : > { %5969 = vmatpush3.bf16.msra.mxu0 %v7128_v20 }
 0x929   : > { %5970 = vmatprep.subr.bf16.mxu0 %v6483_v22 }
 0x92c   : > { %5972 = vmatpush3.bf16.msra.mxu0 %v7132_v34 }
 0x92d   : > { %5973 = vmatprep.subr.bf16.mxu0 %v6483_v22 }
 0x930   : > { %5975 = vmatpush3.bf16.msra.mxu0 %v7150_v44 }
 0x931   : > { %5976 = vmatprep.subr.bf16.mxu0 %v6483_v22 }
 0x933   : > { %4816 = vmatmul.mubr.f32.vlgmr.msra.gmra.mrb[14].mxu0 %v3709_v43  ;;  %v7458_v43 = vand.u32 4294901760, %v7136_v62  ;;  %v7464_v62 = vand.u32 4294901760, %v7154_v17 }
 0x934   : > { %5978 = vmatpush3.bf16.msra.mxu0 %v5977_v57  ;;  %4850 = vmatprep.mubr.msk.f32.mxu0 %vm6484_vm2, %v6481_v0 }
 0x935   : > { %5979 = vmatprep.subr.bf16.mxu0 %v6483_v22  ;;  %v5989_v8 = vpack.c.bf16 %v7458_v43, %v7457_v24  ;;  %v5998_v15 = vpack.c.bf16 %v7464_v62, %v7463_v52 }
 0x938   : > { %5981 = vmatpush3.bf16.msra.mxu0 %v5980_v61 }
 0x939   : > { %5982 = vmatprep.subr.bf16.mxu0 %v6483_v22 }
 0x93c   : > { %5984 = vmatpush3.bf16.msra.mxu0 %v5983_v48 }
 0x93d   : > { %5985 = vmatprep.subr.bf16.mxu0 %v6483_v22 }
 0x940   : > { %5987 = vmatpush3.bf16.msra.mxu0 %v5986_v59 }
 0x941   : > { %5988 = vmatprep.subr.bf16.mxu0 %v6483_v22 }
 0x944   : > { %5990 = vmatpush3.bf16.msra.mxu0 %v5989_v8 }
 0x945   : > { %5991 = vmatprep.subr.bf16.mxu0 %v6483_v22 }
 0x948   : > { %5993 = vmatpush3.bf16.msra.mxu0 %v5992_v5 }
 0x949   : > { %5994 = vmatprep.subr.bf16.mxu0 %v6483_v22 }
 0x94c   : > { %5996 = vmatpush3.bf16.msra.mxu0 %v5995_v40 }
 0x94d   : > { %5997 = vmatprep.subr.bf16.mxu0 %v6483_v22 }
 0x950   : > { %5999 = vmatpush3.bf16.msra.mxu0 %v5998_v15 }
 0x951   : > { %6000 = vmatprep.subr.bf16.mxu0 %v6483_v22 }
 0x953   : > { %4851 = vmatmul.mubr.f32.vlgmr.msra.gmra.mrb[14].mxu0 %v7244_v9 }
 0x954   : > { %6002 = vmatpush3.bf16.msra.mxu0 %v7092_v27  ;;  %4885 = vmatprep.mubr.msk.f32.mxu0 %vm6484_vm2, %v6481_v0  ;;  %v4267_v0 = vmul.f32 1.442695, %v7036_v26 }
 0x955   : > { %6003 = vmatprep.subr.bf16.mxu0 %v6483_v22 }
 0x956   : > { %6185 = vpow2.f32 %v4267_v0 }
 0x958   : > { %6005 = vmatpush3.bf16.msra.mxu0 %v7105_v42 }
 0x959   : > { %6006 = vmatprep.subr.bf16.mxu0 %v6483_v22 }
 0x95c   : > { %6008 = vmatpush3.bf16.msra.mxu0 %v7115_v10 }
 0x95d   : > { %6009 = vmatprep.subr.bf16.mxu0 %v6483_v22 }
 0x960   : > { %6011 = vmatpush3.bf16.msra.mxu0 %v7119_v58  ;;  %v6186_v27 = vpop.eup %6185 }
 0x961   : > { %6012 = vmatprep.subr.bf16.mxu0 %v6483_v22 }
 0x964   : > { %6014 = vmatpush3.bf16.msra.mxu0 %v7124_v13 }
 0x965   : > { %6015 = vmatprep.subr.bf16.mxu0 %v6483_v22 }
 0x968   : > { %6017 = vmatpush3.bf16.msra.mxu0 %v7128_v20 }
 0x969   : > { %6018 = vmatprep.subr.bf16.mxu0 %v6483_v22 }
 0x96c   : > { %6020 = vmatpush3.bf16.msra.mxu0 %v7132_v34 }
 0x96d   : > { %6021 = vmatprep.subr.bf16.mxu0 %v6483_v22 }
 0x970   : > { %6023 = vmatpush3.bf16.msra.mxu0 %v7150_v44 }
 0x973   : > { %4886 = vmatmul.mubr.f32.vlgmr.msra.gmra.mrb[14].mxu0 %v7244_v9 }
 0xa46   : > { %v4263_v42 = vpop.f32.mrb[14].mxu0 }
 0xa47   : > { %v4269_v10 = vmul.f32 %v6186_v27, %v4263_v42  ;;  %v4887_v58 = vpop.f32.mrb[15].mxu0 }
 0xa49   : > { %4270 = vst [vmem:[%s407_s10] sm:$0xff] %v4269_v10 }
 0xa4a   : > { %6399 = shalt.err (!%p6396_p3)
}
 0xa4b   : > { %s6400_s1 = scalar_lea.hbm %s7357_s26, 128  ;;  %s6404_s13 = scalar_lea.hbm %s7409_s8, 256 }
 0xa4c   : > { %p6401_p7 = scmp.ne.s32.totalorder %s7357_s26, %s6400_s1  ;;  %p6405_p8 = scmp.lt.u32.totalorder %s7357_s26, %s7409_s8 }
 0xa4d   : > { %p6406_p0 = scmp.lt.u32.totalorder %s6404_s13, %s6400_s1  ;;  %p6408_p6 = scmp.lt.u32.totalorder %s6400_s1, %s7357_s26 }
 0xa4e   : > { %p6402_p9 = pnand %p6401_p7, %p7465_p5 }
 0xa4f   : > { %p6407_p2 = por %p6406_p0, %p6405_p8 }
 0xa50   : > { %p6403_p4 = pneg %p6402_p9 }
 0xa51   : > { %p6409_p10 = por %p6408_p6, %p6407_p2 }
 0xa53   : > { %p6410_p1 = pnand %p6409_p10, %p6403_p4 }
 0xa55   : > { %6413 = shalt.err (!%p6410_p1)
}
 0xa56   : > { %6084 = dma.vmem_to_hbm [thread:$0]  (%p7465_p5), %s7359_s19, 128, %s7357_s26, %s4272_s14  }
 0xa57 PF: > { %s4297_s21 = sand.u32 1, %s6452_s27   ;;  %p7466_p11 = scmp.ne.s32.totalorder %s7443_s9, 0 }
 0xa58   : > { %p7467_p12 = scmp.ge.s32.totalorder %s6464_s30, 2  ;;  %s4298_s22 = scalar_lea.sflag [#allocation4], %s4297_s21 }
 0xa5a   : > { %p6110_p13 = pnand %p7467_p12, %p7466_p11 }
 0xa5c   : > { %6447 = dma.done.wait (!%p6110_p13), %s4298_s22, 128  }
 0xa5d   : > { %6449 = vsyncadd (!%p6110_p13), %s4298_s22, 4294967168  ;;  %p24_p3 = scmp.ge.s32.totalorder %s6722_s23, 4   ;;  %s7468_s27 = smov %s6456_s28 }
 0xa5e   : > { %s7469_s28 = smov %s6460_s29  ;;  %s7470_s29 = smov %s6733_s24 }
 0xa5f   : > { %s7471_s30 = smov %s6722_s23  ;;  %26 = sbr.rel (!%p24_p3) target bundleno = 10 (0xa), region = 124 }
 0xa66   :  { %4303 = vsyncpa [#allocation3], 1 }
 0xa67   :  { %4305 = vsyncpa [#allocation3 + $0x1], 1 }
 0xa68   :  { %4306 = vsyncpa [#allocation6], 1 }
 0xa69   :  { %4307 = vsyncpa [#allocation9], 1 }
 0xa6a   :  { %4308 = vsyncpa [#allocation12], 1 }
 0xa6b   :  { %4309 = vsyncpa [#allocation4], 1 }
 0xa6c   :  { %4311 = vsyncpa [#allocation4 + $0x1], 1 }

</bundles_post_ra>
